<compile_context>
chip_gen: v7x
topology: tpu7x:2x2x1
jax: 0.10.0
libtpu: 0.0.40
codegen_flags: <defaults>
</compile_context>

<pallas_src>
import jax
import jax.numpy as jnp
from jax.experimental import pallas as pl
from jax.experimental.pallas import tpu as pltpu

# Logit value used to neutralize out-of-range (ragged-tile) mask elements:
# sigmoid / softplus of -1e4 underflow to exactly 0.0 in f32, so masked elements
# contribute exactly nothing to num/den/bce partial sums.
_NEG_PAD = -1.0e4


def _round_up(x, m):
    return ((x + m - 1) // m) * m


def _cdiv(a, b):
    return (a + b - 1) // b


def _vmem_budget_bytes():
    """Per-generation VMEM budget: ~3/4 of physical VMEM, capped at 96 MiB.
    v5e/v6e (128 MiB physical) -> 96 MiB ; v7x (64 MiB physical) -> 48 MiB."""
    cap = 64 * 1024 * 1024  # conservative fallback (v7x-sized)
    try:
        cap = int(pltpu.get_tpu_info().vmem_capacity_bytes)
    except Exception:
        pass
    return min((cap * 3) // 4, 96 * 1024 * 1024)


def _choose_tiles(N, H, A, budget, max_tile_n=None, max_tile_h=None):
    """Pick (tn, th) track / hit tile sizes.

    No wrapper-side padding is ever done: a tile dim either equals the full array
    dim or is a multiple of (8, 128); ragged last tiles are masked in-kernel.
    """
    usable = max(int(budget * 0.4), 1 << 20)      # single-copy heavy-block budget
    bytes_per_elem = (A + 1) * 4                  # A head masks + shared target, f32

    tn = N if N <= 256 else 256
    th_fit = max((usable // (bytes_per_elem * tn)) // 128 * 128, 128)
    if H <= th_fit:
        th = H                                    # single hit tile, exact, no mask
        if N > 256:
            # Headroom left: grow the track tile to amortize per-step overhead.
            tn_fit = (usable // (bytes_per_elem * max(th, 1))) // 128 * 128
            tn = int(min(max(256, tn_fit), 1024, _round_up(N, 128)))
    else:
        # Balance hit tiles over round_up(H, 128) so the last tile is not tiny.
        hc = _round_up(H, 128)
        k = _cdiv(hc, th_fit)
        th = _round_up(_cdiv(hc, k), 128)

    # Test-only overrides (must be a multiple of 8 / 128 when smaller than N / H).
    if max_tile_n is not None:
        tn = min(tn, max_tile_n)
    if max_tile_h is not None:
        th = min(th, max_tile_h)
    return tn, th


# ----------------------------------------------------------------------------
# Fused Pallas kernel: per-head, per-track loss partials, tiled over (track, hit)
# ----------------------------------------------------------------------------
def _make_loss_kernel(A, H, th, ragged_h):
    """Grid = (track tiles i [parallel], hit tiles h [arbitrary]).

    refs[:A]   : per-head mask-logit blocks (tn, th)
    refs[A]    : shared mask-target block   (tn, th)
    refs[A+1]  : cls logits, all heads      (tn, A)
    refs[A+2]  : cls targets                (tn, 1)
    refs[A+3]  : properties, all heads      (tn, A, P)
    refs[A+4]  : property targets           (tn, P)
    refs[A+5]  : fused accumulator          (tn, 5*A)  [num|den|bce|cls|prop] x A
                 (resident across the hit-tile axis)
    """
    def kernel(*refs):
        mask_refs = refs[:A]
        tmask_ref, logits_ref, tcls_ref, props_ref, tprops_ref = refs[A:A + 5]
        acc_ref = refs[A + 5]
        h = pl.program_id(1)

        @pl.when(h == 0)
        def _init():
            acc_ref[...] = jnp.zeros_like(acc_ref)
            # Small per-track losses: computed once per track tile (h == 0 only).
            x = logits_ref[...].astype(jnp.float32)                    # (tn, A)
            y = tcls_ref[...].astype(jnp.float32)                      # (tn, 1)
            acc_ref[:, 3 * A:4 * A] = (jnp.maximum(x, 0.0) - x * y
                                       + jnp.log1p(jnp.exp(-jnp.abs(x))))
            d = (props_ref[...].astype(jnp.float32)
                 - tprops_ref[...].astype(jnp.float32)[:, None, :])    # (tn, A, P)
            acc_ref[:, 4 * A:5 * A] = jnp.sum(d * d, axis=-1)

        t = tmask_ref[...].astype(jnp.float32)                         # (tn, th)
        if ragged_h:
            # Last hit tile extends past H: neutralize out-of-range columns.
            col = jax.lax.broadcasted_iota(jnp.int32, t.shape, 1) + h * th
            valid = col < H
            t = jnp.where(valid, t, 0.0)
        t_rowsum = jnp.sum(t, axis=-1, keepdims=True)                  # shared by heads

        for a, m_ref in enumerate(mask_refs):
            m = m_ref[...].astype(jnp.float32)                         # (tn, th)
            if ragged_h:
                m = jnp.where(valid, m, _NEG_PAD)
            # 2 transcendentals / element (exp + log1p) + one EUP reciprocal:
            # sigmoid and both BCE log terms derive from e = exp(-|m|).
            e = jnp.exp(-jnp.abs(m))
            l1pe = jnp.log1p(e)
            sp_pos = jnp.maximum(m, 0.0) + l1pe          # softplus(m)
            sp_neg = sp_pos - m                          # softplus(-m)
            r = pl.reciprocal(1.0 + e)                   # full precision (dice accuracy)
            p = jnp.where(m >= 0.0, r, e * r)            # sigmoid(m)
            logp = jnp.maximum(-sp_neg, -100.0)          # log(p),   clamped like torch
            log1mp = jnp.maximum(-sp_pos, -100.0)        # log(1-p), clamped like torch
            bce_el = -(t * logp + (1.0 - t) * log1mp)

            acc_ref[:, a:a + 1] += jnp.sum(p * t, axis=-1, keepdims=True)
            acc_ref[:, A + a:A + a + 1] += (jnp.sum(p, axis=-1, keepdims=True)
                                            + t_rowsum)
            acc_ref[:, 2 * A + a:2 * A + a + 1] += jnp.sum(bce_el, axis=-1,
                                                           keepdims=True)
    return kernel


# ----------------------------------------------------------------------------
# Pallas wrapper
# ----------------------------------------------------------------------------
def _fused_partial_losses(mask_list, target_masks, logits_all, tcls, props_all,
                          tprops, *, max_tile_n=None, max_tile_h=None):
    """mask_list: A arrays (N, H); target_masks: (N, H); logits_all: (N, A);
    tcls: (N, 1); props_all: (N, A, P); tprops: (N, P).

    Returns per-head (A,) vectors: cls BCE mean, dice, mask BCE mean, prop MSE.
    """
    A = len(mask_list)
    N, H = mask_list[0].shape
    P = props_all.shape[-1]

    budget = _vmem_budget_bytes()
    tn, th = _choose_tiles(N, H, A, budget, max_tile_n, max_tile_h)
    grid_i = _cdiv(N, tn)
    grid_h = _cdiv(H, th)
    ragged_h = grid_h * th > H
    n_out = grid_i * tn
    C = 5 * A

    mask_spec = pl.BlockSpec((tn, th), lambda i, h: (i, h))
    in_specs = ([mask_spec] * A + [
        pl.BlockSpec((tn, th), lambda i, h: (i, h)),       # shared mask targets
        pl.BlockSpec((tn, A), lambda i, h: (i, 0)),        # cls logits, all heads
        pl.BlockSpec((tn, 1), lambda i, h: (i, 0)),        # cls targets
        pl.BlockSpec((tn, A, P), lambda i, h: (i, 0, 0)),  # props, all heads
        pl.BlockSpec((tn, P), lambda i, h: (i, 0)),        # prop targets
    ])
    out_spec = pl.BlockSpec((tn, C), lambda i, h: (i, 0))  # resident over h

    # NOTE: when grid_i == 1 only one track tile exists; a 2-way hit-range split
    # (extra parallel axis + two accumulator columns) would engage both v7x
    # TensorCores — left out here for simplicity.
    acc = pl.pallas_call(
        _make_loss_kernel(A, H, th, ragged_h),
        out_shape=jax.ShapeDtypeStruct((n_out, C), jnp.float32),
        grid=(grid_i, grid_h),
        in_specs=in_specs,
        out_specs=out_spec,
        compiler_params=pltpu.CompilerParams(
            dimension_semantics=("parallel", "arbitrary"),
            vmem_limit_bytes=int(budget)),
    )(*mask_list, target_masks, logits_all, tcls, props_all, tprops)

    acc = acc[:N]                                      # drop ragged track rows
    num = acc[:, 0:A]
    den = acc[:, A:2 * A]
    bce = acc[:, 2 * A:3 * A]
    cls_p = acc[:, 3 * A:4 * A]
    prop = acc[:, 4 * A:5 * A]

    dice = jnp.mean(1.0 - 2.0 * num / (den + 1e-6), axis=0)   # (A,)
    bce_m = jnp.sum(bce, axis=0) / (N * H)                     # (A,)
    cls_m = jnp.sum(cls_p, axis=0) / N                         # (A,)
    mse_m = jnp.sum(prop, axis=0) / (N * P)                    # (A,)
    return cls_m, dice, bce_m, mse_m


def loss_module_forward(track_logits, hit_masks, track_props,
                        target_cls, target_masks, target_props,
                        intermediate_outputs=None,
                        hit_scores=None, hit_targets=None,
                        alpha=1000.0, beta=200.0, gamma=1.0,
                        use_bce_mask=True, aux_loss_weight=0.1,
                        max_tile_n=None, max_tile_h=None):
    """JAX/Pallas equivalent of LossModule.forward (main + aux heads fused)."""
    N, H = hit_masks.shape
    P = track_props.shape[-1]

    # Heavy (N, H) mask logits stay un-stacked: each head is its own pallas input.
    mask_list = [hit_masks]
    logit_cols = [track_logits.reshape(N, 1)]
    prop_heads = [track_props.reshape(N, P)]
    if intermediate_outputs is not None:
        for aux in intermediate_outputs:
            mask_list.append(aux['hit_assignment'])
            logit_cols.append(aux['track_logits'].reshape(N, 1))
            prop_heads.append(aux['track_properties'].reshape(N, P))

    logits_all = jnp.concatenate(logit_cols, axis=1)   # (N, A)   tiny
    props_all = jnp.stack(prop_heads, axis=1)          # (N, A, P) tiny
    tcls = target_cls.reshape(N, 1)
    tprops = target_props.reshape(N, P)

    cls_v, dice_v, bce_v, mse_v = _fused_partial_losses(
        mask_list, target_masks, logits_all, tcls, props_all, tprops,
        max_tile_n=max_tile_n, max_tile_h=max_tile_h)

    mask_v = 0.5 * dice_v + 0.5 * bce_v if use_bce_mask else dice_v
    head_total = alpha * cls_v + beta * mask_v + gamma * mse_v    # (A,)

    total_loss = head_total[0]
    aux_loss = jnp.float32(0.0)
    if intermediate_outputs is not None:
        aux_loss = jnp.sum(head_total[1:]) * aux_loss_weight

    hit_filter_loss = jnp.float32(0.0)
    if hit_scores is not None and hit_targets is not None:
        # (1, H) elementwise + reduce: cheaper as fused XLA than another pallas_call.
        x = hit_scores.astype(jnp.float32)
        y = hit_targets.astype(jnp.float32)
        hit_filter_loss = jnp.mean(jnp.maximum(x, 0.0) - x * y
                                   + jnp.log1p(jnp.exp(-jnp.abs(x))))

    total_loss = total_loss + aux_loss + hit_filter_loss
    return {
        'total': total_loss,
        'cls': alpha * cls_v[0],
        'mask': beta * mask_v[0],
        'param': gamma * mse_v[0],
        'aux': aux_loss,
        'hit_filter': hit_filter_loss,
    }


# ----------------------------------------------------------------------------
# Pure-JAX reference (PyTorch semantics) for the correctness check
# ----------------------------------------------------------------------------
def _ref_forward(track_logits, hit_masks, track_props, target_cls, target_masks,
                 target_props, intermediate_outputs=None, hit_scores=None,
                 hit_targets=None, alpha=1000.0, beta=200.0, gamma=1.0,
                 use_bce_mask=True, aux_loss_weight=0.1):
    def bcewl(x, y):
        return jnp.mean(jnp.maximum(x, 0.0) - x * y + jnp.log1p(jnp.exp(-jnp.abs(x))))

    def dice_fn(p, t):
        num = 2.0 * jnp.sum(p * t, axis=1)
        den = jnp.sum(p + t, axis=1) + 1e-6
        return jnp.mean(1.0 - num / den)

    def bce_prob(p, t):
        lp = jnp.maximum(jnp.log(p), -100.0)
        l1 = jnp.maximum(jnp.log(1.0 - p), -100.0)
        return jnp.mean(-(t * lp + (1.0 - t) * l1))

    def head(logits, masks, props):
        c = bcewl(logits, target_cls)
        p = jax.nn.sigmoid(masks)
        d = dice_fn(p, target_masks)
        m = 0.5 * d + 0.5 * bce_prob(p, target_masks) if use_bce_mask else d
        e = jnp.mean((props - target_props) ** 2)
        return c, m, e

    c, m, e = head(track_logits, hit_masks, track_props)
    total = alpha * c + beta * m + gamma * e
    aux = 0.0
    for a in (intermediate_outputs or []):
        ac, am, ae = head(a['track_logits'], a['hit_assignment'], a['track_properties'])
        aux = aux + alpha * ac + beta * am + gamma * ae
    aux = aux * aux_loss_weight
    hf = bcewl(hit_scores, hit_targets) if hit_scores is not None else 0.0
    return {'total': total + aux + hf, 'cls': alpha * c, 'mask': beta * m,
            'param': gamma * e}


# ----------------------------------------------------------------------------
if __name__ == "__main__":
    key = jax.random.PRNGKey(0)
    N, H, P = 24, 640, 8      # tracks, hits, property dims (small demo sizes)
    ks = jax.random.split(key, 16)

    track_logits = jax.random.normal(ks[0], (N, 1), jnp.float32)
    target_cls = (jax.random.uniform(ks[1], (N, 1)) > 0.5).astype(jnp.float32)
    hit_masks = jax.random.normal(ks[2], (N, H), jnp.float32)
    target_masks = (jax.random.uniform(ks[3], (N, H)) > 0.5).astype(jnp.float32)
    track_props = jax.random.normal(ks[4], (N, P), jnp.float32)
    target_props = jax.random.normal(ks[5], (N, P), jnp.float32)

    intermediate_outputs = [
        {'track_logits': jax.random.normal(ks[6], (N, 1), jnp.float32),
         'hit_assignment': jax.random.normal(ks[7], (N, H), jnp.float32),
         'track_properties': jax.random.normal(ks[8], (N, P), jnp.float32)},
        {'track_logits': jax.random.normal(ks[9], (N, 1), jnp.float32),
         'hit_assignment': jax.random.normal(ks[10], (N, H), jnp.float32),
         'track_properties': jax.random.normal(ks[11], (N, P), jnp.float32)},
    ]
    hit_scores = jax.random.normal(ks[12], (1, H), jnp.float32)
    hit_targets = (jax.random.uniform(ks[13], (1, H)) > 0.5).astype(jnp.float32)

    fwd = jax.jit(loss_module_forward)

    # Full path: main + 2 aux heads + hit-filter loss.
    out = fwd(track_logits, hit_masks, track_props, target_cls, target_masks,
              target_props, intermediate_outputs=intermediate_outputs,
              hit_scores=hit_scores, hit_targets=hit_targets)
    out = jax.tree_util.tree_map(jax.block_until_ready, out)
    ref = _ref_forward(track_logits, hit_masks, track_props, target_cls,
                       target_masks, target_props, intermediate_outputs,
                       hit_scores, hit_targets)
    for k in ('total', 'cls', 'mask', 'param'):
        assert jnp.allclose(out[k], ref[k], rtol=1e-4, atol=1e-3), (k, out[k], ref[k])

    # No-aux / no-hit-filter path.
    out2 = fwd(track_logits, hit_masks, track_props, target_cls, target_masks,
               target_props, intermediate_outputs=None,
               hit_scores=None, hit_targets=None)
    out2 = jax.tree_util.tree_map(jax.block_until_ready, out2)
    ref2 = _ref_forward(track_logits, hit_masks, track_props, target_cls,
                        target_masks, target_props, None, None, None)
    for k in ('total', 'cls', 'mask', 'param'):
        assert jnp.allclose(out2[k], ref2[k], rtol=1e-4, atol=1e-3), (k, out2[k], ref2[k])

    # Ragged multi-tile stress test: N and H not multiples of the (forced small)
    # tiles — exercises the in-kernel iota masking of the last hit tile and the
    # ragged last track tile, with zero wrapper-side padding.
    Ns, Hs, Ps = 300, 700, 8
    ks2 = jax.random.split(jax.random.PRNGKey(1), 10)
    tl = jax.random.normal(ks2[0], (Ns, 1), jnp.float32)
    tc = (jax.random.uniform(ks2[1], (Ns, 1)) > 0.5).astype(jnp.float32)
    hm = jax.random.normal(ks2[2], (Ns, Hs), jnp.float32)
    tm = (jax.random.uniform(ks2[3], (Ns, Hs)) > 0.5).astype(jnp.float32)
    tp = jax.random.normal(ks2[4], (Ns, Ps), jnp.float32)
    tpt = jax.random.normal(ks2[5], (Ns, Ps), jnp.float32)
    aux1 = [{'track_logits': jax.random.normal(ks2[6], (Ns, 1), jnp.float32),
             'hit_assignment': jax.random.normal(ks2[7], (Ns, Hs), jnp.float32),
             'track_properties': jax.random.normal(ks2[8], (Ns, Ps), jnp.float32)}]
    out3 = loss_module_forward(tl, hm, tp, tc, tm, tpt,
                               intermediate_outputs=aux1,
                               max_tile_n=128, max_tile_h=256)
    out3 = jax.tree_util.tree_map(jax.block_until_ready, out3)
    ref3 = _ref_forward(tl, hm, tp, tc, tm, tpt, aux1, None, None)
    for k in ('total', 'cls', 'mask', 'param'):
        assert jnp.allclose(out3[k], ref3[k], rtol=1e-4, atol=1e-3), (k, out3[k], ref3[k])

    print("KERNEL_OK")
</pallas_src>

<mosaic_0001>
module attributes {stable_mosaic.version = 11 : i64} {
  func.func @kernel(%arg0: i32, %arg1: i32, %arg2: memref<24x640xf32, #tpu.memory_space<vmem>>, %arg3: memref<24x640xf32, #tpu.memory_space<vmem>>, %arg4: memref<24x640xf32, #tpu.memory_space<vmem>>, %arg5: memref<24x640xf32, #tpu.memory_space<vmem>>, %arg6: memref<24x3xf32, #tpu.memory_space<vmem>>, %arg7: memref<24x1xf32, #tpu.memory_space<vmem>>, %arg8: memref<24x3x8xf32, #tpu.memory_space<vmem>>, %arg9: memref<24x8xf32, #tpu.memory_space<vmem>>, %arg10: memref<24x15xf32, #tpu.memory_space<vmem>>) attributes {dimension_semantics = [#tpu.dimension_semantics<parallel>, #tpu.dimension_semantics<arbitrary>], iteration_bounds = array<i64: 1, 1>, scalar_prefetch = 0 : i64, scratch_operands = 0 : i64, tpu.core_type = #tpu.core_type<tc>, window_params = [{transform_indices = @transform_0, window_bounds = array<i64: 24, 640>}, {transform_indices = @transform_1, window_bounds = array<i64: 24, 640>}, {transform_indices = @transform_2, window_bounds = array<i64: 24, 640>}, {transform_indices = @transform_3, window_bounds = array<i64: 24, 640>}, {transform_indices = @transform_4, window_bounds = array<i64: 24, 3>}, {transform_indices = @transform_5, window_bounds = array<i64: 24, 1>}, {transform_indices = @transform_6, window_bounds = array<i64: 24, 3, 8>}, {transform_indices = @transform_7, window_bounds = array<i64: 24, 8>}, {transform_indices = @transform_8, window_bounds = array<i64: 24, 15>}]} {
    %c0_i32 = arith.constant 0 : i32
    %0 = arith.cmpi eq, %arg1, %c0_i32 : i32
    %1 = arith.extui %0 : i1 to i32
    %c0_i32_0 = arith.constant 0 : i32
    %2 = arith.cmpi ne, %1, %c0_i32_0 : i32
    scf.if %2 {
      %cst_75 = arith.constant 0.000000e+00 : f32
      %153 = vector.broadcast %cst_75 : f32 to vector<24x15xf32>
      %c0_76 = arith.constant 0 : index
      %c0_77 = arith.constant 0 : index
      %154 = vector.load %arg10[%c0_76, %c0_77] : memref<24x15xf32, #tpu.memory_space<vmem>>, vector<24x15xf32>
      tpu.vector_store %arg10[%c0_76, %c0_77], %153 {strides = array<i32>} : memref<24x15xf32, #tpu.memory_space<vmem>>, vector<24x15xf32>,
      %c0_78 = arith.constant 0 : index
      %c0_79 = arith.constant 0 : index
      %155 = vector.load %arg6[%c0_78, %c0_79] : memref<24x3xf32, #tpu.memory_space<vmem>>, vector<24x3xf32>
      %c0_80 = arith.constant 0 : index
      %c0_81 = arith.constant 0 : index
      %156 = vector.load %arg7[%c0_80, %c0_81] : memref<24x1xf32, #tpu.memory_space<vmem>>, vector<24x1xf32>
      %cst_82 = arith.constant 0.000000e+00 : f32
      %157 = vector.broadcast %cst_82 : f32 to vector<24x3xf32>
      %158 = arith.maximumf %155, %157 : vector<24x3xf32>
      %159 = vector.broadcast %156 : vector<24x1xf32> to vector<24x3xf32>
      %160 = arith.mulf %155, %159 : vector<24x3xf32>
      %161 = arith.subf %158, %160 : vector<24x3xf32>
      %162 = math.absf %155 : vector<24x3xf32>
      %cst_83 = arith.constant 0.000000e+00 : f32
      %163 = vector.broadcast %cst_83 : f32 to vector<24x3xf32>
      %164 = arith.subf %163, %162 : vector<24x3xf32>
      %165 = math.exp %164 : vector<24x3xf32>
      %166 = math.log1p %165 : vector<24x3xf32>
      %167 = arith.addf %161, %166 : vector<24x3xf32>
      %c0_84 = arith.constant 0 : index
      %c9 = arith.constant 9 : index
      %168 = vector.load %arg10[%c0_84, %c9] : memref<24x15xf32, #tpu.memory_space<vmem>>, vector<24x3xf32>
      tpu.vector_store %arg10[%c0_84, %c9], %167 {strides = array<i32>} : memref<24x15xf32, #tpu.memory_space<vmem>>, vector<24x3xf32>,
      %c0_85 = arith.constant 0 : index
      %c0_86 = arith.constant 0 : index
      %c0_87 = arith.constant 0 : index
      %169 = vector.load %arg8[%c0_85, %c0_86, %c0_87] : memref<24x3x8xf32, #tpu.memory_space<vmem>>, vector<24x3x8xf32>
      %c0_88 = arith.constant 0 : index
      %c0_89 = arith.constant 0 : index
      %170 = vector.load %arg9[%c0_88, %c0_89] : memref<24x8xf32, #tpu.memory_space<vmem>>, vector<24x8xf32>
      %171 = vector.shape_cast %170 : vector<24x8xf32> to vector<24x1x8xf32>
      %172 = vector.broadcast %171 : vector<24x1x8xf32> to vector<24x3x8xf32>
      %173 = arith.subf %169, %172 : vector<24x3x8xf32>
      %174 = arith.mulf %173, %173 : vector<24x3x8xf32>
      %cst_90 = arith.constant dense<0.000000e+00> : vector<24x3xf32>
      %175 = vector.multi_reduction <add>, %174, %cst_90 [2] : vector<24x3x8xf32> to vector<24x3xf32>
      %c0_91 = arith.constant 0 : index
      %c12 = arith.constant 12 : index
      %176 = vector.load %arg10[%c0_91, %c12] : memref<24x15xf32, #tpu.memory_space<vmem>>, vector<24x3xf32>
      tpu.vector_store %arg10[%c0_91, %c12], %175 {strides = array<i32>} : memref<24x15xf32, #tpu.memory_space<vmem>>, vector<24x3xf32>,
    } else {
    }
    %c0 = arith.constant 0 : index
    %c0_1 = arith.constant 0 : index
    %3 = vector.load %arg5[%c0, %c0_1] : memref<24x640xf32, #tpu.memory_space<vmem>>, vector<24x640xf32>
    %cst = arith.constant dense<0.000000e+00> : vector<24xf32>
    %4 = vector.multi_reduction <add>, %3, %cst [1] : vector<24x640xf32> to vector<24xf32>
    %5 = vector.shape_cast %4 : vector<24xf32> to vector<24x1xf32>
    %c0_2 = arith.constant 0 : index
    %c0_3 = arith.constant 0 : index
    %6 = vector.load %arg2[%c0_2, %c0_3] : memref<24x640xf32, #tpu.memory_space<vmem>>, vector<24x640xf32>
    %7 = math.absf %6 : vector<24x640xf32>
    %cst_4 = arith.constant 0.000000e+00 : f32
    %8 = vector.broadcast %cst_4 : f32 to vector<24x640xf32>
    %9 = arith.subf %8, %7 : vector<24x640xf32>
    %10 = math.exp %9 : vector<24x640xf32>
    %11 = math.log1p %10 : vector<24x640xf32>
    %cst_5 = arith.constant 0.000000e+00 : f32
    %12 = vector.broadcast %cst_5 : f32 to vector<24x640xf32>
    %13 = arith.maximumf %6, %12 : vector<24x640xf32>
    %14 = arith.addf %13, %11 : vector<24x640xf32>
    %15 = arith.subf %14, %6 : vector<24x640xf32>
    %cst_6 = arith.constant 1.000000e+00 : f32
    %16 = vector.broadcast %cst_6 : f32 to vector<24x640xf32>
    %17 = arith.addf %16, %10 : vector<24x640xf32>
    %18 = tpu.reciprocal %17 : vector<24x640xf32> -> vector<24x640xf32>
    %cst_7 = arith.constant 0.000000e+00 : f32
    %19 = vector.broadcast %cst_7 : f32 to vector<24x640xf32>
    %20 = arith.cmpf oge, %6, %19 : vector<24x640xf32>
    %21 = arith.mulf %10, %18 : vector<24x640xf32>
    %22 = arith.select %20, %18, %21 : vector<24x640xi1>, vector<24x640xf32>
    %cst_8 = arith.constant 0.000000e+00 : f32
    %23 = vector.broadcast %cst_8 : f32 to vector<24x640xf32>
    %24 = arith.subf %23, %15 : vector<24x640xf32>
    %cst_9 = arith.constant -1.000000e+02 : f32
    %25 = vector.broadcast %cst_9 : f32 to vector<24x640xf32>
    %26 = arith.maximumf %24, %25 : vector<24x640xf32>
    %cst_10 = arith.constant 0.000000e+00 : f32
    %27 = vector.broadcast %cst_10 : f32 to vector<24x640xf32>
    %28 = arith.subf %27, %14 : vector<24x640xf32>
    %cst_11 = arith.constant -1.000000e+02 : f32
    %29 = vector.broadcast %cst_11 : f32 to vector<24x640xf32>
    %30 = arith.maximumf %28, %29 : vector<24x640xf32>
    %31 = arith.mulf %3, %26 : vector<24x640xf32>
    %cst_12 = arith.constant 1.000000e+00 : f32
    %32 = vector.broadcast %cst_12 : f32 to vector<24x640xf32>
    %33 = arith.subf %32, %3 : vector<24x640xf32>
    %34 = arith.mulf %33, %30 : vector<24x640xf32>
    %35 = arith.addf %31, %34 : vector<24x640xf32>
    %cst_13 = arith.constant 0.000000e+00 : f32
    %36 = vector.broadcast %cst_13 : f32 to vector<24x640xf32>
    %37 = arith.subf %36, %35 : vector<24x640xf32>
    %c0_14 = arith.constant 0 : index
    %c0_15 = arith.constant 0 : index
    %38 = vector.load %arg10[%c0_14, %c0_15] : memref<24x15xf32, #tpu.memory_space<vmem>>, vector<24x1xf32>
    %39 = arith.mulf %22, %3 : vector<24x640xf32>
    %cst_16 = arith.constant dense<0.000000e+00> : vector<24xf32>
    %40 = vector.multi_reduction <add>, %39, %cst_16 [1] : vector<24x640xf32> to vector<24xf32>
    %41 = vector.shape_cast %40 : vector<24xf32> to vector<24x1xf32>
    %42 = arith.addf %38, %41 : vector<24x1xf32>
    %c0_17 = arith.constant 0 : index
    %c0_18 = arith.constant 0 : index
    %43 = vector.load %arg10[%c0_17, %c0_18] : memref<24x15xf32, #tpu.memory_space<vmem>>, vector<24x1xf32>
    tpu.vector_store %arg10[%c0_17, %c0_18], %42 {strides = array<i32>} : memref<24x15xf32, #tpu.memory_space<vmem>>, vector<24x1xf32>,
    %c0_19 = arith.constant 0 : index
    %c3 = arith.constant 3 : index
    %44 = vector.load %arg10[%c0_19, %c3] : memref<24x15xf32, #tpu.memory_space<vmem>>, vector<24x1xf32>
    %cst_20 = arith.constant dense<0.000000e+00> : vector<24xf32>
    %45 = vector.multi_reduction <add>, %22, %cst_20 [1] : vector<24x640xf32> to vector<24xf32>
    %46 = vector.shape_cast %45 : vector<24xf32> to vector<24x1xf32>
    %47 = arith.addf %46, %5 : vector<24x1xf32>
    %48 = arith.addf %44, %47 : vector<24x1xf32>
    %c0_21 = arith.constant 0 : index
    %c3_22 = arith.constant 3 : index
    %49 = vector.load %arg10[%c0_21, %c3_22] : memref<24x15xf32, #tpu.memory_space<vmem>>, vector<24x1xf32>
    tpu.vector_store %arg10[%c0_21, %c3_22], %48 {strides = array<i32>} : memref<24x15xf32, #tpu.memory_space<vmem>>, vector<24x1xf32>,
    %c0_23 = arith.constant 0 : index
    %c6 = arith.constant 6 : index
    %50 = vector.load %arg10[%c0_23, %c6] : memref<24x15xf32, #tpu.memory_space<vmem>>, vector<24x1xf32>
    %cst_24 = arith.constant dense<0.000000e+00> : vector<24xf32>
    %51 = vector.multi_reduction <add>, %37, %cst_24 [1] : vector<24x640xf32> to vector<24xf32>
    %52 = vector.shape_cast %51 : vector<24xf32> to vector<24x1xf32>
    %53 = arith.addf %50, %52 : vector<24x1xf32>
    %c0_25 = arith.constant 0 : index
    %c6_26 = arith.constant 6 : index
    %54 = vector.load %arg10[%c0_25, %c6_26] : memref<24x15xf32, #tpu.memory_space<vmem>>, vector<24x1xf32>
    tpu.vector_store %arg10[%c0_25, %c6_26], %53 {strides = array<i32>} : memref<24x15xf32, #tpu.memory_space<vmem>>, vector<24x1xf32>,
    %c0_27 = arith.constant 0 : index
    %c0_28 = arith.constant 0 : index
    %55 = vector.load %arg3[%c0_27, %c0_28] : memref<24x640xf32, #tpu.memory_space<vmem>>, vector<24x640xf32>
    %56 = math.absf %55 : vector<24x640xf32>
    %cst_29 = arith.constant 0.000000e+00 : f32
    %57 = vector.broadcast %cst_29 : f32 to vector<24x640xf32>
    %58 = arith.subf %57, %56 : vector<24x640xf32>
    %59 = math.exp %58 : vector<24x640xf32>
    %60 = math.log1p %59 : vector<24x640xf32>
    %cst_30 = arith.constant 0.000000e+00 : f32
    %61 = vector.broadcast %cst_30 : f32 to vector<24x640xf32>
    %62 = arith.maximumf %55, %61 : vector<24x640xf32>
    %63 = arith.addf %62, %60 : vector<24x640xf32>
    %64 = arith.subf %63, %55 : vector<24x640xf32>
    %cst_31 = arith.constant 1.000000e+00 : f32
    %65 = vector.broadcast %cst_31 : f32 to vector<24x640xf32>
    %66 = arith.addf %65, %59 : vector<24x640xf32>
    %67 = tpu.reciprocal %66 : vector<24x640xf32> -> vector<24x640xf32>
    %cst_32 = arith.constant 0.000000e+00 : f32
    %68 = vector.broadcast %cst_32 : f32 to vector<24x640xf32>
    %69 = arith.cmpf oge, %55, %68 : vector<24x640xf32>
    %70 = arith.mulf %59, %67 : vector<24x640xf32>
    %71 = arith.select %69, %67, %70 : vector<24x640xi1>, vector<24x640xf32>
    %cst_33 = arith.constant 0.000000e+00 : f32
    %72 = vector.broadcast %cst_33 : f32 to vector<24x640xf32>
    %73 = arith.subf %72, %64 : vector<24x640xf32>
    %cst_34 = arith.constant -1.000000e+02 : f32
    %74 = vector.broadcast %cst_34 : f32 to vector<24x640xf32>
    %75 = arith.maximumf %73, %74 : vector<24x640xf32>
    %cst_35 = arith.constant 0.000000e+00 : f32
    %76 = vector.broadcast %cst_35 : f32 to vector<24x640xf32>
    %77 = arith.subf %76, %63 : vector<24x640xf32>
    %cst_36 = arith.constant -1.000000e+02 : f32
    %78 = vector.broadcast %cst_36 : f32 to vector<24x640xf32>
    %79 = arith.maximumf %77, %78 : vector<24x640xf32>
    %80 = arith.mulf %3, %75 : vector<24x640xf32>
    %cst_37 = arith.constant 1.000000e+00 : f32
    %81 = vector.broadcast %cst_37 : f32 to vector<24x640xf32>
    %82 = arith.subf %81, %3 : vector<24x640xf32>
    %83 = arith.mulf %82, %79 : vector<24x640xf32>
    %84 = arith.addf %80, %83 : vector<24x640xf32>
    %cst_38 = arith.constant 0.000000e+00 : f32
    %85 = vector.broadcast %cst_38 : f32 to vector<24x640xf32>
    %86 = arith.subf %85, %84 : vector<24x640xf32>
    %c0_39 = arith.constant 0 : index
    %c1 = arith.constant 1 : index
    %87 = vector.load %arg10[%c0_39, %c1] : memref<24x15xf32, #tpu.memory_space<vmem>>, vector<24x1xf32>
    %88 = arith.mulf %71, %3 : vector<24x640xf32>
    %cst_40 = arith.constant dense<0.000000e+00> : vector<24xf32>
    %89 = vector.multi_reduction <add>, %88, %cst_40 [1] : vector<24x640xf32> to vector<24xf32>
    %90 = vector.shape_cast %89 : vector<24xf32> to vector<24x1xf32>
    %91 = arith.addf %87, %90 : vector<24x1xf32>
    %c0_41 = arith.constant 0 : index
    %c1_42 = arith.constant 1 : index
    %92 = vector.load %arg10[%c0_41, %c1_42] : memref<24x15xf32, #tpu.memory_space<vmem>>, vector<24x1xf32>
    tpu.vector_store %arg10[%c0_41, %c1_42], %91 {strides = array<i32>} : memref<24x15xf32, #tpu.memory_space<vmem>>, vector<24x1xf32>,
    %c0_43 = arith.constant 0 : index
    %c4 = arith.constant 4 : index
    %93 = vector.load %arg10[%c0_43, %c4] : memref<24x15xf32, #tpu.memory_space<vmem>>, vector<24x1xf32>
    %cst_44 = arith.constant dense<0.000000e+00> : vector<24xf32>
    %94 = vector.multi_reduction <add>, %71, %cst_44 [1] : vector<24x640xf32> to vector<24xf32>
    %95 = vector.shape_cast %94 : vector<24xf32> to vector<24x1xf32>
    %96 = arith.addf %95, %5 : vector<24x1xf32>
    %97 = arith.addf %93, %96 : vector<24x1xf32>
    %c0_45 = arith.constant 0 : index
    %c4_46 = arith.constant 4 : index
    %98 = vector.load %arg10[%c0_45, %c4_46] : memref<24x15xf32, #tpu.memory_space<vmem>>, vector<24x1xf32>
    tpu.vector_store %arg10[%c0_45, %c4_46], %97 {strides = array<i32>} : memref<24x15xf32, #tpu.memory_space<vmem>>, vector<24x1xf32>,
    %c0_47 = arith.constant 0 : index
    %c7 = arith.constant 7 : index
    %99 = vector.load %arg10[%c0_47, %c7] : memref<24x15xf32, #tpu.memory_space<vmem>>, vector<24x1xf32>
    %cst_48 = arith.constant dense<0.000000e+00> : vector<24xf32>
    %100 = vector.multi_reduction <add>, %86, %cst_48 [1] : vector<24x640xf32> to vector<24xf32>
    %101 = vector.shape_cast %100 : vector<24xf32> to vector<24x1xf32>
    %102 = arith.addf %99, %101 : vector<24x1xf32>
    %c0_49 = arith.constant 0 : index
    %c7_50 = arith.constant 7 : index
    %103 = vector.load %arg10[%c0_49, %c7_50] : memref<24x15xf32, #tpu.memory_space<vmem>>, vector<24x1xf32>
    tpu.vector_store %arg10[%c0_49, %c7_50], %102 {strides = array<i32>} : memref<24x15xf32, #tpu.memory_space<vmem>>, vector<24x1xf32>,
    %c0_51 = arith.constant 0 : index
    %c0_52 = arith.constant 0 : index
    %104 = vector.load %arg4[%c0_51, %c0_52] : memref<24x640xf32, #tpu.memory_space<vmem>>, vector<24x640xf32>
    %105 = math.absf %104 : vector<24x640xf32>
    %cst_53 = arith.constant 0.000000e+00 : f32
    %106 = vector.broadcast %cst_53 : f32 to vector<24x640xf32>
    %107 = arith.subf %106, %105 : vector<24x640xf32>
    %108 = math.exp %107 : vector<24x640xf32>
    %109 = math.log1p %108 : vector<24x640xf32>
    %cst_54 = arith.constant 0.000000e+00 : f32
    %110 = vector.broadcast %cst_54 : f32 to vector<24x640xf32>
    %111 = arith.maximumf %104, %110 : vector<24x640xf32>
    %112 = arith.addf %111, %109 : vector<24x640xf32>
    %113 = arith.subf %112, %104 : vector<24x640xf32>
    %cst_55 = arith.constant 1.000000e+00 : f32
    %114 = vector.broadcast %cst_55 : f32 to vector<24x640xf32>
    %115 = arith.addf %114, %108 : vector<24x640xf32>
    %116 = tpu.reciprocal %115 : vector<24x640xf32> -> vector<24x640xf32>
    %cst_56 = arith.constant 0.000000e+00 : f32
    %117 = vector.broadcast %cst_56 : f32 to vector<24x640xf32>
    %118 = arith.cmpf oge, %104, %117 : vector<24x640xf32>
    %119 = arith.mulf %108, %116 : vector<24x640xf32>
    %120 = arith.select %118, %116, %119 : vector<24x640xi1>, vector<24x640xf32>
    %cst_57 = arith.constant 0.000000e+00 : f32
    %121 = vector.broadcast %cst_57 : f32 to vector<24x640xf32>
    %122 = arith.subf %121, %113 : vector<24x640xf32>
    %cst_58 = arith.constant -1.000000e+02 : f32
    %123 = vector.broadcast %cst_58 : f32 to vector<24x640xf32>
    %124 = arith.maximumf %122, %123 : vector<24x640xf32>
    %cst_59 = arith.constant 0.000000e+00 : f32
    %125 = vector.broadcast %cst_59 : f32 to vector<24x640xf32>
    %126 = arith.subf %125, %112 : vector<24x640xf32>
    %cst_60 = arith.constant -1.000000e+02 : f32
    %127 = vector.broadcast %cst_60 : f32 to vector<24x640xf32>
    %128 = arith.maximumf %126, %127 : vector<24x640xf32>
    %129 = arith.mulf %3, %124 : vector<24x640xf32>
    %cst_61 = arith.constant 1.000000e+00 : f32
    %130 = vector.broadcast %cst_61 : f32 to vector<24x640xf32>
    %131 = arith.subf %130, %3 : vector<24x640xf32>
    %132 = arith.mulf %131, %128 : vector<24x640xf32>
    %133 = arith.addf %129, %132 : vector<24x640xf32>
    %cst_62 = arith.constant 0.000000e+00 : f32
    %134 = vector.broadcast %cst_62 : f32 to vector<24x640xf32>
    %135 = arith.subf %134, %133 : vector<24x640xf32>
    %c0_63 = arith.constant 0 : index
    %c2 = arith.constant 2 : index
    %136 = vector.load %arg10[%c0_63, %c2] : memref<24x15xf32, #tpu.memory_space<vmem>>, vector<24x1xf32>
    %137 = arith.mulf %120, %3 : vector<24x640xf32>
    %cst_64 = arith.constant dense<0.000000e+00> : vector<24xf32>
    %138 = vector.multi_reduction <add>, %137, %cst_64 [1] : vector<24x640xf32> to vector<24xf32>
    %139 = vector.shape_cast %138 : vector<24xf32> to vector<24x1xf32>
    %140 = arith.addf %136, %139 : vector<24x1xf32>
    %c0_65 = arith.constant 0 : index
    %c2_66 = arith.constant 2 : index
    %141 = vector.load %arg10[%c0_65, %c2_66] : memref<24x15xf32, #tpu.memory_space<vmem>>, vector<24x1xf32>
    tpu.vector_store %arg10[%c0_65, %c2_66], %140 {strides = array<i32>} : memref<24x15xf32, #tpu.memory_space<vmem>>, vector<24x1xf32>,
    %c0_67 = arith.constant 0 : index
    %c5 = arith.constant 5 : index
    %142 = vector.load %arg10[%c0_67, %c5] : memref<24x15xf32, #tpu.memory_space<vmem>>, vector<24x1xf32>
    %cst_68 = arith.constant dense<0.000000e+00> : vector<24xf32>
    %143 = vector.multi_reduction <add>, %120, %cst_68 [1] : vector<24x640xf32> to vector<24xf32>
    %144 = vector.shape_cast %143 : vector<24xf32> to vector<24x1xf32>
    %145 = arith.addf %144, %5 : vector<24x1xf32>
    %146 = arith.addf %142, %145 : vector<24x1xf32>
    %c0_69 = arith.constant 0 : index
    %c5_70 = arith.constant 5 : index
    %147 = vector.load %arg10[%c0_69, %c5_70] : memref<24x15xf32, #tpu.memory_space<vmem>>, vector<24x1xf32>
    tpu.vector_store %arg10[%c0_69, %c5_70], %146 {strides = array<i32>} : memref<24x15xf32, #tpu.memory_space<vmem>>, vector<24x1xf32>,
    %c0_71 = arith.constant 0 : index
    %c8 = arith.constant 8 : index
    %148 = vector.load %arg10[%c0_71, %c8] : memref<24x15xf32, #tpu.memory_space<vmem>>, vector<24x1xf32>
    %cst_72 = arith.constant dense<0.000000e+00> : vector<24xf32>
    %149 = vector.multi_reduction <add>, %135, %cst_72 [1] : vector<24x640xf32> to vector<24xf32>
    %150 = vector.shape_cast %149 : vector<24xf32> to vector<24x1xf32>
    %151 = arith.addf %148, %150 : vector<24x1xf32>
    %c0_73 = arith.constant 0 : index
    %c8_74 = arith.constant 8 : index
    %152 = vector.load %arg10[%c0_73, %c8_74] : memref<24x15xf32, #tpu.memory_space<vmem>>, vector<24x1xf32>
    tpu.vector_store %arg10[%c0_73, %c8_74], %151 {strides = array<i32>} : memref<24x15xf32, #tpu.memory_space<vmem>>, vector<24x1xf32>,
    return
  }
  func.func @transform_0(%arg0: i32, %arg1: i32) -> (i32, i32) {
    %c0_i32 = arith.constant 0 : i32
    return %arg0, %arg1 : i32, i32
  }
  func.func @transform_1(%arg0: i32, %arg1: i32) -> (i32, i32) {
    %c0_i32 = arith.constant 0 : i32
    return %arg0, %arg1 : i32, i32
  }
  func.func @transform_2(%arg0: i32, %arg1: i32) -> (i32, i32) {
    %c0_i32 = arith.constant 0 : i32
    return %arg0, %arg1 : i32, i32
  }
  func.func @transform_3(%arg0: i32, %arg1: i32) -> (i32, i32) {
    %c0_i32 = arith.constant 0 : i32
    return %arg0, %arg1 : i32, i32
  }
  func.func @transform_4(%arg0: i32, %arg1: i32) -> (i32, i32) {
    %c0_i32 = arith.constant 0 : i32
    %c0_i32_0 = arith.constant 0 : i32
    return %arg0, %c0_i32 : i32, i32
  }
  func.func @transform_5(%arg0: i32, %arg1: i32) -> (i32, i32) {
    %c0_i32 = arith.constant 0 : i32
    %c0_i32_0 = arith.constant 0 : i32
    return %arg0, %c0_i32 : i32, i32
  }
  func.func @transform_6(%arg0: i32, %arg1: i32) -> (i32, i32, i32) {
    %c0_i32 = arith.constant 0 : i32
    %c0_i32_0 = arith.constant 0 : i32
    %c0_i32_1 = arith.constant 0 : i32
    return %arg0, %c0_i32, %c0_i32_0 : i32, i32, i32
  }
  func.func @transform_7(%arg0: i32, %arg1: i32) -> (i32, i32) {
    %c0_i32 = arith.constant 0 : i32
    %c0_i32_0 = arith.constant 0 : i32
    return %arg0, %c0_i32 : i32, i32
  }
  func.func @transform_8(%arg0: i32, %arg1: i32) -> (i32, i32) {
    %c0_i32 = arith.constant 0 : i32
    %c0_i32_0 = arith.constant 0 : i32
    return %arg0, %c0_i32 : i32, i32
  }
}

</mosaic_0001>

<bundles_post_ra>
// kernel: loss_module_forward.1
= control target key start
LH: loop header
LB: loop body
LE: loop exit
PB: predicated region body
PF: predicated region fallthrough
CT: control target
= control target key end

     0   :  { %13 = vsyncpa [#allocation3], 0  ;;  %s5260_s0 = inlined_call_operand.vmem [shape: f32[24,640], index: 0, kind: input, shape index: {}]   ;;  %s5261_s1 = inlined_call_operand.vmem [shape: f32[24,640], index: 1, kind: input, shape index: {}]   ;;  %s5262_s2 = inlined_call_operand.hbm [shape: f32[24,640], index: 2, kind: input, shape index: {}]   ;;  %s5263_s3 = inlined_call_operand.hbm [shape: f32[24,640], index: 3, kind: input, shape index: {}]   ;;  %s5264_s4 = inlined_call_operand.vmem [shape: f32[24,3], index: 4, kind: input, shape index: {}]   ;;  %s5265_s5 = inlined_call_operand.vmem [shape: f32[24,1], index: 5, kind: input, shape index: {}]   ;;  %s5266_s6 = inlined_call_operand.vmem [shape: f32[24,3,8], index: 6, kind: input, shape index: {}]   ;;  %s5267_s7 = inlined_call_operand.vmem [shape: f32[24,8], index: 7, kind: input, shape index: {}]   ;;  %s5268_s8 = inlined_call_operand.vmem [shape: f32[24,15], index: 8, kind: output, shape index: {}]  }
   0x1   :  { %14 = vsyncpa [#allocation5], 0  ;;  %s2832_s27 = smov [#allocation2]   ;;  %s2784_s9 = scalar_lea.hbm %s5262_s2, 1920 }
   0x2   :  { %s24_s28 = sshll.u32 %s2832_s27, 4  ;;  %p2785_p0 = scmp.ne.s32.totalorder %s5262_s2, %s2784_s9  ;;  %s25_s28 = int_to_ptr.vmem [resolvable:$true] %s24_s28 }
   0x3   :  { %p2788_p1 = scmp.lt.u32.totalorder %s2784_s9, %s5262_s2 }
   0x5   :  { %p2790_p2 = pnand %p2788_p1, %p2785_p0 }
   0x7   :  { %2793 = shalt.err (!%p2790_p2)
}
   0x8   :  { %s2794_s14 = scalar_lea.vmem %s25_s28, 1920  ;;  %p2799_p4 = scmp.lt.s32.totalorder %s25_s28, %s25_s28 }
   0x9   :  { %p2795_p3 = scmp.ne.s32.totalorder %s25_s28, %s2794_s14  ;;  %p2800_p5 = scmp.lt.s32.totalorder %s2794_s14, %s2794_s14 }
   0xb   :  { %p2801_p6 = por %p2800_p5, %p2799_p4 }
   0xd   :  { %p2802_p7 = pnand %p2801_p6, %p2795_p3 }
   0xf   :  { %2805 = shalt.err (!%p2802_p7)
}
  0x10   :  { %s2833_s15 = smov 640   ;;  %s2834_s16 = smov 40  }
  0x11   :  { %30 = dma.hbm_to_vmem [thread:$0]  %s5262_s2, 1920, %s25_s28, [#allocation3], %s2833_s15, %s2833_s15, %s2834_s16  }
  0x12   :  { %s2835_s19 = smov [#allocation4]   ;;  %s2806_s23 = scalar_lea.hbm %s5263_s3, 1920 }
  0x13   :  { %s36_s20 = sshll.u32 %s2835_s19, 4  ;;  %p2807_p8 = scmp.ne.s32.totalorder %s5263_s3, %s2806_s23  ;;  %s37_s20 = int_to_ptr.vmem [resolvable:$true] %s36_s20 }
  0x14   :  { %p2810_p9 = scmp.lt.u32.totalorder %s2806_s23, %s5263_s3 }
  0x16   :  { %p2812_p10 = pnand %p2810_p9, %p2807_p8 }
  0x18   :  { %2815 = shalt.err (!%p2812_p10)
}
  0x19   :  { %s2816_s29 = scalar_lea.vmem %s37_s20, 1920  ;;  %p2821_p12 = scmp.lt.s32.totalorder %s37_s20, %s37_s20 }
  0x1a   :  { %p2817_p11 = scmp.ne.s32.totalorder %s37_s20, %s2816_s29  ;;  %p2822_p13 = scmp.lt.s32.totalorder %s2816_s29, %s2816_s29 }
  0x1c   :  { %p2823_p0 = por %p2822_p13, %p2821_p12 }
  0x1e   :  { %p2824_p1 = pnand %p2823_p0, %p2817_p11 }
  0x20   :  { %2827 = shalt.err (!%p2824_p1)
}
  0x21   :  { %42 = dma.hbm_to_vmem [thread:$0]  %s5263_s3, 1920, %s37_s20, [#allocation5], %s2833_s15, %s2833_s15, %s2834_s16  }
  0x22   :  { %2828 = dma.done.wait [#allocation3], 1920  }
  0x23   :  { %2829 = vsyncadd [#allocation3], 4294965376 }
  0x24   :  { %2830 = dma.done.wait [#allocation5], 1920  }
  0x25   :  { %2831 = vsyncadd [#allocation5], 4294965376  ;;  %v187_v0 = vlaneseq  ;;  %v2836_v1 = vmov 0   ;;  %v2837_v2 = vmov 1966171168   ;;  %v70_v10 = vld [vmem:[%s5265_s5 + $0x10] sm:$0xff] }
  0x26   :  { %2448 = vset.pattern.permute.xlu1 %v2836_v1  ;;  %2447 = vset.pattern.permute.xlu0 %v2836_v1  ;;  %v185_v3 = vunpack.c.l.s4 %v2837_v2  ;;  %v68_v11 = vld [vmem:[%s5265_s5] sm:$0xff]  ;;  %v69_v13 = vld [vmem:[%s5265_s5 + $0x8] sm:$0xff]  ;;  %v179_v18 = vld [vmem:[%s5267_s7 + $0x10] sm:$0xff]  ;;  %vm498_vm0 = vcmask 59392  }
  0x27   :  { %v188_v4 = vshrl.u32 %v187_v0, 7  ;;  %v596_v5 = vand.u32 127, %v187_v0  ;;  %86 = vperm.xlu1 %2448, %v70_v10   ;;  %76 = vperm.xlu0 %2447, %v68_v11   ;;  %v177_v12 = vld [vmem:[%s5267_s7] sm:$0xff]  ;;  %v178_v15 = vld [vmem:[%s5267_s7 + $0x8] sm:$0xff]  ;;  %v281_v47 = vcombine.high %v179_v18, %v179_v18 }
  0x28   :  { %v186_v6 = vunpack.c.0.s8 %v185_v3  ;;  %v153_v29 = vld [vmem:[%s5266_s6] sm:$0x7]  ;;  %v183_v33 = vcombine.high %v177_v12, %v177_v12  ;;  %v232_v36 = vcombine.high %v178_v15, %v178_v15  ;;  %v154_v37 = vld [vmem:[%s5266_s6 + $0x4] sm:$0x7]  ;;  %v155_v49 = vld [vmem:[%s5266_s6 + $0x8] sm:$0x7] }
  0x29   :  { %v597_v7 = vadd.s32 4294967284, %v596_v5  ;;  %v2929_v16 = vsub.s32 0, %v188_v4  ;;  %v161_v30 = vld [vmem:[%s5266_s6 + $0x20] sm:$0x7]  ;;  %v162_v44 = vld [vmem:[%s5266_s6 + $0x24] sm:$0x7] }
  0x2a   :  { %v2909_v8 = vsub.s32 %v186_v6, %v188_v4  ;;  %v169_v43 = vld [vmem:[%s5266_s6 + $0x40] sm:$0x7]  ;;  %v163_v56 = vld [vmem:[%s5266_s6 + $0x28] sm:$0x7]  ;;  %v170_v58 = vld [vmem:[%s5266_s6 + $0x44] sm:$0x7] }
  0x2b   :  { %v2911_v9 = vsub.s32 %v597_v7, %v188_v4  ;;  %81 = vperm.xlu0 %2447, %v69_v13  }
  0x2c   :  { %v190_v14 = vrot.slane %v177_v12, %v2909_v8  ;;  %v239_v17 = vrot.slane %v178_v15, %v2909_v8  ;;  %v288_v21 = vrot.slane %v179_v18, %v2909_v8  ;;  %v197_v46 = vrot.slane %v183_v33, %v2909_v8  ;;  %v171_v12 = vld [vmem:[%s5266_s6 + $0x48] sm:$0x7] }
  0x2d   :  { %5391 = vst [vmem:[#allocation8_spill] sm:$0xff] %v2911_v9  ;;  %v246_v51 = vrot.slane %v232_v36, %v2909_v8  ;;  %v295_v1 = vrot.slane %v281_v47, %v2909_v8  ;;  %v158_v36 = vld [vmem:[%s5266_s6 + $0x14] sm:$0x7] }
  0x2e   :  { %v198_v19 = vcombine.high %v190_v14, %v190_v14  ;;  %v206_v20 = vrot.slane %v190_v14, %v2909_v8  ;;  %v255_v22 = vrot.slane %v239_v17, %v2909_v8  ;;  %v247_v23 = vcombine.high %v239_v17, %v239_v17 }
  0x2f   :  { %v304_v27 = vrot.slane %v288_v21, %v2909_v8  ;;  %v296_v28 = vcombine.high %v288_v21, %v288_v21  ;;  %v2977_v0 = vrot.slane %v197_v46, %v2909_v8  ;;  %v2981_v4 = vrot.slane %v246_v51, %v2909_v8  ;;  %v164_v21 = vld [vmem:[%s5266_s6 + $0x2c] sm:$0x7] }
  0x30   :  { %v220_v24 = vrot.slane %v198_v19, %v2909_v8  ;;  %v333_v25 = vrot.slane %v206_v20, %v2929_v16  ;;  %v365_v26 = vrot.slane %v255_v22, %v2929_v16  ;;  %v269_v31 = vrot.slane %v247_v23, %v2909_v8 }
  0x31   :  { %v228_v32 = vcombine.high %v206_v20, %v206_v20  ;;  %v277_v35 = vcombine.high %v255_v22, %v255_v22  ;;  %v397_v40 = vrot.slane %v304_v27, %v2929_v16  ;;  %v318_v41 = vrot.slane %v296_v28, %v2909_v8  ;;  %v156_v20 = vld [vmem:[%s5266_s6 + $0xc] sm:$0x7] }
  0x32   :  { %v337_v34 = vrot.slane %v220_v24, %v2929_v16  ;;  %v450_v38 = vsub.f32 %v153_v29, %v333_v25  ;;  %v458_v39 = vsub.f32 %v161_v30, %v365_v26  ;;  %v369_v42 = vrot.slane %v269_v31, %v2929_v16  ;;  %v172_v25 = vld [vmem:[%s5266_s6 + $0x4c] sm:$0x7]  ;;  %v157_v26 = vld [vmem:[%s5266_s6 + $0x10] sm:$0x7] }
  0x33   :  { %v341_v45 = vrot.slane %v228_v32, %v2929_v16  ;;  %v373_v50 = vrot.slane %v277_v35, %v2929_v16  ;;  %v466_v54 = vsub.f32 %v169_v43, %v397_v40  ;;  %v401_v55 = vrot.slane %v318_v41, %v2929_v16  ;;  %v173_v35 = vld [vmem:[%s5266_s6 + $0x50] sm:$0x7] }
  0x34   :  { %v451_v48 = vsub.f32 %v154_v37, %v337_v34  ;;  %v474_v52 = vmul.f32 %v450_v38, %v450_v38  ;;  %v482_v53 = vmul.f32 %v458_v39, %v458_v39  ;;  %v459_v57 = vsub.f32 %v162_v44, %v369_v42 }
  0x35   :  { %v326_v59 = vcombine.high %v304_v27, %v304_v27  ;;  %v230_v60 = vcombine.high %v220_v24, %v220_v24  ;;  %v279_v61 = vcombine.high %v269_v31, %v269_v31  ;;  %v452_v62 = vsub.f32 %v155_v49, %v341_v45  ;;  %v165_v27 = vld [vmem:[%s5266_s6 + $0x30] sm:$0x7] }
  0x36   :  { %v328_v63 = vcombine.high %v318_v41, %v318_v41  ;;  %v475_v2 = vmul.f32 %v451_v48, %v451_v48  ;;  %v460_v3 = vsub.f32 %v163_v56, %v373_v50  ;;  %v199_v5 = vcombine.high %v197_v46, %v197_v46 }
  0x37   :  { %v2984_v6 = vsel %vm498_vm0, %v474_v52, 0.0  ;;  %v490_v7 = vmul.f32 %v466_v54, %v466_v54  ;;  %v467_v10 = vsub.f32 %v170_v58, %v401_v55  ;;  %v2987_v11 = vrot.slane %v295_v1, %v2909_v8 }
  0x38   :  { %v405_v13 = vrot.slane %v326_v59, %v2929_v16  ;;  %v345_v14 = vrot.slane %v230_v60, %v2929_v16  ;;  %v377_v15 = vrot.slane %v279_v61, %v2929_v16  ;;  %v2996_v17 = vrot.slane %v199_v5, %v2909_v8 }
  0x39   :  { %v2999_v18 = vsel %vm498_vm0, %v482_v53, 0.0  ;;  %v483_v19 = vmul.f32 %v459_v57, %v459_v57  ;;  %v409_v22 = vrot.slane %v328_v63, %v2929_v16  ;;  %v349_v23 = vrot.slane %v2977_v0, %v2929_v16  ;;  %v166_v63 = vld [vmem:[%s5266_s6 + $0x34] sm:$0x7] }
  0x3a   :  { %v476_v24 = vmul.f32 %v452_v62, %v452_v62  ;;  %v381_v28 = vrot.slane %v2981_v4, %v2929_v16  ;;  %v413_v29 = vrot.slane %v2987_v11, %v2929_v16  ;;  %v353_v30 = vrot.slane %v2996_v17, %v2929_v16 }
  0x3b   :  { %v3026_v31 = vsel %vm498_vm0, %v475_v2, 0.0  ;;  %v3029_v32 = vsel %vm498_vm0, %v490_v7, 0.0  ;;  %v491_v33 = vmul.f32 %v467_v10, %v467_v10  ;;  %v484_v34 = vmul.f32 %v460_v3, %v460_v3  ;;  %v159_v2 = vld [vmem:[%s5266_s6 + $0x18] sm:$0x7] }
  0x3c   :  { %v468_v37 = vsub.f32 %v171_v12, %v405_v13  ;;  %v453_v38 = vsub.f32 %v156_v20, %v345_v14  ;;  %v461_v39 = vsub.f32 %v164_v21, %v377_v15  ;;  %v248_v40 = vcombine.high %v246_v51, %v246_v51  ;;  %v167_v7 = vld [vmem:[%s5266_s6 + $0x38] sm:$0x7] }
  0x3d   :  { %v3038_v41 = vsel %vm498_vm0, %v483_v19, 0.0  ;;  %v469_v42 = vsub.f32 %v172_v25, %v409_v22  ;;  %v454_v43 = vsub.f32 %v157_v26, %v349_v23  ;;  %v297_v44 = vcombine.high %v295_v1, %v295_v1  ;;  %v174_v1 = vld [vmem:[%s5266_s6 + $0x54] sm:$0x7]  ;;  %v3104_v23 = vld [vmem:[%s5260_s0 + $0x28] sm:$0xff]  ;;  %v3114_v25 = vld [vmem:[%s5260_s0 + $0x38] sm:$0xff] }
  0x3e   :  { %v462_v45 = vsub.f32 %v165_v27, %v381_v28  ;;  %v470_v46 = vsub.f32 %v173_v35, %v413_v29  ;;  %v455_v47 = vsub.f32 %v158_v36, %v353_v30  ;;  %v276_v48 = vrot.slane %v248_v40, %v2909_v8  ;;  %v3128_v30 = vld [vmem:[%s5260_s0 + $0x40] sm:$0xff] }
  0x3f   :  { %v3042_v49 = vsel %vm498_vm0, %v476_v24, 0.0  ;;  %v3045_v50 = vrot.slane %v297_v44, %v2909_v8  ;;  %v229_v51 = vcombine.high %v2977_v0, %v2977_v0  ;;  %v278_v52 = vcombine.high %v2981_v4, %v2981_v4  ;;  %v3109_v24 = vld [vmem:[%s5260_s0 + $0x30] sm:$0xff] }
  0x40   :  { %v492_v53 = vmul.f32 %v468_v37, %v468_v37  ;;  %v477_v54 = vmul.f32 %v453_v38, %v453_v38  ;;  %v485_v55 = vmul.f32 %v461_v39, %v461_v39  ;;  %v327_v56 = vcombine.high %v2987_v11, %v2987_v11  ;;  %v175_v11 = vld [vmem:[%s5266_s6 + $0x58] sm:$0x7] }
  0x41   :  { %v3054_v57 = vsel %vm498_vm0, %v484_v34, 0.0  ;;  %v493_v58 = vmul.f32 %v469_v42, %v469_v42  ;;  %v478_v59 = vmul.f32 %v454_v43, %v454_v43  ;;  %v231_v8 = vcombine.high %v2996_v17, %v2996_v17  ;;  %v160_v17 = vld [vmem:[%s5266_s6 + $0x1c] sm:$0x7] }
  0x42   :  { %v486_v60 = vmul.f32 %v462_v45, %v462_v45  ;;  %v494_v61 = vmul.f32 %v470_v46, %v470_v46  ;;  %v479_v62 = vmul.f32 %v455_v47, %v455_v47  ;;  %v385_v0 = vrot.slane %v276_v48, %v2929_v16 }
  0x43   :  { %v3069_v3 = vsel %vm498_vm0, %v491_v33, 0.0  ;;  %v417_v4 = vrot.slane %v3045_v50, %v2929_v16  ;;  %v357_v5 = vrot.slane %v229_v51, %v2929_v16  ;;  %v389_v10 = vrot.slane %v278_v52, %v2929_v16  ;;  %v3133_v33 = vld [vmem:[%s5260_s0 + $0x48] sm:$0xff]  ;;  %v3151_v52 = vld [vmem:[%s5260_s0] sm:$0xff] }
  0x44   :  { %v3082_v12 = vsel %vm498_vm0, %v492_v53, 0.0  ;;  %v3085_v13 = vsel %vm498_vm0, %v477_v54, 0.0  ;;  %v3088_v14 = vsel %vm498_vm0, %v485_v55, 0.0  ;;  %v421_v15 = vrot.slane %v327_v56, %v2929_v16 }
  0x45   :  { %v3095_v19 = vsel %vm498_vm0, %v493_v58, 0.0  ;;  %v3098_v20 = vsel %vm498_vm0, %v478_v59, 0.0  ;;  %v361_v21 = vrot.slane %v231_v8, %v2929_v16  ;;  %v280_v22 = vcombine.high %v276_v48, %v276_v48  ;;  %v3161_v58 = vld [vmem:[%s5260_s0 + $0x10] sm:$0xff]  ;;  %v3166_v59 = vld [vmem:[%s5260_s0 + $0x18] sm:$0xff]  ;;  %v3171_v8 = vld [vmem:[%s5260_s0 + $0x20] sm:$0xff] }
  0x46   :  { %v3117_v26 = vsel %vm498_vm0, %v486_v60, 0.0  ;;  %v3120_v27 = vsel %vm498_vm0, %v494_v61, 0.0  ;;  %v3123_v28 = vsel %vm498_vm0, %v479_v62, 0.0  ;;  %v463_v29 = vsub.f32 %v166_v63, %v385_v0 }
  0x47   :  { %v471_v34 = vsub.f32 %v174_v1, %v417_v4  ;;  %v456_v35 = vsub.f32 %v159_v2, %v357_v5  ;;  %v464_v36 = vsub.f32 %v167_v7, %v389_v10  ;;  %v329_v37 = vcombine.high %v3045_v50, %v3045_v50 }
  0x48   :  { %v472_v38 = vsub.f32 %v175_v11, %v421_v15  ;;  %v782_v39 = vand.u32 2147483647, %v3104_v23  ;;  %v783_v40 = vand.u32 2147483647, %v3109_v24  ;;  %v784_v42 = vand.u32 2147483647, %v3114_v25 }
  0x49   :  { %v457_v43 = vsub.f32 %v160_v17, %v361_v21  ;;  %v393_v44 = vrot.slane %v280_v22, %v2929_v16  ;;  %v785_v45 = vand.u32 2147483647, %v3128_v30  ;;  %v786_v46 = vand.u32 2147483647, %v3133_v33  ;;  %v3187_v15 = vld [vmem:[#allocation4] sm:$0xff]  ;;  %v3189_v17 = vld [vmem:[#allocation4 + $0x8] sm:$0xff] }
  0x4a   :  { %503 = vadd.xlane.f32.xlu0 %v3026_v31  ;;  %v487_v47 = vmul.f32 %v463_v29, %v463_v29  ;;  %v168_v31 = vld [vmem:[%s5266_s6 + $0x3c] sm:$0x7]  ;;  %v797_v48 = vsub.f32 0.0, %v782_v39  ;;  %v798_v50 = vsub.f32 0.0, %v783_v40  ;;  %v799_v51 = vsub.f32 0.0, %v784_v42 }
  0x4b   :  { %500 = vadd.xlane.f32.xlu1 %v2984_v6  ;;  %v3156_v6 = vld [vmem:[%s5260_s0 + $0x8] sm:$0xff]  ;;  %v480_v53 = vmul.f32 %v456_v35, %v456_v35  ;;  %v488_v54 = vmul.f32 %v464_v36, %v464_v36  ;;  %v800_v55 = vsub.f32 0.0, %v785_v45  ;;  %v801_v56 = vsub.f32 0.0, %v786_v46 }
  0x4c   :  { %v425_v60 = vrot.slane %v329_v37, %v2929_v16  ;;  %v817_v61 = vmul.f32 1.442695, %v797_v48  ;;  %v819_v62 = vmul.f32 1.442695, %v798_v50  ;;  %v821_v63 = vmul.f32 1.442695, %v799_v51 }
  0x4d   :  { %v495_v0 = vmul.f32 %v471_v34, %v471_v34  ;;  %v3176_v1 = vmul.f32 %v472_v38, %v472_v38  ;;  %v823_v2 = vmul.f32 1.442695, %v800_v55  ;;  %v825_v4 = vmul.f32 1.442695, %v801_v56  ;;  %v176_v16 = vld [vmem:[%s5266_s6 + $0x5c] sm:$0x7] }
  0x4e   :  { %524 = vadd.xlane.f32.xlu0 %v2999_v18  ;;  %2452 = vpow2.f32 %v817_v61  ;;  %v777_v5 = vand.u32 2147483647, %v3151_v52  ;;  %v778_v7 = vand.u32 2147483647, %v3156_v6  ;;  %v779_v10 = vand.u32 2147483647, %v3161_v58 }
  0x4f   :  { %527 = vadd.xlane.f32.xlu1 %v3038_v41  ;;  %v465_v18 = vsub.f32 %v168_v31, %v393_v44  ;;  %2454 = vpow2.f32 %v819_v62  ;;  %v780_v41 = vand.u32 2147483647, %v3166_v59  ;;  %v781_v11 = vand.u32 2147483647, %v3171_v8  ;;  %v3202_v37 = vld [vmem:[%s5260_s0 + $0x58] sm:$0xff]  ;;  %v3207_v45 = vld [vmem:[#allocation4 + $0x10] sm:$0xff] }
  0x50   :  { %2456 = vpow2.f32 %v821_v63  ;;  %v792_v21 = vsub.f32 0.0, %v777_v5  ;;  %v793_v22 = vsub.f32 0.0, %v778_v7  ;;  %v794_v29 = vsub.f32 0.0, %v779_v10  ;;  %v3212_v31 = vld [vmem:[%s5260_s0 + $0x60] sm:$0xff] }
  0x51   :  { %2458 = vpow2.f32 %v823_v2  ;;  %v795_v34 = vsub.f32 0.0, %v780_v41  ;;  %v796_v35 = vsub.f32 0.0, %v781_v11  ;;  %v744_v36 = vadd.f32 %v3189_v17, %v3187_v15  ;;  %v3243_v2 = vld [vmem:[#allocation4 + $0x18] sm:$0xff] }
  0x52   :  { %548 = vadd.xlane.f32.xlu0 %v3029_v32  ;;  %v3197_v32 = vld [vmem:[%s5260_s0 + $0x50] sm:$0xff]  ;;  %2460 = vpow2.f32 %v825_v4  ;;  %v807_v38 = vmul.f32 1.442695, %v792_v21  ;;  %v809_v39 = vmul.f32 1.442695, %v793_v22  ;;  %v3205_v40 = vsel %vm498_vm0, %v487_v47, 0.0 }
  0x53   :  { %551 = vadd.xlane.f32.xlu1 %v3069_v3  ;;  %v811_v3 = vmul.f32 1.442695, %v794_v29  ;;  %v481_v42 = vmul.f32 %v457_v43, %v457_v43  ;;  %v473_v44 = vsub.f32 %v176_v16, %v425_v60  ;;  %v813_v46 = vmul.f32 1.442695, %v795_v34  ;;  %v3221_v43 = vld [vmem:[%s5260_s0 + $0x68] sm:$0xff]  ;;  %v3273_v29 = vld [vmem:[#allocation4 + $0x28] sm:$0xff] }
  0x54   :  { %v3216_v48 = vsel %vm498_vm0, %v480_v53, 0.0  ;;  %2462 = vpow2.f32 %v807_v38  ;;  %v815_v50 = vmul.f32 1.442695, %v796_v35  ;;  %v787_v47 = vand.u32 2147483647, %v3197_v32  ;;  %v3232_v53 = vld [vmem:[%s5260_s0 + $0x70] sm:$0xff] }
  0x55   :  { %v3226_v51 = vsel %vm498_vm0, %v488_v54, 0.0  ;;  %2464 = vpow2.f32 %v809_v39  ;;  %5392 = vst [vmem:[#allocation9_spill] sm:$0xff] %v3232_v53  ;;  %v788_v55 = vand.u32 2147483647, %v3202_v37  ;;  %v489_v56 = vmul.f32 %v465_v18, %v465_v18  ;;  %v3287_v38 = vld [vmem:[%s5264_s4 + $0x10] sm:$0xff] }
  0x56   :  { %506 = vadd.xlane.f32.xlu0 %v3042_v49  ;;  %v745_v49 = vadd.f32 %v744_v36, %v3207_v45  ;;  %2466 = vpow2.f32 %v811_v3  ;;  %v789_v60 = vand.u32 2147483647, %v3212_v31  ;;  %v802_v61 = vsub.f32 0.0, %v787_v47  ;;  %v3282_v36 = vld [vmem:[%s5264_s4] sm:$0xff]  ;;  %5401 = vst [vmem:[#allocation18_spill] sm:$0xff] %v3287_v38  ;;  %v3292_v3 = vld [vmem:[#allocation4 + $0x30] sm:$0xff] }
  0x57   :  { %530 = vadd.xlane.f32.xlu1 %v3054_v57  ;;  %v3237_v57 = vsel %vm498_vm0, %v495_v0, 0.0  ;;  %v497_v54 = vmul.f32 %v473_v44, %v473_v44  ;;  %2468 = vpow2.f32 %v813_v46  ;;  %v790_v62 = vand.u32 2147483647, %v3221_v43  ;;  %5400 = vst [vmem:[#allocation17_spill] sm:$0xff] %v3282_v36  ;;  %5403 = vst [vmem:[#allocation20_spill] sm:$0xff] %v3292_v3  ;;  %v3298_v44 = vld [vmem:[#allocation4 + $0x20] sm:$0xff] }
  0x58   :  { %v3240_v63 = vpop.eup %2452  ;;  %2470 = vpow2.f32 %v815_v50  ;;  %v791_v4 = vand.u32 2147483647, %v3232_v53  ;;  %v803_v5 = vsub.f32 0.0, %v788_v55  ;;  %v827_v7 = vmul.f32 1.442695, %v802_v61  ;;  %v3301_v47 = vld [vmem:[#allocation4 + $0x38] sm:$0xff] }
  0x59   :  { %5393 = vst [vmem:[#allocation10_spill] sm:$0xff] %v3240_v63  ;;  %v3246_v10 = vpop.eup %2454  ;;  %v3251_v0 = vsel %vm498_vm0, %v3176_v1, 0.0  ;;  %v3254_v18 = vsel %vm498_vm0, %v481_v42, 0.0  ;;  %v746_v16 = vadd.f32 %v745_v49, %v3243_v2  ;;  %v3263_v11 = vsel %vm498_vm0, %v489_v56, 0.0  ;;  %5405 = vst [vmem:[#allocation22_spill] sm:$0xff] %v3301_v47  ;;  %v3316_v56 = vld [vmem:[%s5264_s4 + $0x8] sm:$0xff] }
  0x5a   :  { %554 = vadd.xlane.f32.xlu0 %v3082_v12  ;;  %5394 = vst [vmem:[#allocation11_spill] sm:$0xff] %v3246_v10  ;;  %v3257_v12 = vadd.f32 1.0, %v3240_v63  ;;  %v3260_v41 = vpop.eup %2456  ;;  %v3266_v21 = vadd.f32 1.0, %v3246_v10  ;;  %2472 = vpow2.f32 %v827_v7  ;;  %v3271_v22 = vsel %vm498_vm0, %v497_v54, 0.0  ;;  %5408 = vst [vmem:[#allocation25_spill] sm:$0xff] %v3316_v56  ;;  %s2838_s4 = smov 9  }
  0x5b   :  { %509 = vadd.xlane.f32.xlu1 %v3085_v13  ;;  %5396 = vst [vmem:[#allocation13_spill] sm:$0xff] %v3260_v41  ;;  %v804_v13 = vsub.f32 0.0, %v789_v60  ;;  %v3268_v1 = vpop.eup %2458  ;;  %v3276_v34 = vadd.f32 1.0, %v3260_v41  ;;  %v805_v35 = vsub.f32 0.0, %v790_v62  ;;  %v806_v46 = vsub.f32 0.0, %v791_v4 }
  0x5c   :  { %5395 = vst [vmem:[#allocation12_spill] sm:$0xff] %v3257_v12  ;;  %5397 = vst [vmem:[#allocation14_spill] sm:$0xff] %v3266_v21  ;;  %2474 = vrcp.f32 %v3257_v12  ;;  %v3289_v39 = vpop.eup %2460  ;;  %v3295_v42 = vadd.f32 1.0, %v3268_v1  ;;  %v829_v50 = vmul.f32 1.442695, %v803_v5  ;;  %vm1052_vm1 = vcmp.ge.f32.partialorder %v3104_v23, 0.0 }
  0x5d   :  { %5398 = vst [vmem:[#allocation15_spill] sm:$0xff] %v3268_v1  ;;  %5399 = vst [vmem:[#allocation16_spill] sm:$0xff] %v3276_v34  ;;  %2476 = vrcp.f32 %v3266_v21  ;;  %v3304_v49 = vadd.f32 1.0, %v3289_v39  ;;  %v750_v55 = vadd.f32 %v3292_v3, %v3273_v29  ;;  %vm1053_vm2 = vcmp.ge.f32.partialorder %v3109_v24, 0.0  ;;  %v3365_v12 = vld [vmem:[#allocation4 + $0x58] sm:$0xff] }
  0x5e   :  { %5402 = vst [vmem:[#allocation19_spill] sm:$0xff] %v3289_v39  ;;  %533 = vadd.xlane.f32.xlu0 %v3088_v14  ;;  %5404 = vst [vmem:[#allocation21_spill] sm:$0xff] %v3295_v42  ;;  %2478 = vrcp.f32 %v3276_v34  ;;  %v3309_v14 = vadd.f32 %v746_v16, %v3298_v44  ;;  %v831_v60 = vmul.f32 1.442695, %v804_v13  ;;  %v95_v61 = vand.u32 2147483647, %v3282_v36 }
  0x5f   :  { %557 = vadd.xlane.f32.xlu1 %v3095_v19  ;;  %5406 = vst [vmem:[#allocation23_spill] sm:$0xff] %v3304_v49  ;;  %v3318_v19 = vpop.eup %2462  ;;  %2480 = vrcp.f32 %v3295_v42  ;;  %v97_v54 = vand.u32 2147483647, %v3287_v38  ;;  %vm1054_vm3 = vcmp.ge.f32.partialorder %v3114_v25, 0.0  ;;  %v833_v5 = vmul.f32 1.442695, %v805_v35 }
  0x60   :  { %5407 = vst [vmem:[#allocation24_spill] sm:$0xff] %v3309_v14  ;;  %v3324_v62 = vpop.eup %2464  ;;  %2482 = vrcp.f32 %v3304_v49  ;;  %v3329_v4 = vadd.f32 1.0, %v3318_v19  ;;  %v751_v7 = vadd.f32 %v750_v55, %v3301_v47  ;;  %vm1055_vm4 = vcmp.ge.f32.partialorder %v3128_v30, 0.0  ;;  %v3342_v34 = vld [vmem:[#allocation4 + $0x40] sm:$0xff]  ;;  %5416 = vst [vmem:[#allocation33_spill] sm:$0xff] %v3365_v12  ;;  %v3378_v14 = vld [vmem:[#allocation4 + $0x48] sm:$0xff] }
  0x61   :  { %v3332_v16 = vpop.eup %2466  ;;  %v3337_v13 = vadd.f32 1.0, %v3324_v62  ;;  %2484 = vpow2.f32 %v829_v50  ;;  %v835_v9 = vmul.f32 1.442695, %v806_v46  ;;  %v98_v49 = vsub.f32 0.0, %v95_v61  ;;  %5411 = vst [vmem:[#allocation28_spill] sm:$0xff] %v3342_v34  ;;  %5417 = vst [vmem:[#allocation34_spill] sm:$0xff] %v3378_v14 }
  0x62   :  { %5409 = vst [vmem:[#allocation26_spill] sm:$0xff] %v3329_v4  ;;  %512 = vadd.xlane.f32.xlu0 %v3098_v20  ;;  %v3339_v42 = vpop.eup %2468  ;;  %vm1056_vm5 = vcmp.ge.f32.partialorder %v3133_v33, 0.0  ;;  %v3346_v35 = vadd.f32 1.0, %v3332_v16  ;;  %2486 = vrcp.f32 %v3329_v4  ;;  %v100_v20 = vsub.f32 0.0, %v97_v54  ;;  %v3363_v54 = vld [vmem:[#allocation4 + $0x50] sm:$0xff] }
  0x63   :  { %5410 = vst [vmem:[#allocation27_spill] sm:$0xff] %v3337_v13  ;;  %536 = vadd.xlane.f32.xlu1 %v3117_v26  ;;  %v96_v55 = vand.u32 2147483647, %v3316_v56  ;;  %v3350_v21 = vpop.eup %2470  ;;  %v3353_v46 = vadd.f32 1.0, %v3339_v42  ;;  %2488 = vrcp.f32 %v3337_v13  ;;  %v752_v26 = vadd.f32 %v751_v7, %v3342_v34  ;;  %5415 = vst [vmem:[#allocation32_spill] sm:$0xff] %v3363_v54 }
  0x64   :  { %5412 = vst [vmem:[#allocation29_spill] sm:$0xff] %v3346_v35  ;;  %v3359_v61 = vadd.f32 1.0, %v3350_v21  ;;  %2490 = vrcp.f32 %v3346_v35  ;;  %vm1047_vm6 = vcmp.ge.f32.partialorder %v3151_v52, 0.0  ;;  %v3368_v53 = vpop.eup %2472  ;;  %vm1048_vm7 = vcmp.ge.f32.partialorder %v3156_v6, 0.0 }
  0x65   :  { %5413 = vst [vmem:[#allocation30_spill] sm:$0xff] %v3353_v46  ;;  %v99_v4 = vsub.f32 0.0, %v96_v55  ;;  %2492 = vrcp.f32 %v3353_v46  ;;  %v756_v50 = vadd.f32 %v3365_v12, %v3363_v54  ;;  %v840_v36 = vmul.f32 -0.5, %v3318_v19  ;;  %v3387_v46 = vld [vmem:[#allocation4 + $0x60] sm:$0xff] }
  0x66   :  { %5414 = vst [vmem:[#allocation31_spill] sm:$0xff] %v3359_v61  ;;  %560 = vadd.xlane.f32.xlu0 %v3120_v27  ;;  %v2475_v35 = vpop.eup %2474  ;;  %2494 = vrcp.f32 %v3359_v61  ;;  %vm1049_vm8 = vcmp.ge.f32.partialorder %v3161_v58, 0.0  ;;  %v3383_v27 = vadd.f32 1.0, %v3368_v53  ;;  %v101_v55 = vmul.f32 1.442695, %v98_v49 }
  0x67   :  { %515 = vadd.xlane.f32.xlu1 %v3123_v28  ;;  %v105_v38 = vmul.f32 1.442695, %v100_v20  ;;  %v2477_v7 = vpop.eup %2476  ;;  %v1067_v56 = vmul.f32 %v2475_v35, %v3240_v63  ;;  %vm1050_vm9 = vcmp.ge.f32.partialorder %v3166_v59, 0.0  ;;  %2496 = vpow2.f32 %v831_v60 }
  0x68   :  { %v3390_v28 = vadd.f32 %v752_v26, %v3378_v14  ;;  %v103_v13 = vmul.f32 1.442695, %v99_v4  ;;  %v2479_v61 = vpop.eup %2478  ;;  %v1068_v12 = vmul.f32 %v2477_v7, %v3246_v10  ;;  %vm1051_vm10 = vcmp.ge.f32.partialorder %v3171_v8, 0.0 }
  0x69   :  { %2498 = vpow2.f32 %v833_v5  ;;  %v3395_v49 = vadd.f32 %v756_v50, %v3387_v46  ;;  %v2481_v63 = vpop.eup %2480  ;;  %v1069_v60 = vmul.f32 %v2479_v61, %v3260_v41  ;;  %v1082_v26 = vsel %vm1052_vm1, %v2475_v35, %v1067_v56 }
  0x6a   :  { %539 = vadd.xlane.f32.xlu0 %v3205_v40  ;;  %2500 = vpow2.f32 %v835_v9  ;;  %v3402_v4 = vadd.f32 1.0, %v840_v36  ;;  %v2483_v10 = vpop.eup %2482  ;;  %v1070_v5 = vmul.f32 %v2481_v63, %v3268_v1  ;;  %v1083_v50 = vsel %vm1053_vm2, %v2477_v7, %v1068_v12 }
  0x6b   :  { %563 = vadd.xlane.f32.xlu1 %v3237_v57  ;;  %v1235_v20 = vmul.f32 %v1082_v26, %v3273_v29  ;;  %2502 = vrcp.f32 %v3383_v27  ;;  %v3410_v40 = vpop.eup %2484  ;;  %v1071_v23 = vmul.f32 %v2483_v10, %v3289_v39  ;;  %v1084_v9 = vsel %vm1054_vm3, %v2479_v61, %v1069_v60  ;;  %v3489_v39 = vld [vmem:[#allocation4 + $0x68] sm:$0xff] }
  0x6c   :  { %v1236_v36 = vmul.f32 %v1083_v50, %v3292_v3  ;;  %2504 = vpow2.f32 %v101_v55  ;;  %v2487_v57 = vpop.eup %2486  ;;  %v1085_v56 = vsel %vm1055_vm4, %v2481_v63, %v1070_v5  ;;  %v1237_v24 = vmul.f32 %v1084_v9, %v3301_v47 }
  0x6d   :  { %v3420_v12 = vadd.f32 1.0, %v3410_v40  ;;  %vm1057_vm11 = vcmp.ge.f32.partialorder %v3197_v32, 0.0  ;;  %2506 = vpow2.f32 %v105_v38  ;;  %v2489_v29 = vpop.eup %2488  ;;  %v3426_v25 = vsel %vm1056_vm5, %v2483_v10, %v1071_v23 }
  0x6e   :  { %518 = vadd.xlane.f32.xlu0 %v3216_v48  ;;  %v1238_v35 = vmul.f32 %v1085_v56, %v3342_v34  ;;  %v1251_v61 = vadd.f32 %v1236_v36, %v1235_v20  ;;  %v1062_v30 = vmul.f32 %v2487_v57, %v3318_v19  ;;  %v2491_v63 = vpop.eup %2490  ;;  %v1239_v7 = vmul.f32 %v3426_v25, %v3378_v14 }
  0x6f   :  { %542 = vadd.xlane.f32.xlu1 %v3226_v51  ;;  %v1063_v38 = vmul.f32 %v2489_v29, %v3324_v62  ;;  %2508 = vrcp.f32 %v3420_v12  ;;  %v3436_v48 = vmul.f32 -0.5, %v3324_v62  ;;  %v2493_v33 = vpop.eup %2492  ;;  %v1064_v55 = vmul.f32 %v2491_v63, %v3332_v16 }
  0x70   :  { %v1252_v10 = vadd.f32 %v1251_v61, %v1237_v24  ;;  %v1077_v20 = vsel %vm1047_vm6, %v2487_v57, %v1062_v30  ;;  %2510 = vpow2.f32 %v103_v13  ;;  %v2495_v60 = vpop.eup %2494  ;;  %v1065_v51 = vmul.f32 %v2493_v33, %v3339_v42 }
  0x71   :  { %v1078_v5 = vsel %vm1048_vm7, %v2489_v29, %v1063_v38  ;;  %v1230_v23 = vmul.f32 %v1077_v20, %v3187_v15  ;;  %vm1058_vm12 = vcmp.ge.f32.partialorder %v3202_v37, 0.0  ;;  %v1279_v36 = vadd.f32 %v1083_v50, %v1082_v26  ;;  %v3446_v14 = vpop.eup %2496 }
  0x72   :  { %566 = vadd.xlane.f32.xlu0 %v3251_v0  ;;  %v1253_v24 = vadd.f32 %v1252_v10, %v1238_v35  ;;  %v1066_v61 = vmul.f32 %v2495_v60, %v3350_v21  ;;  %v3452_v13 = vsel %vm1049_vm8, %v2491_v63, %v1064_v55  ;;  %v1231_v57 = vmul.f32 %v1078_v5, %v3189_v17 }
  0x73   :  { %v3455_v30 = vpop.eup %2498  ;;  %521 = vadd.xlane.f32.xlu1 %v3254_v18  ;;  %v3460_v26 = vsel %vm1050_vm9, %v2493_v33, %v1065_v51  ;;  %v1232_v0 = vmul.f32 %v3452_v13, %v3207_v45  ;;  %v3465_v50 = vadd.f32 1.0, %v3446_v14  ;;  %v1280_v29 = vadd.f32 %v1279_v36, %v1084_v9 }
  0x74   :  { %v3467_v35 = vpop.eup %2500  ;;  %v1254_v63 = vadd.f32 %v1253_v24, %v1239_v7  ;;  %v3471_v38 = vsel %vm1051_vm10, %v2495_v60, %v1066_v61  ;;  %v1233_v18 = vmul.f32 %v3460_v26, %v3243_v2  ;;  %v1245_v10 = vadd.f32 %v1231_v57, %v1230_v23 }
  0x75   :  { %v2503_v33 = vpop.eup %2502  ;;  %v1234_v55 = vmul.f32 %v3471_v38, %v3298_v44  ;;  %v3478_v51 = vadd.f32 1.0, %v3455_v30  ;;  %v3481_v9 = vadd.f32 1.0, %v3467_v35  ;;  %2512 = vrcp.f32 %v3465_v50 }
  0x76   :  { %v2505_v7 = vpop.eup %2504  ;;  %545 = vadd.xlane.f32.xlu0 %v3263_v11  ;;  %v1246_v60 = vadd.f32 %v1245_v10, %v1232_v0  ;;  %v1072_v36 = vmul.f32 %v2503_v33, %v3368_v53  ;;  %v1281_v24 = vadd.f32 %v1280_v29, %v1085_v56  ;;  %v1273_v23 = vadd.f32 %v1078_v5, %v1077_v20  ;;  %v5419_v10 = vld [vmem:[#allocation9_spill] sm:$0xff] }
  0x77   :  { %v2507_v61 = vpop.eup %2506  ;;  %569 = vadd.xlane.f32.xlu1 %v3271_v22  ;;  %2514 = vrcp.f32 %v3478_v51  ;;  %vm1059_vm13 = vcmp.ge.f32.partialorder %v3212_v31, 0.0  ;;  %v107_v57 = vadd.f32 1.0, %v2505_v7  ;;  %v110_v34 = vmul.f32 -0.5, %v2505_v7 }
  0x78   :  { %v113_v47 = vand.u32 2147483647, %v2505_v7  ;;  %v1247_v3 = vadd.f32 %v1246_v60, %v1233_v18  ;;  %2516 = vrcp.f32 %v3481_v9  ;;  %v3494_v11 = vsel %vm1057_vm11, %v2503_v33, %v1072_v36 }
  0x79   :  { %v125_v56 = vadd.f32 1.0, %v2507_v61  ;;  %v2509_v20 = vpop.eup %2508  ;;  %vm1060_vm14 = vcmp.ge.f32.partialorder %v3221_v43, 0.0  ;;  %v1240_v22 = vmul.f32 %v3494_v11, %v3363_v54  ;;  %2518 = vlog2.f32 %v107_v57 }
  0x7a   :  { %v111_v5 = vadd.f32 1.0, %v110_v34  ;;  %v3501_v0 = vadd.f32 %v3395_v49, %v3489_v39  ;;  %v2511_v29 = vpop.eup %2510  ;;  %v1248_v18 = vadd.f32 %v1247_v3, %v1234_v55  ;;  %vm1061_vm15 = vcmp.ge.f32.partialorder %v5419_v10, 0.0 }
  0x7b   :  { %v1073_v33 = vmul.f32 %v2509_v20, %v3410_v40  ;;  %2520 = vlog2.f32 %v125_v56  ;;  %v128_v60 = vmul.f32 -0.5, %v2507_v61  ;;  %1255 = vadd.xlane.f32.xlu1 %v1254_v63  ;;  %vm3505_vm0 = vcmp.lt.f32.partialorder %v113_v47, 0.0004427343  ;;  %v5424_v56 = vld [vmem:[#allocation33_spill] sm:$0xff] }
  0x7c   :  { %5418 = vst [vmem:[#allocation35_spill] sm:$0xff] %v3501_v0  ;;  %v5420_v36 = vmov 0  ;;  %v116_v1 = vadd.f32 1.0, %v2511_v29  ;;  %v119_v57 = vmul.f32 -0.5, %v2511_v29  ;;  %v122_v34 = vand.u32 2147483647, %v2511_v29  ;;  %1249 = vadd.xlane.f32.xlu0 %v1248_v18 }
  0x7d   :  { %v5421_v36 = vsel %vm3505_vm0, 4294967295, %v5420_v36  ;;  %v3511_v49 = vsel %vm1058_vm12, %v2509_v20, %v1073_v33  ;;  %v129_v3 = vadd.f32 1.0, %v128_v60  ;;  %v131_v55 = vand.u32 2147483647, %v2507_v61  ;;  %v5428_v33 = vld [vmem:[#allocation26_spill] sm:$0xff] }
  0x7e   :  { %5422 = vst [vmem:[#allocation9_spill] sm:$0xff] %v5421_v36  ;;  %v3514_v41 = vadd.f32 %v1281_v24, %v3426_v25  ;;  %v1241_v63 = vmul.f32 %v3511_v49, %v5424_v56  ;;  %v3518_v47 = vmul.f32 %v2505_v7, %v111_v5  ;;  %2522 = vlog2.f32 %v116_v1  ;;  %v5429_v25 = vld [vmem:[#allocation24_spill] sm:$0xff] }
  0x7f   :  { %v120_v0 = vadd.f32 1.0, %v119_v57  ;;  %v3520_v54 = vmul.f32 %v2507_v61, %v129_v3  ;;  %vm3522_vm1 = vcmp.lt.f32.partialorder %v131_v55, 0.0004427343  ;;  %v1274_v20 = vadd.f32 %v1273_v23, %v3452_v13  ;;  %v2513_v60 = vpop.eup %2512  ;;  %748 = vadd.xlane.f32.xlu1 %v5429_v25  ;;  %v5434_v61 = vld [vmem:[#allocation27_spill] sm:$0xff] }
  0x80   :  { %5423 = vst [vmem:[#allocation36_spill] sm:$0xff] %v3514_v41  ;;  %2524 = vlog2.f32 %v5428_v33  ;;  %v1257_v24 = vadd.f32 %v1241_v63, %v1240_v22  ;;  %vm3531_vm2 = vcmp.lt.f32.partialorder %v122_v34, 0.0004427343  ;;  %v5431_v7 = vmov 0  ;;  %v5438_v34 = vld [vmem:[#allocation29_spill] sm:$0xff]  ;;  %v3563_v25 = vld [vmem:[#allocation4 + $0x70] sm:$0xff] }
  0x81   :  { %5425 = vst [vmem:[#allocation37_spill] sm:$0xff] %v3520_v54  ;;  %v3529_v41 = vmul.f32 %v2511_v29, %v120_v0  ;;  %v5432_v7 = vsel %vm3531_vm2, 4294967295, %v5431_v7  ;;  %v3537_v1 = vmul.f32 %v3318_v19, %v3402_v4  ;;  %2526 = vlog2.f32 %v5434_v61  ;;  %v2515_v57 = vpop.eup %2514  ;;  %5440 = vst [vmem:[#allocation29_spill] sm:$0xff] %v3563_v25 }
  0x82   :  { %5433 = vst [vmem:[#allocation24_spill] sm:$0xff] %v5432_v7  ;;  %v1074_v13 = vmul.f32 %v2513_v60, %v3446_v14  ;;  %v1275_v23 = vadd.f32 %v1274_v20, %v3460_v26  ;;  %v5435_v5 = vand.u32 2147483647, %v3318_v19  ;;  %v850_v0 = vadd.f32 1.0, %v3436_v48  ;;  %v2517_v26 = vpop.eup %2516 }
  0x83   :  { %5430 = vst [vmem:[#allocation26_spill] sm:$0xff] %v3529_v41  ;;  %v852_v29 = vand.u32 2147483647, %v3324_v62  ;;  %2528 = vlog2.f32 %v5438_v34  ;;  %v858_v4 = vmul.f32 -0.5, %v3332_v16  ;;  %v861_v3 = vand.u32 2147483647, %v3332_v16  ;;  %v2519_v33 = vpop.eup %2518 }
  0x84   :  { %vm3544_vm3 = vcmp.lt.f32.partialorder %v5435_v5, 0.0004427343  ;;  %v867_v55 = vmul.f32 -0.5, %v3339_v42  ;;  %v1075_v19 = vmul.f32 %v2515_v57, %v3455_v30  ;;  %v3557_v63 = vsel %vm1059_vm13, %v2513_v60, %v1074_v13 }
  0x85   :  { %v3560_v48 = vadd.f32 %v1275_v23, %v3471_v38  ;;  %v851_v20 = vmul.f32 %v3324_v62, %v850_v0  ;;  %v1076_v61 = vmul.f32 %v2517_v26, %v3467_v35  ;;  %v1242_v5 = vmul.f32 %v3557_v63, %v3387_v46  ;;  %v2521_v60 = vpop.eup %2520  ;;  %v5445_v23 = vld [vmem:[#allocation30_spill] sm:$0xff] }
  0x86   :  { %vm3568_vm4 = vcmp.lt.f32.partialorder %v852_v29, 0.0004427343  ;;  %v859_v56 = vadd.f32 1.0, %v858_v4  ;;  %v3574_v38 = vsel %vm1060_vm14, %v2515_v57, %v1075_v19  ;;  %v3576_v13 = vmul.f32 0.6931472, %v2519_v33 }
  0x87   :  { %5439 = vst [vmem:[#allocation27_spill] sm:$0xff] %v3560_v48  ;;  %vm3578_vm5 = vcmp.lt.f32.partialorder %v861_v3, 0.0004427343  ;;  %2530 = vlog2.f32 %v5445_v23  ;;  %v3585_v0 = vsel %vm1061_vm15, %v2517_v26, %v1076_v61  ;;  %v1243_v29 = vmul.f32 %v3574_v38, %v3489_v39 }
  0x88   :  { %v1258_v4 = vadd.f32 %v1257_v24, %v1242_v5  ;;  %v3589_v48 = vmul.f32 0.6931472, %v2521_v60  ;;  %v1244_v57 = vmul.f32 %v3585_v0, %v3563_v25  ;;  %v860_v19 = vmul.f32 %v3332_v16, %v859_v56  ;;  %v2523_v23 = vpop.eup %2522  ;;  %v5447_v5 = vld [vmem:[#allocation31_spill] sm:$0xff] }
  0x89   :  { %v868_v33 = vadd.f32 1.0, %v867_v55  ;;  %v870_v61 = vand.u32 2147483647, %v3339_v42  ;;  %2532 = vlog2.f32 %v5447_v5  ;;  %v3604_v25 = vmul.f32 0.6931472, %v2523_v23 }
  0x8a   :  { %5446 = vst [vmem:[#allocation30_spill] sm:$0xff] %v3589_v48  ;;  %v1259_v26 = vadd.f32 %v1258_v4, %v1243_v29  ;;  %v2525_v60 = vpop.eup %2524  ;;  %v876_v3 = vmul.f32 -0.5, %v3350_v21  ;;  %v879_v16 = vand.u32 2147483647, %v3350_v21  ;;  %v972_v24 = vmax.f32 %v3151_v52, 0.0 }
  0x8b   :  { %5448 = vst [vmem:[#allocation31_spill] sm:$0xff] %v3604_v25  ;;  %v869_v36 = vmul.f32 %v3339_v42, %v868_v33  ;;  %v2527_v56 = vpop.eup %2526  ;;  %v839_v29 = vmul.f32 0.6931472, %v2525_v60  ;;  %vm3609_vm6 = vcmp.lt.f32.partialorder %v870_v61, 0.0004427343  ;;  %v974_v61 = vmax.f32 %v3161_v58, 0.0 }
  0x8c   :  { %v1260_v55 = vadd.f32 %v1259_v26, %v1244_v57  ;;  %v848_v5 = vmul.f32 0.6931472, %v2527_v56  ;;  %v877_v42 = vadd.f32 1.0, %v876_v3  ;;  %vm3618_vm7 = vcmp.lt.f32.partialorder %v879_v16, 0.0004427343 }
  0x8d   :  { %v2529_v48 = vpop.eup %2528  ;;  %v845_v57 = vsel %vm3544_vm3, %v3537_v1, %v839_v29  ;;  %v973_v26 = vmax.f32 %v3156_v6, 0.0  ;;  %v975_v60 = vmax.f32 %v3166_v59, 0.0  ;;  %v976_v23 = vmax.f32 %v3171_v8, 0.0 }
  0x8e   :  { %1261 = vadd.xlane.f32.xlu0 %v1260_v55  ;;  %v854_v56 = vsel %vm3568_vm4, %v851_v20, %v848_v5  ;;  %v857_v3 = vmul.f32 0.6931472, %v2529_v48  ;;  %v878_v16 = vmul.f32 %v3350_v21, %v877_v42  ;;  %v987_v25 = vadd.f32 %v972_v24, %v845_v57 }
  0x8f   :  { %v988_v55 = vadd.f32 %v973_v26, %v854_v56  ;;  %v3633_v41 = vsub.f32 1.0, %v3187_v15  ;;  %v3636_v1 = vsub.f32 1.0, %v3189_v17  ;;  %v3641_v34 = vsub.f32 1.0, %v3207_v45 }
  0x90   :  { %v863_v29 = vsel %vm3578_vm5, %v860_v19, %v857_v3  ;;  %v3644_v48 = vsub.f32 1.0, %v3243_v2  ;;  %v3647_v21 = vsub.f32 1.0, %v3298_v44  ;;  %v1002_v5 = vsub.f32 %v987_v25, %v3151_v52 }
  0x91   :  { %5453 = vst [vmem:[#allocation38_spill] sm:$0xff] %v3633_v41  ;;  %5454 = vst [vmem:[#allocation39_spill] sm:$0xff] %v3636_v1  ;;  %v2531_v22 = vpop.eup %2530  ;;  %v989_v24 = vadd.f32 %v974_v61, %v863_v29  ;;  %v1003_v42 = vsub.f32 %v988_v55, %v3156_v6  ;;  %v1122_v57 = vsub.f32 0.0, %v987_v25  ;;  %v1123_v62 = vsub.f32 0.0, %v988_v55 }
  0x92   :  { %5455 = vst [vmem:[#allocation40_spill] sm:$0xff] %v3641_v34  ;;  %5456 = vst [vmem:[#allocation41_spill] sm:$0xff] %v3644_v48  ;;  %754 = vadd.xlane.f32.xlu0 %v3390_v28  ;;  %v866_v20 = vmul.f32 0.6931472, %v2531_v22  ;;  %v1285_v19 = vadd.f32 %v3511_v49, %v3494_v11  ;;  %2534 = vlog2.f32 %v3383_v27  ;;  %v1092_v28 = vsub.f32 0.0, %v1002_v5 }
  0x93   :  { %5457 = vst [vmem:[#allocation42_spill] sm:$0xff] %v3647_v21  ;;  %v2533_v26 = vpop.eup %2532  ;;  %v1004_v3 = vsub.f32 %v989_v24, %v3161_v58  ;;  %v1093_v22 = vsub.f32 0.0, %v1003_v42  ;;  %v1124_v52 = vsub.f32 0.0, %v989_v24  ;;  %v1137_v7 = vmax.f32 %v1122_v57, -100.0 }
  0x94   :  { %v872_v56 = vsel %vm3609_vm6, %v869_v36, %v866_v20  ;;  %v875_v61 = vmul.f32 0.6931472, %v2533_v26  ;;  %v1107_v25 = vmax.f32 %v1092_v28, -100.0  ;;  %v1138_v54 = vmax.f32 %v1123_v62, -100.0 }
  0x95   :  { %v990_v29 = vadd.f32 %v975_v60, %v872_v56  ;;  %v1094_v6 = vsub.f32 0.0, %v1004_v3  ;;  %v1108_v55 = vmax.f32 %v1093_v22, -100.0  ;;  %v1139_v4 = vmax.f32 %v1124_v52, -100.0 }
  0x96   :  { %v881_v11 = vsel %vm3618_vm7, %v878_v16, %v875_v61  ;;  %v1152_v58 = vmul.f32 %v1107_v25, %v3187_v15  ;;  %v1182_v42 = vmul.f32 %v3633_v41, %v1137_v7  ;;  %v1183_v57 = vmul.f32 %v3636_v1, %v1138_v54 }
  0x97   :  { %v1005_v27 = vsub.f32 %v990_v29, %v3166_v59  ;;  %v1125_v49 = vsub.f32 0.0, %v990_v29  ;;  %v991_v36 = vadd.f32 %v976_v23, %v881_v11  ;;  %v1109_v20 = vmax.f32 %v1094_v6, -100.0 }
  0x98   :  { %v1153_v5 = vmul.f32 %v1108_v55, %v3189_v17  ;;  %v1184_v59 = vmul.f32 %v3641_v34, %v1139_v4  ;;  %v1197_v56 = vadd.f32 %v1182_v42, %v1152_v58  ;;  %v1286_v22 = vadd.f32 %v1285_v19, %v3557_v63 }
  0x99   :  { %v1095_v60 = vsub.f32 0.0, %v1005_v27  ;;  %v1140_v24 = vmax.f32 %v1125_v49, -100.0  ;;  %v1006_v62 = vsub.f32 %v991_v36, %v3171_v8  ;;  %v1126_v33 = vsub.f32 0.0, %v991_v36 }
  0x9a   :  { %v1154_v16 = vmul.f32 %v1109_v20, %v3207_v45  ;;  %v1198_v15 = vadd.f32 %v1183_v57, %v1153_v5  ;;  %v1212_v61 = vsub.f32 0.0, %v1197_v56  ;;  %v930_v29 = vmul.f32 -0.5, %v3368_v53 }
  0x9b   :  { %v1110_v26 = vmax.f32 %v1095_v60, -100.0  ;;  %v1185_v23 = vmul.f32 %v3644_v48, %v1140_v24  ;;  %v1096_v3 = vsub.f32 0.0, %v1006_v62  ;;  %v1141_v17 = vmax.f32 %v1126_v33, -100.0 }
  0x9c   :  { %v1199_v28 = vadd.f32 %v1184_v59, %v1154_v16  ;;  %v2535_v7 = vpop.eup %2534  ;;  %v1213_v8 = vsub.f32 0.0, %v1198_v15  ;;  %v1287_v25 = vadd.f32 %v1286_v22, %v3574_v38  ;;  %v931_v49 = vadd.f32 1.0, %v930_v29 }
  0x9d   :  { %v1155_v54 = vmul.f32 %v1110_v26, %v3243_v2  ;;  %v1111_v45 = vmax.f32 %v1096_v3, -100.0  ;;  %v1186_v52 = vmul.f32 %v3647_v21, %v1141_v17  ;;  %v929_v27 = vmul.f32 0.6931472, %v2535_v7 }
  0x9e   :  { %v1214_v6 = vsub.f32 0.0, %v1199_v28  ;;  %v1304_v11 = vadd.f32 %v1213_v8, %v1212_v61  ;;  %v3676_v63 = vadd.f32 %v1287_v25, %v3585_v0  ;;  %v933_v2 = vand.u32 2147483647, %v3368_v53 }
  0x9f   :  { %v1200_v55 = vadd.f32 %v1185_v23, %v1155_v54  ;;  %v1156_v4 = vmul.f32 %v1111_v45, %v3298_v44  ;;  %2536 = vlog2.f32 %v3420_v12  ;;  %v932_v20 = vmul.f32 %v3368_v53, %v931_v49  ;;  %v5468_v45 = vld [vmem:[#allocation17_spill] sm:$0xff]  ;;  %v5470_v49 = vld [vmem:[#allocation32_spill] sm:$0xff] }
  0xa0   :  { %v1305_v36 = vadd.f32 %v1304_v11, %v1214_v6  ;;  %v939_v58 = vmul.f32 -0.5, %v3410_v40  ;;  %vm3682_vm8 = vcmp.lt.f32.partialorder %v933_v2, 0.0004427343  ;;  %v942_v44 = vand.u32 2147483647, %v3410_v40  ;;  %v5469_v6 = vld [vmem:[#allocation18_spill] sm:$0xff] }
  0xa1   :  { %v1215_v19 = vsub.f32 0.0, %v1200_v55  ;;  %v1201_v38 = vadd.f32 %v1186_v52, %v1156_v4  ;;  %2538 = vlog2.f32 %v3465_v50  ;;  %v935_v60 = vsel %vm3682_vm8, %v932_v20, %v929_v27  ;;  %v5483_v53 = vld [vmem:[#allocation37_spill] sm:$0xff] }
  0xa2   :  { %v940_v12 = vadd.f32 1.0, %v939_v58  ;;  %v948_v24 = vmul.f32 -0.5, %v3446_v14  ;;  %vm3691_vm9 = vcmp.lt.f32.partialorder %v942_v44, 0.0004427343  ;;  %v951_v57 = vand.u32 2147483647, %v3446_v14 }
  0xa3   :  { %v1306_v0 = vadd.f32 %v1305_v36, %v1215_v19  ;;  %v1216_v42 = vsub.f32 0.0, %v1201_v38  ;;  %2540 = vlog2.f32 %v3478_v51  ;;  %v957_v50 = vmul.f32 -0.5, %v3455_v30 }
  0xa4   :  { %v941_v62 = vmul.f32 %v3410_v40, %v940_v12  ;;  %v949_v33 = vadd.f32 1.0, %v948_v24  ;;  %v960_v16 = vand.u32 2147483647, %v3455_v30  ;;  %vm3702_vm10 = vcmp.lt.f32.partialorder %v951_v57, 0.0004427343 }
  0xa5   :  { %v3700_v59 = vadd.f32 %v1306_v0, %v1216_v42  ;;  %2542 = vlog2.f32 %v3481_v9  ;;  %v966_v23 = vmul.f32 -0.5, %v3467_v35  ;;  %v958_v51 = vadd.f32 1.0, %v957_v50  ;;  %v5478_v42 = vld [vmem:[#allocation29_spill] sm:$0xff] }
  0xa6   :  { %v950_v56 = vmul.f32 %v3446_v14, %v949_v33  ;;  %vm3709_vm11 = vcmp.lt.f32.partialorder %v960_v16, 0.0004427343  ;;  %v969_v15 = vand.u32 2147483647, %v3467_v35  ;;  %v982_v17 = vmax.f32 %v3197_v32, 0.0  ;;  %v77_v7 = vpop.permute.xlu0 %76  ;;  %v87_v9 = vpop.permute.xlu1 %86  ;;  %v5480_v50 = vld [vmem:[#allocation25_spill] sm:$0xff] }
  0xa7   :  { %v967_v3 = vadd.f32 1.0, %v966_v23  ;;  %v983_v28 = vmax.f32 %v3202_v37, 0.0  ;;  %v984_v22 = vmax.f32 %v3212_v31, 0.0  ;;  %v959_v54 = vmul.f32 %v3455_v30, %v958_v51  ;;  %v5472_v30 = vld [vmem:[#allocation33_spill] sm:$0xff] }
  0xa8   :  { %vm3718_vm12 = vcmp.lt.f32.partialorder %v969_v15, 0.0004427343  ;;  %v985_v61 = vmax.f32 %v3221_v43, 0.0  ;;  %v986_v8 = vmax.f32 %v5419_v10, 0.0  ;;  %v89_v52 = vmul.f32 %v77_v7, %v5468_v45 }
  0xa9   :  { %v2537_v29 = vpop.eup %2536  ;;  %v91_v25 = vmul.f32 %v87_v9, %v5469_v6  ;;  %v968_v55 = vmul.f32 %v3467_v35, %v967_v3  ;;  %v997_v11 = vadd.f32 %v982_v17, %v935_v60  ;;  %v3728_v4 = vsub.f32 1.0, %v5470_v49 }
  0xaa   :  { %v938_v27 = vmul.f32 0.6931472, %v2537_v29  ;;  %v3731_v2 = vsub.f32 1.0, %v5472_v30  ;;  %v3734_v19 = vsub.f32 1.0, %v3387_v46  ;;  %v5475_v20 = vmax.f32 %v5468_v45, 0.0  ;;  %v82_v0 = vpop.permute.xlu0 %81 }
  0xab   :  { %5471 = vst [vmem:[#allocation17_spill] sm:$0xff] %v3728_v4  ;;  %v2539_v36 = vpop.eup %2538  ;;  %v5476_v38 = vmax.f32 %v5469_v6, 0.0  ;;  %v1012_v35 = vsub.f32 %v997_v11, %v3197_v32  ;;  %v1132_v44 = vsub.f32 0.0, %v997_v11  ;;  %v3744_v24 = vsub.f32 1.0, %v3489_v39 }
  0xac   :  { %5473 = vst [vmem:[#allocation18_spill] sm:$0xff] %v3731_v2  ;;  %5474 = vst [vmem:[#allocation32_spill] sm:$0xff] %v3734_v19  ;;  %v92_v58 = vsub.f32 %v5475_v20, %v89_v52  ;;  %v944_v60 = vsel %vm3691_vm9, %v941_v62, %v938_v27  ;;  %v947_v12 = vmul.f32 0.6931472, %v2539_v36  ;;  %v3747_v57 = vsub.f32 1.0, %v5478_v42  ;;  %v5484_v62 = vld [vmem:[#allocation30_spill] sm:$0xff] }
  0xad   :  { %v94_v5 = vsub.f32 %v5476_v38, %v91_v25  ;;  %5477 = vst [vmem:[#allocation33_spill] sm:$0xff] %v3744_v24  ;;  %v2541_v33 = vpop.eup %2540  ;;  %v90_v16 = vmul.f32 %v82_v0, %v5480_v50  ;;  %v5482_v32 = vsel %vm3505_vm0, %v3518_v47, %v3576_v13  ;;  %v5485_v15 = vsel %vm3522_vm1, %v5483_v53, %v5484_v62  ;;  %v5488_v36 = vld [vmem:[#allocation26_spill] sm:$0xff]  ;;  %v5489_v20 = vld [vmem:[#allocation31_spill] sm:$0xff] }
  0xae   :  { %5479 = vst [vmem:[#allocation29_spill] sm:$0xff] %v3747_v57  ;;  %v134_v51 = vadd.f32 %v5482_v32, %v92_v58  ;;  %v998_v17 = vadd.f32 %v983_v28, %v944_v60  ;;  %v953_v7 = vsel %vm3702_vm10, %v950_v56, %v947_v12  ;;  %v956_v9 = vmul.f32 0.6931472, %v2541_v33  ;;  %v5495_v56 = vld [vmem:[#allocation35_spill] sm:$0xff] }
  0xaf   :  { %v136_v3 = vadd.f32 %v5485_v15, %v94_v5  ;;  %v1102_v29 = vsub.f32 0.0, %v1012_v35  ;;  %v1147_v45 = vmax.f32 %v1132_v44, -100.0  ;;  %v2543_v52 = vpop.eup %2542  ;;  %v5486_v6 = vmax.f32 %v5480_v50, 0.0 }
  0xb0   :  { %140 = vrot.lane.b32.xlu1 %v134_v51, %s2838_s4  ;;  %v999_v47 = vadd.f32 %v984_v22, %v953_v7  ;;  %v1013_v18 = vsub.f32 %v998_v17, %v3202_v37  ;;  %v1133_v13 = vsub.f32 0.0, %v998_v17  ;;  %v962_v11 = vsel %vm3709_vm11, %v959_v54, %v956_v9  ;;  %v5491_v9 = vld [vmem:[#allocation12_spill] sm:$0xff] }
  0xb1   :  { %v93_v25 = vsub.f32 %v5486_v6, %v90_v16  ;;  %v965_v28 = vmul.f32 0.6931472, %v2543_v52  ;;  %v1117_v27 = vmax.f32 %v1102_v29, -100.0  ;;  %v1192_v26 = vmul.f32 %v3728_v4, %v1147_v45 }
  0xb2   :  { %v5490_v58 = vsel %vm3531_vm2, %v5488_v36, %v5489_v20  ;;  %v1000_v5 = vadd.f32 %v985_v61, %v962_v11  ;;  %v1014_v35 = vsub.f32 %v999_v47, %v3212_v31  ;;  %v1103_v22 = vsub.f32 0.0, %v1013_v18 }
  0xb3   :  { %v135_v38 = vadd.f32 %v5490_v58, %v93_v25  ;;  %v971_v37 = vsel %vm3718_vm12, %v968_v55, %v965_v28  ;;  %v1134_v44 = vsub.f32 0.0, %v999_v47  ;;  %v1148_v40 = vmax.f32 %v1133_v13, -100.0  ;;  %v5493_v13 = vld [vmem:[#allocation14_spill] sm:$0xff] }
  0xb4   :  { %v1162_v54 = vmul.f32 %v1117_v27, %v5470_v49  ;;  %144 = vrot.lane.b32.xlu1 %v136_v3, %s2838_s4  ;;  %v1001_v0 = vadd.f32 %v986_v8, %v971_v37  ;;  %v1015_v60 = vsub.f32 %v1000_v5, %v3221_v43  ;;  %v1104_v12 = vsub.f32 0.0, %v1014_v35  ;;  %v5494_v27 = vld [vmem:[#allocation11_spill] sm:$0xff] }
  0xb5   :  { %142 = vrot.lane.b32.xlu0 %v135_v38, %s2838_s4  ;;  %v1118_v33 = vmax.f32 %v1103_v22, -100.0  ;;  %v1135_v50 = vsub.f32 0.0, %v1000_v5  ;;  %v1149_v16 = vmax.f32 %v1134_v44, -100.0  ;;  %v1193_v61 = vmul.f32 %v3731_v2, %v1148_v40  ;;  %v5496_v22 = vld [vmem:[#allocation16_spill] sm:$0xff]  ;;  %v5499_v40 = vld [vmem:[#allocation13_spill] sm:$0xff] }
  0xb6   :  { %v1207_v31 = vadd.f32 %v1192_v26, %v1162_v54  ;;  %v1016_v23 = vsub.f32 %v1001_v0, %v5419_v10  ;;  %v1105_v14 = vsub.f32 0.0, %v1015_v60  ;;  %v1119_v55 = vmax.f32 %v1104_v12, -100.0  ;;  %v5492_v10 = vld [vmem:[#allocation10_spill] sm:$0xff]  ;;  %v5502_v12 = vld [vmem:[#allocation21_spill] sm:$0xff] }
  0xb7   :  { %v1136_v32 = vsub.f32 0.0, %v1001_v0  ;;  %v1150_v51 = vmax.f32 %v1135_v50, -100.0  ;;  %v1163_v49 = vmul.f32 %v1118_v33, %v5472_v30  ;;  %v1194_v53 = vmul.f32 %v3734_v19, %v1149_v16  ;;  %v5503_v33 = vld [vmem:[#allocation15_spill] sm:$0xff]  ;;  %v3879_v44 = vld [vmem:[%s5261_s1 + $0x38] sm:$0xff] }
  0xb8   :  { %v1222_v8 = vsub.f32 0.0, %v1207_v31  ;;  %v1106_v62 = vsub.f32 0.0, %v1016_v23  ;;  %v1120_v43 = vmax.f32 %v1105_v14, -100.0  ;;  %v1164_v3 = vmul.f32 %v1119_v55, %v3387_v46  ;;  %v5504_v55 = vld [vmem:[#allocation23_spill] sm:$0xff] }
  0xb9   :  { %v1151_v15 = vmax.f32 %v1136_v32, -100.0  ;;  %v1195_v17 = vmul.f32 %v3744_v24, %v1150_v51  ;;  %v1208_v7 = vadd.f32 %v1193_v61, %v1163_v49  ;;  %2544 = vlog2.f32 %v5491_v9  ;;  %v5505_v32 = vld [vmem:[#allocation19_spill] sm:$0xff] }
  0xba   :  { %v885_v29 = vmul.f32 -0.5, %v5492_v10  ;;  %v1121_v45 = vmax.f32 %v1106_v62, -100.0  ;;  %v1165_v52 = vmul.f32 %v1120_v43, %v3489_v39  ;;  %v1209_v6 = vadd.f32 %v1194_v53, %v1164_v3 }
  0xbb   :  { %v1196_v30 = vmul.f32 %v3747_v57, %v1151_v15  ;;  %v1223_v25 = vsub.f32 0.0, %v1208_v7  ;;  %v888_v18 = vand.u32 2147483647, %v5492_v10  ;;  %2546 = vlog2.f32 %v5493_v13  ;;  %v2734_v15 = vld [vmem:[%s5260_s0 + $0x28] sm:$0xff] }
  0xbc   :  { %v886_v47 = vadd.f32 1.0, %v885_v29  ;;  %v1166_v46 = vmul.f32 %v1121_v45, %v5478_v42  ;;  %v1210_v11 = vadd.f32 %v1195_v17, %v1165_v52  ;;  %v1224_v28 = vsub.f32 0.0, %v1209_v6  ;;  %v3834_v29 = vld [vmem:[%s5261_s1 + $0x28] sm:$0xff] }
  0xbd   :  { %v894_v26 = vmul.f32 -0.5, %v5494_v27  ;;  %v3794_v36 = vadd.f32 %v5495_v56, %v5478_v42  ;;  %v1316_v39 = vadd.f32 %v1223_v25, %v1222_v8  ;;  %v897_v58 = vand.u32 2147483647, %v5494_v27  ;;  %v2736_v25 = vld [vmem:[%s5260_s0 + $0x38] sm:$0xff]  ;;  %v3862_v56 = vld [vmem:[#allocation4 + $0x28] sm:$0xff] }
  0xbe   :  { %v887_v20 = vmul.f32 %v5492_v10, %v886_v47  ;;  %v1211_v38 = vadd.f32 %v1196_v30, %v1166_v46  ;;  %v1225_v5 = vsub.f32 0.0, %v1210_v11  ;;  %2548 = vlog2.f32 %v5496_v22  ;;  %v2735_v30 = vld [vmem:[%s5260_s0 + $0x30] sm:$0xff] }
  0xbf   :  { %v895_v35 = vadd.f32 1.0, %v894_v26  ;;  %v1317_v37 = vadd.f32 %v1316_v39, %v1224_v28  ;;  %vm3799_vm13 = vcmp.lt.f32.partialorder %v888_v18, 0.0004427343  ;;  %v903_v54 = vmul.f32 -0.5, %v5499_v40  ;;  %v2737_v18 = vld [vmem:[%s5260_s0 + $0x40] sm:$0xff]  ;;  %v3852_v46 = vld [vmem:[%s5261_s1 + $0x30] sm:$0xff] }
  0xc0   :  { %v906_v42 = vand.u32 2147483647, %v5499_v40  ;;  %v1226_v0 = vsub.f32 0.0, %v1211_v38  ;;  %vm3805_vm14 = vcmp.lt.f32.partialorder %v897_v58, 0.0004427343  ;;  %2550 = vlog2.f32 %v5502_v12  ;;  %v5512_v38 = vld [vmem:[#allocation20_spill] sm:$0xff] }
  0xc1   :  { %v912_v50 = vmul.f32 -0.5, %v5503_v33  ;;  %v1318_v16 = vadd.f32 %v1317_v37, %v1225_v5  ;;  %v896_v61 = vmul.f32 %v5494_v27, %v895_v35  ;;  %v904_v31 = vadd.f32 1.0, %v903_v54  ;;  %v3859_v27 = vld [vmem:[%s5260_s0 + $0x48] sm:$0xff]  ;;  %v5513_v35 = vld [vmem:[#allocation22_spill] sm:$0xff] }
  0xc2   :  { %v915_v23 = vand.u32 2147483647, %v5503_v33  ;;  %2552 = vlog2.f32 %v5504_v55  ;;  %v921_v51 = vmul.f32 -0.5, %v5505_v32  ;;  %v924_v49 = vand.u32 2147483647, %v5505_v32  ;;  %v3889_v54 = vld [vmem:[%s5261_s1 + $0x48] sm:$0xff] }
  0xc3   :  { %v913_v14 = vadd.f32 1.0, %v912_v50  ;;  %v2545_v53 = vpop.eup %2544  ;;  %v3816_v8 = vadd.f32 %v1318_v16, %v1226_v0  ;;  %v905_v62 = vmul.f32 %v5499_v40, %v904_v31  ;;  %vm3819_vm15 = vcmp.lt.f32.partialorder %v906_v42, 0.0004427343  ;;  %v3884_v40 = vld [vmem:[%s5261_s1 + $0x40] sm:$0xff] }
  0xc4   :  { %v977_v3 = vmax.f32 %v2734_v15, 0.0  ;;  %v884_v17 = vmul.f32 0.6931472, %v2545_v53  ;;  %vm3827_vm0 = vcmp.lt.f32.partialorder %v915_v23, 0.0004427343  ;;  %v922_v10 = vadd.f32 1.0, %v921_v51 }
  0xc5   :  { %v914_v7 = vmul.f32 %v5503_v33, %v913_v14  ;;  %v2547_v45 = vpop.eup %2546  ;;  %vm3836_vm1 = vcmp.lt.f32.partialorder %v924_v49, 0.0004427343  ;;  %v978_v6 = vmax.f32 %v2735_v30, 0.0  ;;  %v979_v47 = vmax.f32 %v2736_v25, 0.0  ;;  %v5515_v12 = vld [vmem:[#allocation34_spill] sm:$0xff] }
  0xc6   :  { %v980_v13 = vmax.f32 %v2737_v18, 0.0  ;;  %v890_v11 = vsel %vm3799_vm13, %v887_v20, %v884_v17  ;;  %v893_v28 = vmul.f32 0.6931472, %v2547_v45  ;;  %v981_v26 = vmax.f32 %v3859_v27, 0.0  ;;  %v5514_v20 = vld [vmem:[#allocation28_spill] sm:$0xff] }
  0xc7   :  { %v3865_v39 = vsub.f32 1.0, %v3862_v56  ;;  %v992_v58 = vadd.f32 %v977_v3, %v890_v11  ;;  %v3868_v5 = vsub.f32 1.0, %v5512_v38  ;;  %v3871_v22 = vsub.f32 1.0, %v5513_v35 }
  0xc8   :  { %v3874_v37 = vsub.f32 1.0, %v5514_v20  ;;  %v2549_v42 = vpop.eup %2548  ;;  %v899_v0 = vsel %vm3805_vm14, %v896_v61, %v893_v28  ;;  %v3894_v33 = vsub.f32 1.0, %v5515_v12  ;;  %v1349_v50 = vand.u32 2147483647, %v3834_v29 }
  0xc9   :  { %v1350_v16 = vand.u32 2147483647, %v3852_v46  ;;  %v902_v31 = vmul.f32 0.6931472, %v2549_v42  ;;  %v993_v23 = vadd.f32 %v978_v6, %v899_v0  ;;  %v1007_v14 = vsub.f32 %v992_v58, %v2734_v15 }
  0xca   :  { %5516 = vst [vmem:[#allocation25_spill] sm:$0xff] %v3894_v33  ;;  %v1127_v55 = vsub.f32 0.0, %v992_v58  ;;  %v2551_v51 = vpop.eup %2550  ;;  %v923_v49 = vmul.f32 %v5505_v32, %v922_v10  ;;  %v1351_v53 = vand.u32 2147483647, %v3879_v44  ;;  %v1352_v3 = vand.u32 2147483647, %v3884_v40 }
  0xcb   :  { %v1353_v60 = vand.u32 2147483647, %v3889_v54  ;;  %v908_v61 = vsel %vm3819_vm15, %v905_v62, %v902_v31  ;;  %v911_v17 = vmul.f32 0.6931472, %v2551_v51  ;;  %v1008_v45 = vsub.f32 %v993_v23, %v2735_v30 }
  0xcc   :  { %v1097_v11 = vsub.f32 0.0, %v1007_v14  ;;  %v2553_v28 = vpop.eup %2552  ;;  %v994_v38 = vadd.f32 %v979_v47, %v908_v61  ;;  %v1128_v6 = vsub.f32 0.0, %v993_v23  ;;  %v1142_v15 = vmax.f32 %v1127_v55, -100.0  ;;  %v3910_v14 = vld [vmem:[#allocation4 + $0x30] sm:$0xff] }
  0xcd   :  { %v1364_v58 = vsub.f32 0.0, %v1349_v50  ;;  %v917_v32 = vsel %vm3827_vm0, %v914_v7, %v911_v17  ;;  %v920_v10 = vmul.f32 0.6931472, %v2553_v28  ;;  %v1098_v35 = vsub.f32 0.0, %v1008_v45 }
  0xce   :  { %v1112_v20 = vmax.f32 %v1097_v11, -100.0  ;;  %v995_v42 = vadd.f32 %v980_v13, %v917_v32  ;;  %v1009_v0 = vsub.f32 %v994_v38, %v2736_v25  ;;  %v1129_v12 = vsub.f32 0.0, %v994_v38 }
  0xcf   :  { %v1143_v57 = vmax.f32 %v1128_v6, -100.0  ;;  %v926_v62 = vsel %vm3836_vm1, %v923_v49, %v920_v10  ;;  %v1113_v43 = vmax.f32 %v1098_v35, -100.0  ;;  %v1187_v47 = vmul.f32 %v3865_v39, %v1142_v15  ;;  %v3917_v6 = vld [vmem:[#allocation4 + $0x38] sm:$0xff] }
  0xd0   :  { %v1157_v30 = vmul.f32 %v3862_v56, %v1112_v20  ;;  %v996_v31 = vadd.f32 %v981_v26, %v926_v62  ;;  %v1010_v50 = vsub.f32 %v995_v42, %v2737_v18  ;;  %v1099_v23 = vsub.f32 0.0, %v1009_v0  ;;  %v3921_v20 = vld [vmem:[#allocation4 + $0x40] sm:$0xff] }
  0xd1   :  { %v1130_v9 = vsub.f32 0.0, %v995_v42  ;;  %v1144_v7 = vmax.f32 %v1129_v12, -100.0  ;;  %v1158_v13 = vmul.f32 %v3910_v14, %v1113_v43  ;;  %v1188_v25 = vmul.f32 %v3868_v5, %v1143_v57  ;;  %v5517_v12 = vld [vmem:[#allocation36_spill] sm:$0xff] }
  0xd2   :  { %v1202_v55 = vadd.f32 %v1187_v47, %v1157_v30  ;;  %v1011_v52 = vsub.f32 %v996_v31, %v3859_v27  ;;  %v1100_v51 = vsub.f32 0.0, %v1010_v50  ;;  %v1114_v49 = vmax.f32 %v1099_v23, -100.0  ;;  %v3927_v50 = vld [vmem:[#allocation4 + $0x48] sm:$0xff] }
  0xd3   :  { %v1131_v61 = vsub.f32 0.0, %v996_v31  ;;  %v1145_v17 = vmax.f32 %v1130_v9, -100.0  ;;  %v1189_v18 = vmul.f32 %v3871_v22, %v1144_v7  ;;  %v1203_v26 = vadd.f32 %v1188_v25, %v1158_v13  ;;  %v5518_v31 = vld [vmem:[#allocation27_spill] sm:$0xff] }
  0xd4   :  { %760 = vadd.xlane.f32.xlu0 %v3794_v36  ;;  %v1217_v45 = vsub.f32 0.0, %v1202_v55  ;;  %v1101_v11 = vsub.f32 0.0, %v1011_v52  ;;  %v1115_v28 = vmax.f32 %v1100_v51, -100.0  ;;  %v1159_v57 = vmul.f32 %v3917_v6, %v1114_v49 }
  0xd5   :  { %v1146_v38 = vmax.f32 %v1131_v61, -100.0  ;;  %v1190_v15 = vmul.f32 %v3874_v37, %v1145_v17  ;;  %v1218_v27 = vsub.f32 0.0, %v1203_v26  ;;  %v1365_v32 = vsub.f32 0.0, %v1350_v16  ;;  %v3950_v61 = vld [vmem:[%s5261_s1 + $0x18] sm:$0xff] }
  0xd6   :  { %v1366_v10 = vsub.f32 0.0, %v1351_v53  ;;  %v1116_v35 = vmax.f32 %v1101_v11, -100.0  ;;  %v1160_v36 = vmul.f32 %v3921_v20, %v1115_v28  ;;  %v1204_v0 = vadd.f32 %v1189_v18, %v1159_v57  ;;  %5521 = vst [vmem:[#allocation30_spill] sm:$0xff] %v3950_v61  ;;  %v3955_v18 = vld [vmem:[%s5261_s1 + $0x20] sm:$0xff] }
  0xd7   :  { %v1191_v42 = vmul.f32 %v3894_v33, %v1146_v38  ;;  %v1310_v62 = vadd.f32 %v1218_v27, %v1217_v45  ;;  %v1367_v43 = vsub.f32 0.0, %v1352_v3  ;;  %v1368_v30 = vsub.f32 0.0, %v1353_v60  ;;  %v3934_v3 = vld [vmem:[%s5261_s1] sm:$0xff]  ;;  %v3939_v60 = vld [vmem:[%s5261_s1 + $0x8] sm:$0xff]  ;;  %5522 = vst [vmem:[#allocation24_spill] sm:$0xff] %v3955_v18 }
  0xd8   :  { %1283 = vadd.xlane.f32.xlu0 %v5517_v12  ;;  %v1384_v47 = vmul.f32 1.442695, %v1364_v58  ;;  %1277 = vadd.xlane.f32.xlu1 %v5518_v31  ;;  %v1161_v16 = vmul.f32 %v3927_v50, %v1116_v35  ;;  %v1205_v53 = vadd.f32 %v1190_v15, %v1160_v36  ;;  %v1219_v23 = vsub.f32 0.0, %v1204_v0  ;;  %5519 = vst [vmem:[#allocation9_spill] sm:$0xff] %v3934_v3  ;;  %v3968_v35 = vld [vmem:[%s5261_s1 + $0x50] sm:$0xff]  ;;  %v3978_v0 = vld [vmem:[%s5261_s1 + $0x58] sm:$0xff] }
  0xd9   :  { %v1386_v9 = vmul.f32 1.442695, %v1365_v32  ;;  %v1388_v7 = vmul.f32 1.442695, %v1366_v10  ;;  %v1390_v13 = vmul.f32 1.442695, %v1367_v43 }
  0xda   :  { %2554 = vpow2.f32 %v1384_v47  ;;  %v1392_v25 = vmul.f32 1.442695, %v1368_v30  ;;  %v1206_v55 = vadd.f32 %v1191_v42, %v1161_v16  ;;  %v1220_v52 = vsub.f32 0.0, %v1205_v53  ;;  %5520 = vst [vmem:[#allocation37_spill] sm:$0xff] %v3939_v60  ;;  %5523 = vst [vmem:[#allocation26_spill] sm:$0xff] %v3978_v0  ;;  %v3988_v30 = vld [vmem:[%s5261_s1 + $0x60] sm:$0xff] }
  0xdb   :  { %v1311_v51 = vadd.f32 %v1310_v62, %v1219_v23  ;;  %2556 = vpow2.f32 %v1386_v9  ;;  %v1345_v26 = vand.u32 2147483647, %v3939_v60  ;;  %v1347_v11 = vand.u32 2147483647, %v3950_v61  ;;  %5524 = vst [vmem:[#allocation31_spill] sm:$0xff] %v3988_v30  ;;  %v3999_v16 = vld [vmem:[%s5261_s1 + $0x68] sm:$0xff] }
  0xdc   :  { %1308 = vadd.xlane.f32.xlu0 %v3700_v59  ;;  %2558 = vpow2.f32 %v1388_v7  ;;  %1289 = vadd.xlane.f32.xlu1 %v3676_v63  ;;  %v1221_v58 = vsub.f32 0.0, %v1206_v55  ;;  %v3945_v59 = vld [vmem:[%s5261_s1 + $0x10] sm:$0xff]  ;;  %v1344_v63 = vand.u32 2147483647, %v3934_v3  ;;  %v1348_v57 = vand.u32 2147483647, %v3955_v18 }
  0xdd   :  { %v1312_v49 = vadd.f32 %v1311_v51, %v1220_v52  ;;  %2560 = vpow2.f32 %v1390_v13  ;;  %v1346_v45 = vand.u32 2147483647, %v3945_v59  ;;  %v1360_v38 = vsub.f32 0.0, %v1345_v26  ;;  %v4004_v53 = vld [vmem:[%s5261_s1 + $0x70] sm:$0xff] }
  0xde   :  { %2562 = vpow2.f32 %v1392_v25  ;;  %v1359_v28 = vsub.f32 0.0, %v1344_v63  ;;  %v1362_v42 = vsub.f32 0.0, %v1347_v11  ;;  %v1363_v43 = vsub.f32 0.0, %v1348_v57  ;;  %v501_v11 = vpop.xlane.xlu1 %500 }
  0xdf   :  { %v1313_v17 = vadd.f32 %v1312_v49, %v1221_v58  ;;  %v1376_v27 = vmul.f32 1.442695, %v1360_v38  ;;  %v1361_v10 = vsub.f32 0.0, %v1346_v45  ;;  %v1354_v23 = vand.u32 2147483647, %v3968_v35  ;;  %v504_v45 = vpop.xlane.xlu0 %503 }
  0xe0   :  { %1320 = vadd.xlane.f32.xlu0 %v3816_v8  ;;  %v1374_v15 = vmul.f32 1.442695, %v1359_v28  ;;  %v1355_v25 = vand.u32 2147483647, %v3978_v0  ;;  %v1380_v52 = vmul.f32 1.442695, %v1362_v42 }
  0xe1   :  { %1314 = vadd.xlane.f32.xlu1 %v1313_v17  ;;  %v1378_v13 = vmul.f32 1.442695, %v1361_v10  ;;  %v1356_v51 = vand.u32 2147483647, %v3988_v30  ;;  %v1382_v58 = vmul.f32 1.442695, %v1363_v43 }
  0xe2   :  { %2564 = vpow2.f32 %v1374_v15  ;;  %v1357_v49 = vand.u32 2147483647, %v3999_v16  ;;  %v1358_v17 = vand.u32 2147483647, %v4004_v53  ;;  %v1369_v63 = vsub.f32 0.0, %v1354_v23  ;;  %v5525_v10 = vld [vmem:[#allocation8_spill] sm:$0xff] }
  0xe3   :  { %2566 = vpow2.f32 %v1376_v27  ;;  %v1370_v26 = vsub.f32 0.0, %v1355_v25  ;;  %v1371_v28 = vsub.f32 0.0, %v1356_v51  ;;  %v605_v42 = vrot.slane %v504_v45, %v5525_v10 }
  0xe4   :  { %v3963_v32 = vpop.eup %2554  ;;  %v1372_v38 = vsub.f32 0.0, %v1357_v49  ;;  %v1373_v57 = vsub.f32 0.0, %v1358_v17  ;;  %v1394_v15 = vmul.f32 1.442695, %v1369_v63  ;;  %v601_v43 = vrot.slane %v501_v11, %v5525_v10  ;;  %v525_v63 = vpop.xlane.xlu0 %524 }
  0xe5   :  { %v3970_v8 = vpop.eup %2556  ;;  %v3973_v36 = vadd.f32 1.0, %v3963_v32  ;;  %v1396_v27 = vmul.f32 1.442695, %v1370_v26  ;;  %v1398_v24 = vmul.f32 1.442695, %v1371_v28  ;;  %vm694_vm2 = vcmask 1041409   ;;  %v528_v26 = vpop.xlane.xlu1 %527 }
  0xe6   :  { %v3980_v12 = vpop.eup %2558  ;;  %v3983_v62 = vadd.f32 1.0, %v3970_v8  ;;  %vm1619_vm3 = vcmp.ge.f32.partialorder %v3834_v29, 0.0  ;;  %vm1620_vm4 = vcmp.ge.f32.partialorder %v3852_v46, 0.0  ;;  %vm1621_vm5 = vcmp.ge.f32.partialorder %v3879_v44, 0.0 }
  0xe7   :  { %v3990_v47 = vpop.eup %2560  ;;  %v3993_v31 = vadd.f32 1.0, %v3980_v12  ;;  %2568 = vrcp.f32 %v3973_v36  ;;  %v1400_v25 = vmul.f32 1.442695, %v1372_v38  ;;  %vm1622_vm6 = vcmp.ge.f32.partialorder %v3884_v40, 0.0 }
  0xe8   :  { %v4007_v9 = vpop.eup %2562  ;;  %v4010_v7 = vadd.f32 1.0, %v3990_v47  ;;  %2570 = vrcp.f32 %v3983_v62  ;;  %v4040_v17 = vsel %vm694_vm2, %v605_v42, %v601_v43  ;;  %vm1623_vm7 = vcmp.ge.f32.partialorder %v3889_v54, 0.0 }
  0xe9   :  { %v4015_v55 = vadd.f32 1.0, %v4007_v9  ;;  %2572 = vrcp.f32 %v3993_v31  ;;  %5526 = vst [vmem:[#allocation12_spill] sm:$0xff] %v4040_v17  ;;  %v633_v28 = vrot.slane %v525_v63, %v5525_v10  ;;  %v637_v38 = vrot.slane %v528_v26, %v5525_v10 }
  0xea   :  { %2574 = vrcp.f32 %v4010_v7  ;;  %vm1614_vm8 = vcmp.ge.f32.partialorder %v3934_v3, 0.0  ;;  %vm1615_vm9 = vcmp.ge.f32.partialorder %v3939_v60, 0.0  ;;  %vm1616_vm10 = vcmp.ge.f32.partialorder %v3945_v59, 0.0  ;;  %v4183_v3 = vld [vmem:[#allocation4 + $0x10] sm:$0xff] }
  0xeb   :  { %2576 = vrcp.f32 %v4015_v55  ;;  %v4067_v21 = vsel %vm694_vm2, %v637_v38, %v633_v28  ;;  %vm1617_vm11 = vcmp.ge.f32.partialorder %v3950_v61, 0.0  ;;  %vm1618_vm12 = vcmp.ge.f32.partialorder %v3955_v18, 0.0  ;;  %5548 = vst [vmem:[#allocation27_spill] sm:$0xff] %v4183_v3 }
  0xec   :  { %2578 = vpow2.f32 %v1378_v13  ;;  %v4025_v19 = vpop.eup %2564  ;;  %5528 = vst [vmem:[#allocation14_spill] sm:$0xff] %v4067_v21  ;;  %vm1624_vm13 = vcmp.ge.f32.partialorder %v3968_v35, 0.0  ;;  %vm1625_vm14 = vcmp.ge.f32.partialorder %v3978_v0, 0.0  ;;  %vm1626_vm15 = vcmp.ge.f32.partialorder %v3988_v30, 0.0 }
  0xed   :  { %2580 = vpow2.f32 %v1380_v52  ;;  %v4029_v23 = vpop.eup %2566  ;;  %v4033_v13 = vadd.f32 1.0, %v4025_v19  ;;  %vm1627_vm1 = vcmp.ge.f32.partialorder %v3999_v16, 0.0 }
  0xee   :  { %2582 = vpow2.f32 %v1382_v58  ;;  %v4037_v51 = vadd.f32 1.0, %v4029_v23  ;;  %v1402_v58 = vmul.f32 1.442695, %v1373_v57 }
  0xef   :  { %2584 = vpow2.f32 %v1394_v15 }
  0xf0   :  { %2586 = vpow2.f32 %v1396_v27 }
  0xf1   :  { %v2569_v52 = vpop.eup %2568  ;;  %2588 = vpow2.f32 %v1398_v24 }
  0xf2   :  { %v2571_v49 = vpop.eup %2570  ;;  %v1634_v45 = vmul.f32 %v2569_v52, %v3963_v32  ;;  %2590 = vrcp.f32 %v4033_v13 }
  0xf3   :  { %v2573_v11 = vpop.eup %2572  ;;  %v1635_v24 = vmul.f32 %v2571_v49, %v3970_v8  ;;  %2592 = vrcp.f32 %v4037_v51 }
  0xf4   :  { %v2575_v57 = vpop.eup %2574  ;;  %v1636_v15 = vmul.f32 %v2573_v11, %v3980_v12  ;;  %v1649_v27 = vsel %vm1619_vm3, %v2569_v52, %v1634_v45  ;;  %2594 = vpow2.f32 %v1400_v25  ;;  %vm1628_vm3 = vcmp.ge.f32.partialorder %v4004_v53, 0.0 }
  0xf5   :  { %v2577_v42 = vpop.eup %2576  ;;  %v1637_v43 = vmul.f32 %v2575_v57, %v3990_v47  ;;  %v1650_v63 = vsel %vm1620_vm4, %v2571_v49, %v1635_v24  ;;  %v1787_v26 = vmul.f32 %v3862_v56, %v1649_v27  ;;  %2596 = vpow2.f32 %v1402_v58 }
  0xf6   :  { %v4058_v2 = vpop.eup %2578  ;;  %v1638_v4 = vmul.f32 %v2577_v42, %v4007_v9  ;;  %v1651_v52 = vsel %vm1621_vm5, %v2573_v11, %v1636_v15  ;;  %v1788_v25 = vmul.f32 %v3910_v14, %v1650_v63  ;;  %v1831_v45 = vadd.f32 %v1650_v63, %v1649_v27 }
  0xf7   :  { %v4064_v17 = vpop.eup %2580  ;;  %v1652_v49 = vsel %vm1622_vm6, %v2575_v57, %v1637_v43  ;;  %v1789_v58 = vmul.f32 %v3917_v6, %v1651_v52  ;;  %v4073_v24 = vadd.f32 1.0, %v4058_v2 }
  0xf8   :  { %5527 = vst [vmem:[#allocation10_spill] sm:$0xff] %v4064_v17  ;;  %v4075_v48 = vpop.eup %2582  ;;  %v1653_v11 = vsel %vm1623_vm7, %v2577_v42, %v1638_v4  ;;  %v1790_v15 = vmul.f32 %v3921_v20, %v1652_v49  ;;  %v1803_v27 = vadd.f32 %v1788_v25, %v1787_v26  ;;  %v4081_v63 = vadd.f32 1.0, %v4064_v17 }
  0xf9   :  { %5529 = vst [vmem:[#allocation11_spill] sm:$0xff] %v4073_v24  ;;  %5530 = vst [vmem:[#allocation35_spill] sm:$0xff] %v4075_v48  ;;  %v4083_v28 = vpop.eup %2584  ;;  %v1791_v38 = vmul.f32 %v3927_v50, %v1653_v11  ;;  %v4087_v57 = vadd.f32 1.0, %v4075_v48  ;;  %2598 = vrcp.f32 %v4073_v24  ;;  %v1832_v43 = vadd.f32 %v1831_v45, %v1651_v52 }
  0xfa   :  { %5531 = vst [vmem:[#allocation16_spill] sm:$0xff] %v4081_v63  ;;  %5532 = vst [vmem:[#allocation13_spill] sm:$0xff] %v4083_v28  ;;  %v4090_v21 = vpop.eup %2586  ;;  %v1804_v34 = vadd.f32 %v1803_v27, %v1789_v58  ;;  %2600 = vrcp.f32 %v4081_v63  ;;  %v4094_v4 = vadd.f32 1.0, %v4083_v28  ;;  %v1452_v42 = vmul.f32 -0.5, %v3963_v32 }
  0xfb   :  { %5533 = vst [vmem:[#allocation21_spill] sm:$0xff] %v4087_v57  ;;  %5534 = vst [vmem:[#allocation15_spill] sm:$0xff] %v4090_v21  ;;  %v4097_v26 = vpop.eup %2588  ;;  %2602 = vrcp.f32 %v4087_v57  ;;  %v4102_v25 = vadd.f32 1.0, %v4090_v21  ;;  %v1833_v52 = vadd.f32 %v1832_v43, %v1652_v49  ;;  %v1455_v63 = vand.u32 2147483647, %v3963_v32 }
  0xfc   :  { %5535 = vst [vmem:[#allocation23_spill] sm:$0xff] %v4094_v4  ;;  %v2591_v45 = vpop.eup %2590  ;;  %v1805_v1 = vadd.f32 %v1804_v34, %v1790_v15  ;;  %v4106_v58 = vadd.f32 1.0, %v4097_v26  ;;  %2604 = vrcp.f32 %v4094_v4  ;;  %v1453_v57 = vadd.f32 1.0, %v1452_v42 }
  0xfd   :  { %5536 = vst [vmem:[#allocation19_spill] sm:$0xff] %v4102_v25  ;;  %v2593_v27 = vpop.eup %2592  ;;  %v1629_v41 = vmul.f32 %v2591_v45, %v4025_v19  ;;  %2606 = vrcp.f32 %v4102_v25  ;;  %v4117_v43 = vadd.f32 %v1833_v52, %v1653_v11  ;;  %v4140_v52 = vld [vmem:[#allocation4 + $0x8] sm:$0xff]  ;;  %vm4148_vm0 = vcmp.lt.f32.partialorder %v1455_v63, 0.0004427343 }
  0xfe   :  { %5537 = vst [vmem:[#allocation20_spill] sm:$0xff] %v4106_v58  ;;  %v4113_v49 = vpop.eup %2594  ;;  %v1806_v34 = vadd.f32 %v1805_v1, %v1791_v38  ;;  %v1630_v15 = vmul.f32 %v2593_v27, %v4029_v23  ;;  %2608 = vrcp.f32 %v4106_v58  ;;  %v1461_v1 = vmul.f32 -0.5, %v3970_v8  ;;  %v4132_v38 = vld [vmem:[#allocation4] sm:$0xff]  ;;  %5541 = vst [vmem:[#allocation36_spill] sm:$0xff] %v4140_v52 }
  0xff   :  { %v4119_v4 = vpop.eup %2596  ;;  %v1644_v24 = vsel %vm1614_vm8, %v2591_v45, %v1629_v41  ;;  %v4124_v10 = vadd.f32 1.0, %v4113_v49  ;;  %2610 = vlog2.f32 %v3973_v36  ;;  %5539 = vst [vmem:[#allocation28_spill] sm:$0xff] %v4132_v38  ;;  %v4145_v45 = vmul.f32 %v3963_v32, %v1453_v57 }
 0x100   :  { %1807 = vadd.xlane.f32.xlu0 %v1806_v34  ;;  %v1645_v11 = vsel %vm1615_vm9, %v2593_v27, %v1630_v15  ;;  %v1782_v42 = vmul.f32 %v4132_v38, %v1644_v24  ;;  %v4136_v41 = vadd.f32 1.0, %v4119_v4  ;;  %2612 = vlog2.f32 %v3983_v62  ;;  %v4235_v34 = vld [vmem:[#allocation4 + $0x70] sm:$0xff] }
 0x101   :  { %5538 = vst [vmem:[#allocation22_spill] sm:$0xff] %v4124_v10  ;;  %v1783_v36 = vmul.f32 %v4140_v52, %v1645_v11  ;;  %2614 = vrcp.f32 %v4124_v10  ;;  %v1462_v27 = vadd.f32 1.0, %v1461_v1  ;;  %v1464_v15 = vand.u32 2147483647, %v3970_v8 }
 0x102   :  { %5540 = vst [vmem:[#allocation34_spill] sm:$0xff] %v4136_v41  ;;  %2616 = vrcp.f32 %v4136_v41  ;;  %v1470_v62 = vmul.f32 -0.5, %v3980_v12  ;;  %v1473_v58 = vand.u32 2147483647, %v3980_v12  ;;  %v1825_v38 = vadd.f32 %v1645_v11, %v1644_v24 }
 0x103   :  { %v2599_v25 = vpop.eup %2598  ;;  %v1797_v52 = vadd.f32 %v1783_v36, %v1782_v42  ;;  %2618 = vlog2.f32 %v3993_v31  ;;  %v1479_v32 = vmul.f32 -0.5, %v3990_v47  ;;  %v4161_v1 = vmul.f32 %v3970_v8, %v1462_v27 }
 0x104   :  { %v2601_v57 = vpop.eup %2600  ;;  %v1631_v63 = vmul.f32 %v2599_v25, %v4058_v2  ;;  %vm4163_vm4 = vcmp.lt.f32.partialorder %v1464_v15, 0.0004427343  ;;  %v1471_v42 = vadd.f32 1.0, %v1470_v62  ;;  %vm4168_vm5 = vcmp.lt.f32.partialorder %v1473_v58, 0.0004427343 }
 0x105   :  { %v2603_v24 = vpop.eup %2602  ;;  %v1632_v11 = vmul.f32 %v2601_v57, %v4064_v17  ;;  %2620 = vlog2.f32 %v4010_v7  ;;  %v1480_v36 = vadd.f32 1.0, %v1479_v32  ;;  %v1482_v10 = vand.u32 2147483647, %v3990_v47 }
 0x106   :  { %v2605_v60 = vpop.eup %2604  ;;  %v1633_v8 = vmul.f32 %v2603_v24, %v4075_v48  ;;  %v1646_v27 = vsel %vm1616_vm10, %v2599_v25, %v1631_v63  ;;  %v4178_v15 = vmul.f32 %v3980_v12, %v1471_v42  ;;  %2622 = vlog2.f32 %v4015_v55  ;;  %v4189_v63 = vld [vmem:[#allocation4 + $0x18] sm:$0xff] }
 0x107   :  { %v2607_v58 = vpop.eup %2606  ;;  %v1647_v62 = vsel %vm1617_vm11, %v2601_v57, %v1632_v11  ;;  %v1784_v7 = vmul.f32 %v4183_v3, %v1646_v27  ;;  %v1826_v32 = vadd.f32 %v1825_v38, %v1646_v27  ;;  %v1639_v17 = vmul.f32 %v2605_v60, %v4083_v28  ;;  %5549 = vst [vmem:[#allocation43_spill] sm:$0xff] %v4189_v63  ;;  %v4196_v11 = vld [vmem:[#allocation4 + $0x20] sm:$0xff] }
 0x108   :  { %v2609_v48 = vpop.eup %2608  ;;  %v1648_v25 = vsel %vm1618_vm12, %v2603_v24, %v1633_v8  ;;  %v1785_v12 = vmul.f32 %v4189_v63, %v1647_v62  ;;  %v1640_v55 = vmul.f32 %v2607_v58, %v4090_v21  ;;  %v4194_v42 = vmul.f32 %v3990_v47, %v1480_v36 }
 0x109   :  { %v2611_v57 = vpop.eup %2610  ;;  %v1786_v38 = vmul.f32 %v4196_v11, %v1648_v25  ;;  %v1798_v27 = vadd.f32 %v1797_v52, %v1784_v7  ;;  %v1827_v28 = vadd.f32 %v1826_v32, %v1647_v62  ;;  %v1641_v3 = vmul.f32 %v2609_v48, %v4097_v26  ;;  %v4210_v62 = vld [vmem:[#allocation4 + $0x50] sm:$0xff] }
 0x10a   :  { %v2613_v18 = vpop.eup %2612  ;;  %v1654_v24 = vsel %vm1624_vm13, %v2605_v60, %v1639_v17  ;;  %v1655_v8 = vsel %vm1625_vm14, %v2607_v58, %v1640_v55  ;;  %v1451_v21 = vmul.f32 0.6931472, %v2611_v57  ;;  %vm4204_vm6 = vcmp.lt.f32.partialorder %v1482_v10, 0.0004427343  ;;  %5552 = vst [vmem:[#allocation44_spill] sm:$0xff] %v4210_v62  ;;  %v4214_v17 = vld [vmem:[#allocation4 + $0x58] sm:$0xff] }
 0x10b   :  { %v2615_v36 = vpop.eup %2614  ;;  %v1799_v63 = vadd.f32 %v1798_v27, %v1785_v12  ;;  %v1828_v61 = vadd.f32 %v1827_v28, %v1648_v25  ;;  %v1656_v52 = vsel %vm1626_vm15, %v2609_v48, %v1641_v3  ;;  %v1792_v7 = vmul.f32 %v4210_v62, %v1654_v24  ;;  %5553 = vst [vmem:[#allocation45_spill] sm:$0xff] %v4214_v17  ;;  %v4217_v58 = vld [vmem:[#allocation4 + $0x60] sm:$0xff] }
 0x10c   :  { %v2617_v32 = vpop.eup %2616  ;;  %v1642_v60 = vmul.f32 %v2615_v36, %v4113_v49  ;;  %v1793_v10 = vmul.f32 %v4214_v17, %v1655_v8  ;;  %v1794_v55 = vmul.f32 %v4217_v58, %v1656_v52  ;;  %v1837_v12 = vadd.f32 %v1655_v8, %v1654_v24 }
 0x10d   :  { %v2619_v28 = vpop.eup %2618  ;;  %v1800_v25 = vadd.f32 %v1799_v63, %v1786_v38  ;;  %1829 = vadd.xlane.f32.xlu0 %v1828_v61  ;;  %v1643_v48 = vmul.f32 %v2617_v32, %v4119_v4  ;;  %v1457_v3 = vsel %vm4148_vm0, %v4145_v45, %v1451_v21  ;;  %v1460_v57 = vmul.f32 0.6931472, %v2613_v18  ;;  %v4228_v63 = vld [vmem:[#allocation4 + $0x68] sm:$0xff] }
 0x10e   :  { %v1657_v27 = vsel %vm1627_vm1, %v2615_v36, %v1642_v60  ;;  %v1809_v62 = vadd.f32 %v1793_v10, %v1792_v7  ;;  %v1838_v17 = vadd.f32 %v1837_v12, %v1656_v52  ;;  %v1469_v30 = vmul.f32 0.6931472, %v2619_v28 }
 0x10f   :  { %v2621_v0 = vpop.eup %2620  ;;  %1801 = vadd.xlane.f32.xlu1 %v1800_v25  ;;  %v1658_v24 = vsel %vm1628_vm3, %v2617_v32, %v1643_v48  ;;  %v1795_v61 = vmul.f32 %v4228_v63, %v1657_v27  ;;  %v1466_v21 = vsel %vm4163_vm4, %v4161_v1, %v1460_v57  ;;  %v1488_v18 = vmul.f32 -0.5, %v4007_v9 }
 0x110   :  { %v2623_v45 = vpop.eup %2622  ;;  %v1796_v38 = vmul.f32 %v4235_v34, %v1658_v24  ;;  %v1810_v8 = vadd.f32 %v1809_v62, %v1794_v55  ;;  %v1839_v36 = vadd.f32 %v1838_v17, %v1657_v27  ;;  %v1475_v52 = vsel %vm4168_vm5, %v4178_v15, %v1469_v30 }
 0x111   :  { %v1478_v7 = vmul.f32 0.6931472, %v2621_v0  ;;  %v1487_v32 = vmul.f32 0.6931472, %v2623_v45  ;;  %v1489_v60 = vadd.f32 1.0, %v1488_v18  ;;  %v1544_v10 = vmax.f32 %v3834_v29, 0.0 }
 0x112   :  { %v1811_v41 = vadd.f32 %v1810_v8, %v1795_v61  ;;  %v1840_v1 = vadd.f32 %v1839_v36, %v1658_v24  ;;  %v1491_v12 = vand.u32 2147483647, %v4007_v9  ;;  %v1545_v28 = vmax.f32 %v3852_v46, 0.0 }
 0x113   :  { %v1484_v62 = vsel %vm4204_vm6, %v4194_v42, %v1478_v7  ;;  %v1490_v17 = vmul.f32 %v4007_v9, %v1489_v60  ;;  %v1546_v31 = vmax.f32 %v3879_v44, 0.0  ;;  %v1547_v0 = vmax.f32 %v3884_v40, 0.0 }
 0x114   :  { %v1812_v30 = vadd.f32 %v1811_v41, %v1796_v38  ;;  %1841 = vadd.xlane.f32.xlu0 %v1840_v1  ;;  %vm1492_vm7 = vcmp.lt.f32.partialorder %v1491_v12, 0.0004427343  ;;  %v1548_v15 = vmax.f32 %v3889_v54, 0.0  ;;  %v1559_v55 = vadd.f32 %v1544_v10, %v1457_v3  ;;  %v4258_v10 = vpop.xlane.xlu0 %548 }
 0x115   :  { %v1493_v25 = vsel %vm1492_vm7, %v1490_v17, %v1487_v32  ;;  %v1560_v48 = vadd.f32 %v1545_v28, %v1466_v21  ;;  %v1561_v57 = vadd.f32 %v1546_v31, %v1475_v52  ;;  %v1562_v27 = vadd.f32 %v1547_v0, %v1484_v62 }
 0x116   :  { %1813 = vadd.xlane.f32.xlu1 %v1812_v30  ;;  %v1563_v24 = vadd.f32 %v1548_v15, %v1493_v25  ;;  %v1574_v42 = vsub.f32 %v1559_v55, %v3834_v29  ;;  %v1694_v47 = vsub.f32 0.0, %v1559_v55  ;;  %2624 = vlog2.f32 %v4033_v13 }
 0x117   :  { %v1575_v9 = vsub.f32 %v1560_v48, %v3852_v46  ;;  %v1576_v61 = vsub.f32 %v1561_v57, %v3879_v44  ;;  %v1577_v18 = vsub.f32 %v1562_v27, %v3884_v40  ;;  %v1695_v45 = vsub.f32 0.0, %v1560_v48 }
 0x118   :  { %v1578_v3 = vsub.f32 %v1563_v24, %v3889_v54  ;;  %v1664_v38 = vsub.f32 0.0, %v1574_v42  ;;  %v1696_v21 = vsub.f32 0.0, %v1561_v57  ;;  %v1697_v8 = vsub.f32 0.0, %v1562_v27  ;;  %v4272_v27 = vpop.xlane.xlu1 %551 }
 0x119   :  { %v1665_v36 = vsub.f32 0.0, %v1575_v9  ;;  %v1666_v52 = vsub.f32 0.0, %v1576_v61  ;;  %v1667_v7 = vsub.f32 0.0, %v1577_v18  ;;  %v1698_v32 = vsub.f32 0.0, %v1563_v24  ;;  %v4277_v9 = vpop.xlane.xlu0 %506 }
 0x11a   :  { %1835 = vadd.xlane.f32.xlu1 %v4117_v43  ;;  %v1668_v29 = vsub.f32 0.0, %v1578_v3  ;;  %v1679_v13 = vmax.f32 %v1664_v38, -100.0  ;;  %v1709_v60 = vmax.f32 %v1694_v47, -100.0  ;;  %v1710_v46 = vmax.f32 %v1695_v45, -100.0 }
 0x11b   :  { %v1680_v44 = vmax.f32 %v1665_v36, -100.0  ;;  %v1681_v40 = vmax.f32 %v1666_v52, -100.0  ;;  %v1682_v41 = vmax.f32 %v1667_v7, -100.0  ;;  %v1711_v1 = vmax.f32 %v1696_v21, -100.0 }
 0x11c   :  { %v1683_v54 = vmax.f32 %v1668_v29, -100.0  ;;  %v1712_v12 = vmax.f32 %v1697_v8, -100.0  ;;  %v1713_v28 = vmax.f32 %v1698_v32, -100.0  ;;  %v1724_v62 = vmul.f32 %v3862_v56, %v1679_v13  ;;  %v5557_v13 = vld [vmem:[#allocation11_spill] sm:$0xff] }
 0x11d   :  { %v1725_v17 = vmul.f32 %v3910_v14, %v1680_v44  ;;  %v1726_v31 = vmul.f32 %v3917_v6, %v1681_v40  ;;  %v1727_v43 = vmul.f32 %v3921_v20, %v1682_v41  ;;  %v1739_v0 = vmul.f32 %v1709_v60, %v3865_v39  ;;  %v5558_v41 = vld [vmem:[#allocation16_spill] sm:$0xff] }
 0x11e   :  { %v1728_v30 = vmul.f32 %v3927_v50, %v1683_v54  ;;  %v1740_v15 = vmul.f32 %v1710_v46, %v3868_v5  ;;  %v1741_v55 = vmul.f32 %v1711_v1, %v3871_v22  ;;  %v1742_v25 = vmul.f32 %v1712_v12, %v3874_v37  ;;  %v5554_v50 = vld [vmem:[#allocation8_spill] sm:$0xff]  ;;  %v4293_v1 = vpop.xlane.xlu1 %530 }
 0x11f   :  { %v1743_v48 = vmul.f32 %v1713_v28, %v3894_v33  ;;  %v1754_v57 = vadd.f32 %v1739_v0, %v1724_v62  ;;  %v1407_v56 = vmul.f32 -0.5, %v4025_v19  ;;  %v1410_v14 = vand.u32 2147483647, %v4025_v19  ;;  %v5559_v62 = vld [vmem:[#allocation10_spill] sm:$0xff]  ;;  %v5560_v0 = vld [vmem:[#allocation21_spill] sm:$0xff] }
 0x120   :  { %v2625_v6 = vpop.eup %2624  ;;  %v1755_v20 = vadd.f32 %v1740_v15, %v1725_v17  ;;  %v1756_v24 = vadd.f32 %v1741_v55, %v1726_v31  ;;  %v1757_v42 = vadd.f32 %v1742_v25, %v1727_v43  ;;  %2626 = vlog2.f32 %v4037_v51  ;;  %v4299_v43 = vpop.xlane.xlu0 %554  ;;  %v5574_v33 = vld [vmem:[#allocation38_spill] sm:$0xff] }
 0x121   :  { %v1758_v61 = vadd.f32 %v1743_v48, %v1728_v30  ;;  %v1769_v18 = vsub.f32 0.0, %v1754_v57  ;;  %v1408_v45 = vadd.f32 1.0, %v1407_v56  ;;  %v1406_v52 = vmul.f32 0.6931472, %v2625_v6  ;;  %v5561_v30 = vld [vmem:[#allocation35_spill] sm:$0xff] }
 0x122   :  { %v1770_v21 = vsub.f32 0.0, %v1755_v20  ;;  %v1771_v8 = vsub.f32 0.0, %v1756_v24  ;;  %v1772_v36 = vsub.f32 0.0, %v1757_v42  ;;  %vm4283_vm8 = vcmp.lt.f32.partialorder %v1410_v14, 0.0004427343  ;;  %v5564_v20 = vld [vmem:[#allocation9_spill] sm:$0xff] }
 0x123   :  { %v1416_v7 = vmul.f32 -0.5, %v4029_v23  ;;  %v1773_v32 = vsub.f32 0.0, %v1758_v61  ;;  %2628 = vlog2.f32 %v5557_v13  ;;  %v1425_v60 = vmul.f32 -0.5, %v4058_v2 }
 0x124   :  { %v1862_v29 = vadd.f32 %v1770_v21, %v1769_v18  ;;  %v1409_v46 = vmul.f32 %v4025_v19, %v1408_v45  ;;  %v1419_v40 = vand.u32 2147483647, %v4029_v23  ;;  %2630 = vlog2.f32 %v5558_v41  ;;  %v5567_v21 = vld [vmem:[#allocation37_spill] sm:$0xff]  ;;  %v4340_v41 = vld [vmem:[#allocation2 + $0x20] sm:$0xff] }
 0x125   :  { %v1417_v44 = vadd.f32 1.0, %v1416_v7  ;;  %v1426_v12 = vadd.f32 1.0, %v1425_v60  ;;  %v1428_v28 = vand.u32 2147483647, %v4058_v2  ;;  %v1434_v17 = vmul.f32 -0.5, %v5559_v62  ;;  %v5572_v60 = vld [vmem:[#allocation30_spill] sm:$0xff] }
 0x126   :  { %v1863_v54 = vadd.f32 %v1862_v29, %v1771_v8  ;;  %v1437_v19 = vand.u32 2147483647, %v5559_v62  ;;  %2632 = vlog2.f32 %v5560_v0  ;;  %v1443_v15 = vmul.f32 -0.5, %v5561_v30  ;;  %v4330_v29 = vld [vmem:[#allocation2 + $0x10] sm:$0xff] }
 0x127   :  { %v1435_v48 = vadd.f32 1.0, %v1434_v17  ;;  %v1446_v57 = vand.u32 2147483647, %v5561_v30  ;;  %v1412_v56 = vsel %vm4283_vm8, %v1409_v46, %v1406_v52  ;;  %v1418_v14 = vmul.f32 %v4029_v23, %v1417_v44  ;;  %v4323_v52 = vld [vmem:[#allocation2 + $0x8] sm:$0xff] }
 0x128   :  { %v1864_v25 = vadd.f32 %v1863_v54, %v1772_v36  ;;  %vm4310_vm9 = vcmp.lt.f32.partialorder %v1419_v40, 0.0004427343  ;;  %v1539_v24 = vmax.f32 %v5564_v20, 0.0  ;;  %v1427_v18 = vmul.f32 %v4058_v2, %v1426_v12  ;;  %v4321_v36 = vld [vmem:[#allocation2] sm:$0xff]  ;;  %v4338_v40 = vld [vmem:[#allocation2 + $0x18] sm:$0xff]  ;;  %v5573_v12 = vld [vmem:[#allocation24_spill] sm:$0xff] }
 0x129   :  { %vm4316_vm10 = vcmp.lt.f32.partialorder %v1428_v28, 0.0004427343  ;;  %v1540_v8 = vmax.f32 %v5567_v21, 0.0  ;;  %v1436_v51 = vmul.f32 %v5559_v62, %v1435_v48  ;;  %vm4326_vm11 = vcmp.lt.f32.partialorder %v1437_v19, 0.0004427343 }
 0x12a   :  { %v2627_v42 = vpop.eup %2626  ;;  %v1865_v61 = vadd.f32 %v1864_v25, %v1773_v32  ;;  %v1444_v32 = vadd.f32 1.0, %v1443_v15  ;;  %vm4332_vm12 = vcmp.lt.f32.partialorder %v1446_v57, 0.0004427343  ;;  %v1541_v13 = vmax.f32 %v3945_v59, 0.0 }
 0x12b   :  { %v1415_v23 = vmul.f32 0.6931472, %v2627_v42  ;;  %v1542_v46 = vmax.f32 %v5572_v60, 0.0  ;;  %v1554_v44 = vadd.f32 %v1539_v24, %v1412_v56  ;;  %v1543_v28 = vmax.f32 %v5573_v12, 0.0 }
 0x12c   :  { %1866 = vadd.xlane.f32.xlu0 %v1865_v61  ;;  %v1896_v62 = vand.u32 2147483647, %v4321_v36  ;;  %v1897_v17 = vand.u32 2147483647, %v4323_v52  ;;  %v1898_v48 = vand.u32 2147483647, %v4330_v29  ;;  %v1445_v24 = vmul.f32 %v5561_v30, %v1444_v32 }
 0x12d   :  { %v1421_v54 = vsel %vm4310_vm9, %v1418_v14, %v1415_v23  ;;  %v2629_v19 = vpop.eup %2628  ;;  %v1569_v15 = vsub.f32 %v1554_v44, %v5564_v20  ;;  %v1689_v25 = vsub.f32 0.0, %v1554_v44  ;;  %v1899_v6 = vand.u32 2147483647, %v4338_v40 }
 0x12e   :  { %v1555_v0 = vadd.f32 %v1540_v8, %v1421_v54  ;;  %v2631_v57 = vpop.eup %2630  ;;  %v1424_v56 = vmul.f32 0.6931472, %v2629_v19  ;;  %v1900_v14 = vand.u32 2147483647, %v4340_v41  ;;  %v1911_v44 = vsub.f32 0.0, %v1896_v62 }
 0x12f   :  { %v1433_v42 = vmul.f32 0.6931472, %v2631_v57  ;;  %v1659_v23 = vsub.f32 0.0, %v1569_v15  ;;  %v1704_v8 = vmax.f32 %v1689_v25, -100.0  ;;  %v1912_v54 = vsub.f32 0.0, %v1897_v17  ;;  %v5576_v25 = vld [vmem:[#allocation36_spill] sm:$0xff] }
 0x130   :  { %v1570_v61 = vsub.f32 %v1555_v0, %v5567_v21  ;;  %v1690_v55 = vsub.f32 0.0, %v1555_v0  ;;  %v2633_v31 = vpop.eup %2632  ;;  %v1430_v20 = vsel %vm4316_vm10, %v1427_v18, %v1424_v56  ;;  %vm696_vm13 = vcmask 1042434   ;;  %v5577_v56 = vld [vmem:[#allocation39_spill] sm:$0xff] }
 0x131   :  { %v1439_v19 = vsel %vm4326_vm11, %v1436_v51, %v1433_v42  ;;  %v1442_v30 = vmul.f32 0.6931472, %v2633_v31  ;;  %v1556_v32 = vadd.f32 %v1541_v13, %v1430_v20  ;;  %v1674_v47 = vmax.f32 %v1659_v23, -100.0  ;;  %v5575_v31 = vld [vmem:[#allocation28_spill] sm:$0xff] }
 0x132   :  { %v1660_v38 = vsub.f32 0.0, %v1570_v61  ;;  %v1557_v3 = vadd.f32 %v1542_v46, %v1439_v19  ;;  %v1705_v57 = vmax.f32 %v1690_v55, -100.0  ;;  %v1734_v21 = vmul.f32 %v1704_v8, %v5574_v33  ;;  %v5578_v23 = vld [vmem:[#allocation40_spill] sm:$0xff] }
 0x133   :  { %v1448_v0 = vsel %vm4332_vm12, %v1445_v24, %v1442_v30  ;;  %v1571_v45 = vsub.f32 %v1556_v32, %v3945_v59  ;;  %v1691_v15 = vsub.f32 0.0, %v1556_v32  ;;  %v1719_v13 = vmul.f32 %v5575_v31, %v1674_v47  ;;  %v5579_v47 = vld [vmem:[#allocation41_spill] sm:$0xff]  ;;  %v5580_v32 = vld [vmem:[#allocation27_spill] sm:$0xff] }
 0x134   :  { %v1675_v18 = vmax.f32 %v1660_v38, -100.0  ;;  %v1558_v62 = vadd.f32 %v1543_v28, %v1448_v0  ;;  %v1572_v7 = vsub.f32 %v1557_v3, %v5572_v60  ;;  %v1692_v51 = vsub.f32 0.0, %v1557_v3 }
 0x135   :  { %v1661_v17 = vsub.f32 0.0, %v1571_v45  ;;  %v1706_v46 = vmax.f32 %v1691_v15, -100.0  ;;  %v1735_v42 = vmul.f32 %v1705_v57, %v5577_v56  ;;  %v1749_v28 = vadd.f32 %v1734_v21, %v1719_v13 }
 0x136   :  { %v1720_v55 = vmul.f32 %v5576_v25, %v1675_v18  ;;  %v1573_v2 = vsub.f32 %v1558_v62, %v5573_v12  ;;  %v1662_v24 = vsub.f32 0.0, %v1572_v7  ;;  %v1693_v61 = vsub.f32 0.0, %v1558_v62  ;;  %v5581_v12 = vld [vmem:[#allocation43_spill] sm:$0xff]  ;;  %v5582_v62 = vld [vmem:[#allocation42_spill] sm:$0xff] }
 0x137   :  { %v1707_v59 = vmax.f32 %v1692_v51, -100.0  ;;  %v1676_v38 = vmax.f32 %v1661_v17, -100.0  ;;  %v1736_v20 = vmul.f32 %v1706_v46, %v5578_v23  ;;  %v1764_v45 = vsub.f32 0.0, %v1749_v28 }
 0x138   :  { %v1750_v8 = vadd.f32 %v1735_v42, %v1720_v55  ;;  %v1663_v60 = vsub.f32 0.0, %v1573_v2  ;;  %v1677_v3 = vmax.f32 %v1662_v24, -100.0  ;;  %v1708_v19 = vmax.f32 %v1693_v61, -100.0 }
 0x139   :  { %v1737_v30 = vmul.f32 %v1707_v59, %v5579_v47  ;;  %v1721_v0 = vmul.f32 %v5580_v32, %v1676_v38  ;;  %v1913_v57 = vsub.f32 0.0, %v1898_v48  ;;  %v1914_v17 = vsub.f32 0.0, %v1899_v6 }
 0x13a   :  { %v1765_v18 = vsub.f32 0.0, %v1750_v8  ;;  %v1678_v15 = vmax.f32 %v1663_v60, -100.0  ;;  %v1722_v7 = vmul.f32 %v5581_v12, %v1677_v3  ;;  %v1738_v51 = vmul.f32 %v1708_v19, %v5582_v62  ;;  %v5587_v8 = vld [vmem:[#allocation14_spill] sm:$0xff]  ;;  %v510_v3 = vpop.xlane.xlu1 %509  ;;  %v4493_v62 = vld [vmem:[#allocation2 + $0x70] sm:$0xff] }
 0x13b   :  { %v1751_v56 = vadd.f32 %v1736_v20, %v1721_v0  ;;  %v1915_v21 = vsub.f32 0.0, %v1900_v14  ;;  %v1926_v13 = vmul.f32 1.442695, %v1911_v44  ;;  %v1928_v2 = vmul.f32 1.442695, %v1912_v54  ;;  %v5585_v44 = vld [vmem:[#allocation12_spill] sm:$0xff] }
 0x13c   :  { %v1856_v46 = vadd.f32 %v1765_v18, %v1764_v45  ;;  %v1723_v55 = vmul.f32 %v4196_v11, %v1678_v15  ;;  %v1752_v42 = vadd.f32 %v1737_v30, %v1722_v7  ;;  %v1930_v24 = vmul.f32 1.442695, %v1913_v57  ;;  %v534_v45 = vpop.xlane.xlu0 %533  ;;  %v5591_v7 = vld [vmem:[#allocation23_spill] sm:$0xff] }
 0x13d   :  { %v1766_v61 = vsub.f32 0.0, %v1751_v56  ;;  %2634 = vpow2.f32 %v1926_v13  ;;  %v1932_v59 = vmul.f32 1.442695, %v1914_v17  ;;  %v1934_v38 = vmul.f32 1.442695, %v1915_v21 }
 0x13e   :  { %v5583_v48 = vrot.slane %v4258_v10, %v5554_v50  ;;  %v5584_v28 = vrot.slane %v4272_v27, %v5554_v50  ;;  %v1753_v20 = vadd.f32 %v1738_v51, %v1723_v55  ;;  %v1767_v14 = vsub.f32 0.0, %v1752_v42  ;;  %v5592_v51 = vld [vmem:[#allocation15_spill] sm:$0xff] }
 0x13f   :  { %2636 = vpow2.f32 %v1928_v2  ;;  %v5586_v54 = vrot.slane %v4277_v9, %v5554_v50  ;;  %v5588_v60 = vrot.slane %v4293_v1, %v5554_v50  ;;  %v1857_v19 = vadd.f32 %v1856_v46, %v1766_v61  ;;  %v5590_v1 = vld [vmem:[#allocation13_spill] sm:$0xff]  ;;  %v5594_v61 = vld [vmem:[#allocation20_spill] sm:$0xff] }
 0x140   :  { %v715_v6 = vsel %vm694_vm2, %v5584_v28, %v5583_v48  ;;  %2638 = vpow2.f32 %v1930_v24  ;;  %vm698_vm14 = vcmask 1043459   ;;  %v613_v27 = vrot.slane %v510_v3, %v5554_v50  ;;  %v5595_v28 = vld [vmem:[#allocation22_spill] sm:$0xff] }
 0x141   :  { %v697_v56 = vsel %vm696_vm13, %v5586_v54, %v5585_v44  ;;  %v709_v10 = vsel %vm696_vm13, %v5588_v60, %v5587_v8  ;;  %v1768_v30 = vsub.f32 0.0, %v1753_v20  ;;  %2640 = vpow2.f32 %v1932_v59  ;;  %v4408_v59 = vpop.xlane.xlu1 %557  ;;  %v5596_v54 = vld [vmem:[#allocation34_spill] sm:$0xff]  ;;  %v2754_v60 = vld [vmem:[%s5261_s1 + $0x50] sm:$0xff] }
 0x142   :  { %v5589_v0 = vrot.slane %v4299_v43, %v5554_v50  ;;  %v1858_v18 = vadd.f32 %v1857_v19, %v1767_v14  ;;  %2642 = vpow2.f32 %v1934_v38  ;;  %v1497_v57 = vmul.f32 -0.5, %v5590_v1  ;;  %v5593_v43 = vld [vmem:[#allocation19_spill] sm:$0xff] }
 0x143   :  { %v645_v15 = vrot.slane %v534_v45, %v5554_v50  ;;  %2644 = vlog2.f32 %v5591_v7  ;;  %v1506_v17 = vmul.f32 -0.5, %v5592_v51  ;;  %v1515_v46 = vmul.f32 -0.5, %v4097_v26 }
 0x144   :  { %v4394_v9 = vsel %vm696_vm13, %v5589_v0, %v715_v6  ;;  %v1859_v21 = vadd.f32 %v1858_v18, %v1768_v30  ;;  %v1500_v13 = vand.u32 2147483647, %v5590_v1  ;;  %2646 = vlog2.f32 %v5593_v43 }
 0x145   :  { %v1509_v55 = vand.u32 2147483647, %v5592_v51  ;;  %v4405_v42 = vsel %vm698_vm14, %v613_v27, %v697_v56  ;;  %v1498_v2 = vadd.f32 1.0, %v1497_v57  ;;  %v1507_v24 = vadd.f32 1.0, %v1506_v17 }
 0x146   :  { %2648 = vlog2.f32 %v5594_v61  ;;  %1860 = vadd.xlane.f32.xlu1 %v1859_v21  ;;  %v1516_v38 = vadd.f32 1.0, %v1515_v46  ;;  %v1518_v48 = vand.u32 2147483647, %v4097_v26  ;;  %v1524_v6 = vmul.f32 -0.5, %v4113_v49 }
 0x147   :  { %2650 = vlog2.f32 %v5595_v28  ;;  %v4414_v20 = vsel %vm698_vm14, %v645_v15, %v709_v10  ;;  %v1527_v44 = vand.u32 2147483647, %v4113_v49  ;;  %v4420_v56 = vpop.eup %2634  ;;  %vm4422_vm2 = vcmp.lt.f32.partialorder %v1500_v13, 0.0004427343 }
 0x148   :  { %2652 = vlog2.f32 %v5596_v54  ;;  %vm4426_vm15 = vcmp.lt.f32.partialorder %v1509_v55, 0.0004427343  ;;  %v1525_v3 = vadd.f32 1.0, %v1524_v6  ;;  %v1533_v10 = vmul.f32 -0.5, %v4119_v4  ;;  %v5606_v55 = vld [vmem:[#allocation26_spill] sm:$0xff]  ;;  %v4480_v6 = vld [vmem:[#allocation2 + $0x58] sm:$0xff] }
 0x149   :  { %v4431_v19 = vpop.eup %2636  ;;  %v4434_v27 = vadd.f32 1.0, %v4420_v56  ;;  %v1499_v30 = vmul.f32 %v5590_v1, %v1498_v2  ;;  %v1508_v0 = vmul.f32 %v5592_v51, %v1507_v24  ;;  %v1536_v45 = vand.u32 2147483647, %v4119_v4  ;;  %v4468_v24 = vld [vmem:[#allocation2 + $0x50] sm:$0xff] }
 0x14a   :  { %v4439_v18 = vpop.eup %2638  ;;  %v4442_v57 = vadd.f32 1.0, %v4431_v19  ;;  %v1517_v15 = vmul.f32 %v4097_v26, %v1516_v38  ;;  %vm4445_vm0 = vcmp.lt.f32.partialorder %v1518_v48, 0.0004427343  ;;  %v1534_v17 = vadd.f32 1.0, %v1533_v10  ;;  %v5610_v48 = vld [vmem:[#allocation31_spill] sm:$0xff] }
 0x14b   :  { %v4449_v46 = vpop.eup %2640  ;;  %v4452_v1 = vadd.f32 1.0, %v4439_v18  ;;  %2654 = vrcp.f32 %v4434_v27  ;;  %vm4455_vm1 = vcmp.lt.f32.partialorder %v1527_v44, 0.0004427343  ;;  %v1549_v21 = vmax.f32 %v3968_v35, 0.0 }
 0x14c   :  { %v4460_v13 = vpop.eup %2642  ;;  %v4463_v26 = vadd.f32 1.0, %v4449_v46  ;;  %2656 = vrcp.f32 %v4442_v57  ;;  %v1526_v43 = vmul.f32 %v4113_v49, %v1525_v3  ;;  %v1550_v2 = vmax.f32 %v5606_v55, 0.0  ;;  %v4482_v49 = vld [vmem:[#allocation2 + $0x60] sm:$0xff] }
 0x14d   :  { %v2645_v61 = vpop.eup %2644  ;;  %v4471_v38 = vadd.f32 1.0, %v4460_v13  ;;  %2658 = vrcp.f32 %v4452_v1  ;;  %vm2166_vm3 = vcmp.ge.f32.partialorder %v4321_v36, 0.0  ;;  %vm4475_vm4 = vcmp.lt.f32.partialorder %v1536_v45, 0.0004427343  ;;  %v4488_v45 = vld [vmem:[#allocation2 + $0x68] sm:$0xff] }
 0x14e   :  { %5605 = vst [vmem:[#allocation8_spill] sm:$0xff] %v4463_v26  ;;  %v1551_v28 = vmax.f32 %v5610_v48, 0.0  ;;  %v2647_v44 = vpop.eup %2646  ;;  %2660 = vrcp.f32 %v4463_v26  ;;  %vm2167_vm5 = vcmp.ge.f32.partialorder %v4323_v52, 0.0  ;;  %v1496_v54 = vmul.f32 0.6931472, %v2645_v61 }
 0x14f   :  { %5607 = vst [vmem:[#allocation11_spill] sm:$0xff] %v4471_v38  ;;  %v1535_v3 = vmul.f32 %v4119_v4, %v1534_v17  ;;  %v1552_v10 = vmax.f32 %v3999_v16, 0.0  ;;  %2662 = vrcp.f32 %v4471_v38  ;;  %vm2168_vm6 = vcmp.ge.f32.partialorder %v4330_v29, 0.0 }
 0x150   :  { %v2649_v55 = vpop.eup %2648  ;;  %v1505_v48 = vmul.f32 0.6931472, %v2647_v44  ;;  %v1553_v14 = vmax.f32 %v4004_v53, 0.0  ;;  %vm2169_vm7 = vcmp.ge.f32.partialorder %v4338_v40, 0.0  ;;  %v1502_v16 = vsel %vm4422_vm2, %v1499_v30, %v1496_v54 }
 0x151   :  { %v2651_v23 = vpop.eup %2650  ;;  %v1514_v4 = vmul.f32 0.6931472, %v2649_v55  ;;  %vm2170_vm8 = vcmp.ge.f32.partialorder %v4340_v41, 0.0  ;;  %v1564_v38 = vadd.f32 %v1549_v21, %v1502_v16  ;;  %v5618_v17 = vand.u32 2147483647, %v4468_v24 }
 0x152   :  { %v2653_v33 = vpop.eup %2652  ;;  %v1511_v53 = vsel %vm4426_vm15, %v1508_v0, %v1505_v48  ;;  %v1523_v44 = vmul.f32 0.6931472, %v2651_v23  ;;  %vm700_vm9 = vcmask 1044484   ;;  %vm702_vm10 = vcmask 1045509  }
 0x153   :  { %v1520_v26 = vsel %vm4445_vm0, %v1517_v15, %v1514_v4  ;;  %v1532_v8 = vmul.f32 0.6931472, %v2653_v33  ;;  %v1565_v30 = vadd.f32 %v1550_v2, %v1511_v53  ;;  %v1579_v0 = vsub.f32 %v1564_v38, %v2754_v60  ;;  %v2755_v33 = vld [vmem:[%s5261_s1 + $0x58] sm:$0xff] }
 0x154   :  { %v1529_v55 = vsel %vm4455_vm1, %v1526_v43, %v1523_v44  ;;  %v1566_v61 = vadd.f32 %v1551_v28, %v1520_v26  ;;  %v1699_v23 = vsub.f32 0.0, %v1564_v38  ;;  %v2756_v26 = vld [vmem:[%s5261_s1 + $0x60] sm:$0xff]  ;;  %vm704_vm11 = vcmask 1046534  }
 0x155   :  { %v1538_v21 = vsel %vm4475_vm4, %v1535_v3, %v1532_v8  ;;  %v1567_v48 = vadd.f32 %v1552_v10, %v1529_v55  ;;  %v1580_v15 = vsub.f32 %v1565_v30, %v2755_v33  ;;  %v1700_v7 = vsub.f32 0.0, %v1565_v30  ;;  %v2655_v2 = vpop.eup %2654  ;;  %v2757_v3 = vld [vmem:[%s5261_s1 + $0x68] sm:$0xff]  ;;  %v4525_v8 = vpop.xlane.xlu0 %512  ;;  %v2758_v30 = vld [vmem:[%s5261_s1 + $0x70] sm:$0xff] }
 0x156   :  { %v1568_v51 = vadd.f32 %v1553_v14, %v1538_v21  ;;  %v1581_v43 = vsub.f32 %v1566_v61, %v2756_v26  ;;  %v1669_v28 = vsub.f32 0.0, %v1579_v0  ;;  %v1701_v16 = vsub.f32 0.0, %v1566_v61  ;;  %v2657_v38 = vpop.eup %2656  ;;  %v4531_v21 = vpop.xlane.xlu1 %536 }
 0x157   :  { %v2181_v35 = vmul.f32 %v2655_v2, %v4420_v56  ;;  %v1582_v10 = vsub.f32 %v1567_v48, %v2757_v3  ;;  %v1670_v4 = vsub.f32 0.0, %v1580_v15  ;;  %v1702_v53 = vsub.f32 0.0, %v1567_v48  ;;  %v2659_v44 = vpop.eup %2658 }
 0x158   :  { %v2182_v14 = vmul.f32 %v2657_v38, %v4431_v19  ;;  %v1583_v61 = vsub.f32 %v1568_v51, %v2758_v30  ;;  %v1671_v55 = vsub.f32 0.0, %v1581_v43  ;;  %v1684_v60 = vmax.f32 %v1669_v28, -100.0  ;;  %v2661_v0 = vpop.eup %2660 }
 0x159   :  { %v2183_v33 = vmul.f32 %v2659_v44, %v4439_v18  ;;  %v4536_v48 = vsel %vm2166_vm3, %v2655_v2, %v2181_v35  ;;  %v1672_v15 = vsub.f32 0.0, %v1582_v10  ;;  %v1685_v26 = vmax.f32 %v1670_v4, -100.0  ;;  %v2663_v3 = vpop.eup %2662 }
 0x15a   :  { %v2184_v54 = vmul.f32 %v2661_v0, %v4449_v46  ;;  %v4541_v47 = vsel %vm2167_vm5, %v2657_v38, %v2182_v14  ;;  %v2334_v43 = vmul.f32 %v5575_v31, %v4536_v48  ;;  %v1673_v28 = vsub.f32 0.0, %v1583_v61 }
 0x15b   :  { %v2185_v30 = vmul.f32 %v2663_v3, %v4460_v13  ;;  %v4548_v36 = vsel %vm2168_vm6, %v2659_v44, %v2183_v33  ;;  %v2335_v2 = vmul.f32 %v5576_v25, %v4541_v47  ;;  %v1686_v35 = vmax.f32 %v1671_v55, -100.0  ;;  %v4566_v55 = vpop.xlane.xlu0 %560 }
 0x15c   :  { %v4554_v10 = vsel %vm2169_vm7, %v2661_v0, %v2184_v54  ;;  %v2336_v52 = vmul.f32 %v5580_v32, %v4548_v36  ;;  %v1687_v38 = vmax.f32 %v1672_v15, -100.0  ;;  %v1688_v31 = vmax.f32 %v1673_v28, -100.0  ;;  %v5611_v15 = vld [vmem:[#allocation44_spill] sm:$0xff]  ;;  %v5612_v28 = vld [vmem:[#allocation45_spill] sm:$0xff] }
 0x15d   :  { %v4560_v4 = vsel %vm2170_vm8, %v2663_v3, %v2185_v30  ;;  %v2337_v29 = vmul.f32 %v5581_v12, %v4554_v10  ;;  %v2349_v44 = vadd.f32 %v2335_v2, %v2334_v43  ;;  %v1703_v14 = vsub.f32 0.0, %v1568_v51  ;;  %v4569_v3 = vpop.xlane.xlu1 %515  ;;  %v5614_v43 = vld [vmem:[#allocation18_spill] sm:$0xff] }
 0x15e   :  { %v2338_v25 = vmul.f32 %v4196_v11, %v4560_v4  ;;  %v1714_v40 = vmax.f32 %v1699_v23, -100.0  ;;  %v1715_v54 = vmax.f32 %v1700_v7, -100.0  ;;  %v1716_v61 = vmax.f32 %v1701_v16, -100.0  ;;  %v5613_v7 = vld [vmem:[#allocation17_spill] sm:$0xff] }
 0x15f   :  { %v2350_v32 = vadd.f32 %v2349_v44, %v2336_v52  ;;  %v1717_v0 = vmax.f32 %v1702_v53, -100.0  ;;  %v1718_v33 = vmax.f32 %v1703_v14, -100.0  ;;  %v1729_v41 = vmul.f32 %v5611_v15, %v1684_v60  ;;  %v5615_v52 = vld [vmem:[#allocation32_spill] sm:$0xff]  ;;  %v5616_v44 = vld [vmem:[#allocation33_spill] sm:$0xff] }
 0x160   :  { %v1730_v30 = vmul.f32 %v5612_v28, %v1685_v26  ;;  %v1731_v12 = vmul.f32 %v4217_v58, %v1686_v35  ;;  %v1732_v51 = vmul.f32 %v4228_v63, %v1687_v38  ;;  %v1733_v11 = vmul.f32 %v4235_v34, %v1688_v31  ;;  %v5617_v60 = vld [vmem:[#allocation29_spill] sm:$0xff]  ;;  %v4588_v28 = vpop.xlane.xlu0 %539 }
 0x161   :  { %v2351_v23 = vadd.f32 %v2350_v32, %v2337_v29  ;;  %v1744_v16 = vmul.f32 %v1714_v40, %v5613_v7  ;;  %v1745_v2 = vmul.f32 %v1715_v54, %v5614_v43  ;;  %v1746_v53 = vmul.f32 %v1716_v61, %v5615_v52 }
 0x162   :  { %v1747_v14 = vmul.f32 %v1717_v0, %v5616_v44  ;;  %v1748_v15 = vmul.f32 %v1718_v33, %v5617_v60  ;;  %v1921_v26 = vsub.f32 0.0, %v5618_v17  ;;  %v5619_v58 = vand.u32 2147483647, %v4480_v6 }
 0x163   :  { %v2352_v63 = vadd.f32 %v2351_v23, %v2338_v25  ;;  %v1759_v38 = vadd.f32 %v1744_v16, %v1729_v41  ;;  %v1760_v34 = vadd.f32 %v1745_v2, %v1730_v30  ;;  %v1761_v31 = vadd.f32 %v1746_v53, %v1731_v12  ;;  %v4592_v41 = vld [vmem:[#allocation2 + $0x28] sm:$0xff]  ;;  %v4594_v30 = vpop.xlane.xlu1 %563  ;;  %v4601_v16 = vld [vmem:[#allocation2 + $0x30] sm:$0xff] }
 0x164   :  { %v1922_v35 = vsub.f32 0.0, %v5619_v58  ;;  %v1762_v29 = vadd.f32 %v1747_v14, %v1732_v51  ;;  %v1763_v40 = vadd.f32 %v1748_v15, %v1733_v11  ;;  %v5620_v54 = vand.u32 2147483647, %v4482_v49 }
 0x165   :  { %v5621_v61 = vand.u32 2147483647, %v4488_v45  ;;  %2353 = vadd.xlane.f32.xlu0 %v2352_v63  ;;  %v1774_v33 = vsub.f32 0.0, %v1759_v38  ;;  %v1775_v17 = vsub.f32 0.0, %v1760_v34  ;;  %v1776_v60 = vsub.f32 0.0, %v1761_v31  ;;  %v4603_v63 = vld [vmem:[#allocation2 + $0x38] sm:$0xff] }
 0x166   :  { %v1923_v32 = vsub.f32 0.0, %v5620_v54  ;;  %v5622_v58 = vand.u32 2147483647, %v4493_v62  ;;  %v5623_v12 = vrot.slane %v4408_v59, %v5554_v50  ;;  %v1946_v11 = vmul.f32 1.442695, %v1921_v26  ;;  %v4611_v26 = vld [vmem:[#allocation2 + $0x48] sm:$0xff] }
 0x167   :  { %v1924_v0 = vsub.f32 0.0, %v5621_v61  ;;  %v1948_v23 = vmul.f32 1.442695, %v1922_v35  ;;  %v1777_v2 = vsub.f32 0.0, %v1762_v29  ;;  %v1868_v53 = vadd.f32 %v1775_v17, %v1774_v33 }
 0x168   :  { %v1925_v25 = vsub.f32 0.0, %v5622_v58  ;;  %v717_v51 = vsel %vm698_vm14, %v5623_v12, %v4394_v9  ;;  %v1950_v14 = vmul.f32 1.442695, %v1923_v32  ;;  %v617_v38 = vrot.slane %v4525_v8, %v5554_v50  ;;  %v4609_v9 = vld [vmem:[#allocation2 + $0x40] sm:$0xff] }
 0x169   :  { %v1952_v15 = vmul.f32 1.442695, %v1924_v0  ;;  %v649_v34 = vrot.slane %v4531_v21, %v5554_v50  ;;  %2664 = vpow2.f32 %v1946_v11  ;;  %v1778_v35 = vsub.f32 0.0, %v1763_v40  ;;  %v4618_v21 = vpop.xlane.xlu0 %518 }
 0x16a   :  { %v1954_v59 = vmul.f32 1.442695, %v1925_v25  ;;  %v1869_v31 = vadd.f32 %v1868_v53, %v1776_v60  ;;  %v681_v29 = vrot.slane %v4566_v55, %v5554_v50  ;;  %2666 = vpow2.f32 %v1948_v23  ;;  %v543_v60 = vpop.xlane.xlu1 %542 }
 0x16b   :  { %2668 = vpow2.f32 %v1950_v14  ;;  %v1901_v54 = vand.u32 2147483647, %v4592_v41  ;;  %v1902_v8 = vand.u32 2147483647, %v4601_v16  ;;  %v1903_v32 = vand.u32 2147483647, %v4603_v63 }
 0x16c   :  { %v1870_v61 = vadd.f32 %v1869_v31, %v1777_v2  ;;  %2670 = vpow2.f32 %v1952_v15  ;;  %v1904_v0 = vand.u32 2147483647, %v4609_v9  ;;  %v1905_v40 = vand.u32 2147483647, %v4611_v26 }
 0x16d   :  { %2672 = vpow2.f32 %v1954_v59  ;;  %v1916_v33 = vsub.f32 0.0, %v1901_v54  ;;  %v1917_v55 = vsub.f32 0.0, %v1902_v8  ;;  %v1918_v17 = vsub.f32 0.0, %v1903_v32 }
 0x16e   :  { %v1871_v58 = vadd.f32 %v1870_v61, %v1778_v35  ;;  %v621_v25 = vrot.slane %v4569_v3, %v5554_v50  ;;  %v1919_v12 = vsub.f32 0.0, %v1904_v0  ;;  %v1920_v11 = vsub.f32 0.0, %v1905_v40  ;;  %v567_v3 = vpop.xlane.xlu0 %566  ;;  %v522_v32 = vpop.xlane.xlu1 %521 }
 0x16f   :  { %v1936_v23 = vmul.f32 1.442695, %v1916_v33  ;;  %v1938_v53 = vmul.f32 1.442695, %v1917_v55  ;;  %v1940_v14 = vmul.f32 1.442695, %v1918_v17  ;;  %v653_v2 = vrot.slane %v4588_v28, %v5554_v50 }
 0x170   :  { %v701_v15 = vsel %vm700_vm9, %v617_v38, %v4405_v42  ;;  %v711_v59 = vsel %vm700_vm9, %v649_v34, %v4414_v20  ;;  %1872 = vadd.xlane.f32.xlu1 %v1871_v58  ;;  %v1942_v35 = vmul.f32 1.442695, %v1919_v12  ;;  %v1944_v31 = vmul.f32 1.442695, %v1920_v11 }
 0x171   :  { %2674 = vpow2.f32 %v1936_v23  ;;  %v718_v54 = vsel %vm700_vm9, %v681_v29, %v717_v51  ;;  %v685_v8 = vrot.slane %v4594_v30, %v5554_v50  ;;  %v2377_v28 = vadd.f32 %v4541_v47, %v4536_v48 }
 0x172   :  { %2676 = vpow2.f32 %v1938_v53  ;;  %v703_v20 = vsel %vm702_vm10, %v621_v25, %v701_v15  ;;  %v712_v38 = vsel %vm702_vm10, %v653_v2, %v711_v59  ;;  %v625_v47 = vrot.slane %v4618_v21, %v5554_v50  ;;  %v4669_v58 = vpop.xlane.xlu0 %545 }
 0x173   :  { %v4635_v42 = vpop.eup %2664  ;;  %2678 = vpow2.f32 %v1940_v14  ;;  %v2378_v30 = vadd.f32 %v2377_v28, %v4548_v36  ;;  %v657_v61 = vrot.slane %v543_v60, %v5554_v50  ;;  %v689_v0 = vrot.slane %v567_v3, %v5554_v50 }
 0x174   :  { %v4639_v34 = vpop.eup %2666  ;;  %v4642_v51 = vadd.f32 1.0, %v4635_v42  ;;  %2680 = vpow2.f32 %v1942_v35  ;;  %v719_v36 = vsel %vm702_vm10, %v685_v8, %v718_v54  ;;  %vm706_vm12 = vcmask 1047559  }
 0x175   :  { %5624 = vst [vmem:[#allocation16_spill] sm:$0xff] %v4639_v34  ;;  %v4647_v48 = vpop.eup %2668  ;;  %v4650_v29 = vadd.f32 1.0, %v4639_v34  ;;  %2682 = vpow2.f32 %v1944_v31  ;;  %v2379_v21 = vadd.f32 %v2378_v30, %v4554_v10  ;;  %v629_v60 = vrot.slane %v522_v32, %v5554_v50  ;;  %v4676_v10 = vpop.xlane.xlu1 %569 }
 0x176   :  { %5625 = vst [vmem:[#allocation10_spill] sm:$0xff] %v4647_v48  ;;  %v4654_v40 = vpop.eup %2670  ;;  %v4657_v33 = vadd.f32 1.0, %v4647_v48  ;;  %2684 = vrcp.f32 %v4642_v51  ;;  %vm2176_vm13 = vcmp.ge.f32.partialorder %v4468_v24, 0.0  ;;  %vm2177_vm14 = vcmp.ge.f32.partialorder %v4480_v6, 0.0 }
 0x177   :  { %5626 = vst [vmem:[#allocation21_spill] sm:$0xff] %v4650_v29  ;;  %5627 = vst [vmem:[#allocation35_spill] sm:$0xff] %v4654_v40  ;;  %v4662_v55 = vpop.eup %2672  ;;  %v4665_v17 = vadd.f32 1.0, %v4654_v40  ;;  %2686 = vrcp.f32 %v4650_v29  ;;  %v705_v12 = vsel %vm704_vm11, %v625_v47, %v703_v20  ;;  %v4682_v11 = vsel %vm704_vm11, %v657_v61, %v712_v38 }
 0x178   :  { %5628 = vst [vmem:[#allocation9_spill] sm:$0xff] %v4657_v33  ;;  %5629 = vst [vmem:[#allocation37_spill] sm:$0xff] %v4662_v55  ;;  %v4672_v25 = vadd.f32 1.0, %v4662_v55  ;;  %2688 = vrcp.f32 %v4657_v33  ;;  %v4685_v23 = vsel %vm704_vm11, %v689_v0, %v719_v36  ;;  %vm2178_vm2 = vcmp.ge.f32.partialorder %v4482_v49, 0.0 }
 0x179   :  { %5630 = vst [vmem:[#allocation30_spill] sm:$0xff] %v4665_v17  ;;  %2690 = vrcp.f32 %v4665_v17  ;;  %v4690_v53 = vadd.f32 %v2379_v21, %v4560_v4  ;;  %v4693_v14 = vsel %vm706_vm12, %v629_v60, %v705_v12  ;;  %vm2179_vm15 = vcmp.ge.f32.partialorder %v4488_v45, 0.0 }
 0x17a   :  { %5631 = vst [vmem:[#allocation24_spill] sm:$0xff] %v4672_v25  ;;  %2692 = vrcp.f32 %v4672_v25  ;;  %5632 = vst [vmem:[#allocation28_spill] sm:$0xff] %v4693_v14  ;;  %vm2180_vm0 = vcmp.ge.f32.partialorder %v4493_v62, 0.0  ;;  %v4722_v21 = vmul.f32 -0.5, %v4420_v56  ;;  %vm2171_vm1 = vcmp.ge.f32.partialorder %v4592_v41, 0.0 }
 0x17b   :  { %v4697_v15 = vpop.eup %2674  ;;  %2694 = vlog2.f32 %v4434_v27  ;;  %vm2172_vm3 = vcmp.ge.f32.partialorder %v4601_v16, 0.0  ;;  %vm2173_vm4 = vcmp.ge.f32.partialorder %v4603_v63, 0.0  ;;  %vm2174_vm5 = vcmp.ge.f32.partialorder %v4609_v9, 0.0 }
 0x17c   :  { %v4705_v3 = vpop.eup %2676  ;;  %v2001_v54 = vadd.f32 1.0, %v4697_v15  ;;  %v2004_v8 = vmul.f32 -0.5, %v4697_v15  ;;  %v2007_v30 = vand.u32 2147483647, %v4697_v15  ;;  %vm2175_vm6 = vcmp.ge.f32.partialorder %v4611_v26, 0.0 }
 0x17d   :  { %v4712_v20 = vpop.eup %2678  ;;  %v2010_v38 = vadd.f32 1.0, %v4705_v3  ;;  %v2013_v47 = vmul.f32 -0.5, %v4705_v3  ;;  %v2016_v2 = vand.u32 2147483647, %v4705_v3 }
 0x17e   :  { %v4718_v61 = vpop.eup %2680  ;;  %v2019_v0 = vadd.f32 1.0, %v4712_v20  ;;  %2696 = vrcp.f32 %v2001_v54  ;;  %v2005_v36 = vadd.f32 1.0, %v2004_v8  ;;  %v2022_v28 = vmul.f32 -0.5, %v4712_v20 }
 0x17f   :  { %v4724_v60 = vpop.eup %2682  ;;  %v2028_v12 = vadd.f32 1.0, %v4718_v61  ;;  %2698 = vrcp.f32 %v2010_v38  ;;  %v2014_v59 = vadd.f32 1.0, %v2013_v47  ;;  %v2025_v8 = vand.u32 2147483647, %v4712_v20 }
 0x180   :  { %v2685_v32 = vpop.eup %2684  ;;  %v2037_v27 = vadd.f32 1.0, %v4724_v60  ;;  %2700 = vrcp.f32 %v2019_v0  ;;  %v4735_v47 = vmul.f32 %v4697_v15, %v2005_v36  ;;  %v2023_v43 = vadd.f32 1.0, %v2022_v28  ;;  %v4751_v28 = vld [vmem:[#allocation4 + $0x50] sm:$0xff] }
 0x181   :  { %v2687_v4 = vpop.eup %2686  ;;  %v2191_v31 = vmul.f32 %v2685_v32, %v4635_v42  ;;  %2702 = vrcp.f32 %v2028_v12  ;;  %v4738_v35 = vmul.f32 %v4705_v3, %v2014_v59  ;;  %v2031_v59 = vmul.f32 -0.5, %v4718_v61  ;;  %5633 = vst [vmem:[#allocation36_spill] sm:$0xff] %v4751_v28 }
 0x182   :  { %v2689_v44 = vpop.eup %2688  ;;  %v2192_v52 = vmul.f32 %v2687_v4, %v4639_v34  ;;  %2704 = vrcp.f32 %v2037_v27  ;;  %vm4761_vm7 = vcmp.lt.f32.partialorder %v2007_v30, 0.0004427343  ;;  %vm4770_vm8 = vcmp.lt.f32.partialorder %v2016_v2, 0.0004427343  ;;  %v4784_v2 = vld [vmem:[#allocation4 + $0x70] sm:$0xff] }
 0x183   :  { %v2691_v7 = vpop.eup %2690  ;;  %v2193_v25 = vmul.f32 %v2689_v44, %v4647_v48  ;;  %v2206_v17 = vsel %vm2176_vm13, %v2685_v32, %v2191_v31  ;;  %2706 = vlog2.f32 %v2001_v54  ;;  %v4758_v54 = vld [vmem:[#allocation4 + $0x58] sm:$0xff]  ;;  %v4775_v49 = vmul.f32 %v4712_v20, %v2023_v43  ;;  %5641 = vst [vmem:[#allocation14_spill] sm:$0xff] %v4784_v2  ;;  %v4829_v48 = vld [vmem:[#allocation4 + $0x48] sm:$0xff] }
 0x184   :  { %v2693_v36 = vpop.eup %2692  ;;  %v2194_v33 = vmul.f32 %v2691_v7, %v4654_v40  ;;  %v2207_v34 = vsel %vm2177_vm14, %v2687_v4, %v2192_v52  ;;  %v2344_v29 = vmul.f32 %v4751_v28, %v2206_v17  ;;  %2708 = vlog2.f32 %v2010_v38  ;;  %5634 = vst [vmem:[#allocation27_spill] sm:$0xff] %v4758_v54  ;;  %v4767_v4 = vld [vmem:[#allocation4 + $0x60] sm:$0xff] }
 0x185   :  { %v2195_v24 = vmul.f32 %v2693_v36, %v4662_v55  ;;  %v2208_v31 = vsel %vm2178_vm2, %v2689_v44, %v2193_v25  ;;  %v2345_v32 = vmul.f32 %v4758_v54, %v2207_v34  ;;  %v2389_v40 = vadd.f32 %v2207_v34, %v2206_v17  ;;  %5637 = vst [vmem:[#allocation43_spill] sm:$0xff] %v4767_v4  ;;  %v4777_v44 = vpop.eup %2694  ;;  %v4781_v17 = vld [vmem:[#allocation4 + $0x68] sm:$0xff] }
 0x186   :  { %v2209_v52 = vsel %vm2179_vm15, %v2691_v7, %v2194_v33  ;;  %v2346_v38 = vmul.f32 %v4767_v4, %v2208_v31  ;;  %2710 = vlog2.f32 %v2019_v0  ;;  %5640 = vst [vmem:[#allocation12_spill] sm:$0xff] %v4781_v17  ;;  %vm4787_vm9 = vcmp.lt.f32.partialorder %v2025_v8, 0.0004427343  ;;  %v4862_v8 = vpop.xlane.xlu1 %1255 }
 0x187   :  { %v2210_v34 = vsel %vm2180_vm0, %v2693_v36, %v2195_v24  ;;  %v2347_v45 = vmul.f32 %v4781_v17, %v2209_v52  ;;  %v2361_v7 = vadd.f32 %v2345_v32, %v2344_v29  ;;  %v2390_v33 = vadd.f32 %v2389_v40, %v2208_v31 }
 0x188   :  { %v2697_v25 = vpop.eup %2696  ;;  %v2348_v30 = vmul.f32 %v4784_v2, %v2210_v34  ;;  %2712 = vlog2.f32 %v2028_v12  ;;  %v2032_v43 = vadd.f32 1.0, %v2031_v59  ;;  %v2034_v62 = vand.u32 2147483647, %v4718_v61 }
 0x189   :  { %v2699_v36 = vpop.eup %2698  ;;  %v2362_v24 = vadd.f32 %v2361_v7, %v2346_v38  ;;  %v2186_v4 = vmul.f32 %v2697_v25, %v4697_v15  ;;  %v2391_v17 = vadd.f32 %v2390_v33, %v2209_v52  ;;  %2714 = vlog2.f32 %v2037_v27  ;;  %v4810_v33 = vld [vmem:[#allocation4 + $0x28] sm:$0xff] }
 0x18a   :  { %v2701_v29 = vpop.eup %2700  ;;  %v2187_v40 = vmul.f32 %v2699_v36, %v4705_v3  ;;  %v4795_v31 = vmul.f32 %v4718_v61, %v2032_v43  ;;  %vm4797_vm10 = vcmp.lt.f32.partialorder %v2034_v62, 0.0004427343  ;;  %v2040_v12 = vmul.f32 -0.5, %v4724_v60 }
 0x18b   :  { %v2703_v59 = vpop.eup %2702  ;;  %v2363_v32 = vadd.f32 %v2362_v24, %v2347_v45  ;;  %v2188_v38 = vmul.f32 %v2701_v29, %v4712_v20  ;;  %v2201_v15 = vsel %vm2171_vm1, %v2697_v25, %v2186_v4  ;;  %v4805_v27 = vadd.f32 %v2391_v17, %v2210_v34  ;;  %v4816_v34 = vld [vmem:[#allocation4 + $0x30] sm:$0xff] }
 0x18c   :  { %v2705_v52 = vpop.eup %2704  ;;  %v2189_v3 = vmul.f32 %v2703_v59, %v4718_v61  ;;  %v2202_v7 = vsel %vm2172_vm3, %v2699_v36, %v2187_v40  ;;  %v2339_v43 = vmul.f32 %v4810_v33, %v2201_v15  ;;  %v2041_v62 = vadd.f32 1.0, %v2040_v12  ;;  %v4821_v36 = vld [vmem:[#allocation4 + $0x38] sm:$0xff] }
 0x18d   :  { %v2707_v2 = vpop.eup %2706  ;;  %v2364_v45 = vadd.f32 %v2363_v32, %v2348_v30  ;;  %v2190_v20 = vmul.f32 %v2705_v52, %v4724_v60  ;;  %v2203_v4 = vsel %vm2173_vm4, %v2701_v29, %v2188_v38  ;;  %v2340_v17 = vmul.f32 %v4816_v34, %v2202_v7  ;;  %v4826_v32 = vld [vmem:[#allocation4 + $0x40] sm:$0xff] }
 0x18e   :  { %v2709_v61 = vpop.eup %2708  ;;  %v2204_v25 = vsel %vm2174_vm5, %v2703_v59, %v2189_v3  ;;  %v2341_v24 = vmul.f32 %v4821_v36, %v2203_v4  ;;  %v2383_v40 = vadd.f32 %v2202_v7, %v2201_v15  ;;  %v2003_v12 = vmul.f32 0.6931472, %v2707_v2 }
 0x18f   :  { %2365 = vadd.xlane.f32.xlu0 %v2364_v45  ;;  %v2205_v30 = vsel %vm2175_vm6, %v2705_v52, %v2190_v20  ;;  %v2342_v29 = vmul.f32 %v4826_v32, %v2204_v25  ;;  %v2355_v38 = vadd.f32 %v2340_v17, %v2339_v43  ;;  %v2012_v54 = vmul.f32 0.6931472, %v2709_v61 }
 0x190   :  { %v2711_v55 = vpop.eup %2710  ;;  %v2343_v59 = vmul.f32 %v4829_v48, %v2205_v30  ;;  %v2384_v3 = vadd.f32 %v2383_v40, %v2203_v4  ;;  %v2009_v2 = vsel %vm4761_vm7, %v4735_v47, %v2003_v12  ;;  %v2042_v15 = vmul.f32 %v4724_v60, %v2041_v62 }
 0x191   :  { %v2356_v7 = vadd.f32 %v2355_v38, %v2341_v24  ;;  %v2018_v52 = vsel %vm4770_vm8, %v4738_v35, %v2012_v54  ;;  %v2021_v45 = vmul.f32 0.6931472, %v2711_v55  ;;  %v2043_v43 = vand.u32 2147483647, %v4724_v60 }
 0x192   :  { %v2713_v20 = vpop.eup %2712  ;;  %v2385_v17 = vadd.f32 %v2384_v3, %v2204_v25  ;;  %v5646_v61 = vmax.f32 %v4592_v41, 0.0  ;;  %v5647_v4 = vmax.f32 %v4601_v16, 0.0  ;;  %v4845_v47 = vmul.f32 0.6931472, %v4777_v44 }
 0x193   :  { %v2715_v6 = vpop.eup %2714  ;;  %v2357_v62 = vadd.f32 %v2356_v7, %v2342_v29  ;;  %v2027_v35 = vsel %vm4787_vm9, %v4775_v49, %v2021_v45  ;;  %v2030_v55 = vmul.f32 0.6931472, %v2713_v20  ;;  %vm2044_vm11 = vcmp.lt.f32.partialorder %v2043_v43, 0.0004427343 }
 0x194   :  { %v2111_v14 = vadd.f32 %v5646_v61, %v2009_v2  ;;  %v2112_v40 = vadd.f32 %v5647_v4, %v2018_v52  ;;  %v2386_v60 = vadd.f32 %v2385_v17, %v2205_v30  ;;  %v2039_v28 = vmul.f32 0.6931472, %v2715_v6 }
 0x195   :  { %v5648_v54 = vmax.f32 %v4603_v63, 0.0  ;;  %v2358_v12 = vadd.f32 %v2357_v62, %v2343_v59  ;;  %v2036_v44 = vsel %vm4797_vm10, %v4795_v31, %v2030_v55  ;;  %v5649_v49 = vmax.f32 %v4609_v9, 0.0  ;;  %v4864_v31 = vpop.xlane.xlu0 %1249 }
 0x196   :  { %v2126_v24 = vsub.f32 %v2111_v14, %v4592_v41  ;;  %v2127_v29 = vsub.f32 %v2112_v40, %v4601_v16  ;;  %v2246_v38 = vsub.f32 0.0, %v2111_v14  ;;  %2387 = vadd.xlane.f32.xlu0 %v2386_v60  ;;  %v2045_v0 = vsel %vm2044_vm11, %v2042_v15, %v2039_v28 }
 0x197   :  { %v2113_v25 = vadd.f32 %v5648_v54, %v2027_v35  ;;  %v2114_v3 = vadd.f32 %v5649_v49, %v2036_v44  ;;  %2359 = vadd.xlane.f32.xlu1 %v2358_v12  ;;  %v5650_v7 = vmax.f32 %v4611_v26, 0.0  ;;  %v2247_v52 = vsub.f32 0.0, %v2112_v40 }
 0x198   :  { %v2216_v2 = vsub.f32 0.0, %v2126_v24  ;;  %v2217_v59 = vsub.f32 0.0, %v2127_v29  ;;  %v2261_v61 = vmax.f32 %v2246_v38, -100.0  ;;  %2716 = vlog2.f32 %v4442_v57 }
 0x199   :  { %v2128_v30 = vsub.f32 %v2113_v25, %v4603_v63  ;;  %v2115_v41 = vadd.f32 %v5650_v7, %v2045_v0  ;;  %v2248_v45 = vsub.f32 0.0, %v2113_v25  ;;  %v2129_v16 = vsub.f32 %v2114_v3, %v4609_v9  ;;  %v4878_v38 = vpop.xlane.xlu0 %1261  ;;  %v5651_v0 = vld [vmem:[#allocation25_spill] sm:$0xff] }
 0x19a   :  { %v2231_v15 = vmax.f32 %v2216_v2, -100.0  ;;  %v2249_v43 = vsub.f32 0.0, %v2114_v3  ;;  %v2232_v63 = vmax.f32 %v2217_v59, -100.0  ;;  %v2262_v62 = vmax.f32 %v2247_v52, -100.0 }
 0x19b   :  { %v2218_v14 = vsub.f32 0.0, %v2128_v30  ;;  %v2130_v20 = vsub.f32 %v2115_v41, %v4611_v26  ;;  %v2250_v17 = vsub.f32 0.0, %v2115_v41  ;;  %v2219_v4 = vsub.f32 0.0, %v2129_v16  ;;  %2381 = vadd.xlane.f32.xlu1 %v4690_v53  ;;  %v4876_v53 = vpop.xlane.xlu1 %748 }
 0x19c   :  { %v2263_v35 = vmax.f32 %v2248_v45, -100.0  ;;  %v2264_v55 = vmax.f32 %v2249_v43, -100.0  ;;  %v2276_v28 = vmul.f32 %v4810_v33, %v2231_v15  ;;  %v2277_v54 = vmul.f32 %v4816_v34, %v2232_v63  ;;  %v5657_v43 = vld [vmem:[#allocation8_spill] sm:$0xff] }
 0x19d   :  { %v2233_v6 = vmax.f32 %v2218_v14, -100.0  ;;  %v2220_v40 = vsub.f32 0.0, %v2130_v20  ;;  %v2265_v60 = vmax.f32 %v2250_v17, -100.0  ;;  %v2234_v9 = vmax.f32 %v2219_v4, -100.0 }
 0x19e   :  { %v2291_v26 = vmul.f32 %v2261_v61, %v3865_v39  ;;  %v2292_v12 = vmul.f32 %v2262_v62, %v3868_v5  ;;  %v2293_v44 = vmul.f32 %v2263_v35, %v3871_v22  ;;  %v2294_v29 = vmul.f32 %v2264_v55, %v3874_v37 }
 0x19f   :  { %v2278_v25 = vmul.f32 %v4821_v36, %v2233_v6  ;;  %v2235_v24 = vmax.f32 %v2220_v40, -100.0  ;;  %v2279_v33 = vmul.f32 %v4826_v32, %v2234_v9  ;;  %v2295_v49 = vmul.f32 %v2265_v60, %v5651_v0  ;;  %2393 = vadd.xlane.f32.xlu1 %v4805_v27  ;;  %v4945_v0 = vld [vmem:[#allocation2 + $0x18] sm:$0xff] }
 0x1a0   :  { %v2306_v34 = vadd.f32 %v2291_v26, %v2276_v28  ;;  %v1960_v36 = vadd.f32 1.0, %v4722_v21  ;;  %v2307_v5 = vadd.f32 %v2292_v12, %v2277_v54  ;;  %v5652_v22 = vand.u32 2147483647, %v4420_v56  ;;  %v2769_v54 = vld [vmem:[#allocation2] sm:$0xff]  ;;  %v2770_v12 = vld [vmem:[#allocation2 + $0x8] sm:$0xff]  ;;  %v2774_v40 = vld [vmem:[#allocation4] sm:$0xff] }
 0x1a1   :  { %v2280_v39 = vmul.f32 %v4829_v48, %v2235_v24  ;;  %v2308_v3 = vadd.f32 %v2293_v44, %v2278_v25  ;;  %v2309_v30 = vadd.f32 %v2294_v29, %v2279_v33  ;;  %v1968_v27 = vmul.f32 -0.5, %v4431_v19  ;;  %v4942_v33 = vld [vmem:[#allocation2 + $0x10] sm:$0xff] }
 0x1a2   :  { %vm4887_vm13 = vcmp.lt.f32.partialorder %v5652_v22, 0.0004427343  ;;  %v2321_v2 = vsub.f32 0.0, %v2306_v34  ;;  %v1961_v32 = vmul.f32 %v4420_v56, %v1960_v36  ;;  %v2322_v21 = vsub.f32 0.0, %v2307_v5  ;;  %v2717_v29 = vpop.eup %2716 }
 0x1a3   :  { %v2310_v7 = vadd.f32 %v2295_v49, %v2280_v39  ;;  %v2323_v41 = vsub.f32 0.0, %v2308_v3  ;;  %v5655_v48 = vrot.slane %v4669_v58, %v5554_v50  ;;  %v5656_v52 = vrot.slane %v4676_v10, %v5554_v50  ;;  %v4917_v10 = vpop.xlane.xlu0 %754 }
 0x1a4   :  { %v1971_v57 = vand.u32 2147483647, %v4431_v19  ;;  %2718 = vlog2.f32 %v4452_v1  ;;  %v2324_v45 = vsub.f32 0.0, %v2309_v30  ;;  %v2414_v16 = vadd.f32 %v2322_v21, %v2321_v2  ;;  %v2773_v21 = vld [vmem:[#allocation2 + $0x20] sm:$0xff] }
 0x1a5   :  { %v4899_v59 = vsel %vm706_vm12, %v5655_v48, %v4682_v11  ;;  %v4906_v56 = vsel %vm706_vm12, %v5656_v52, %v4685_v23  ;;  %v1969_v14 = vadd.f32 1.0, %v1968_v27  ;;  %v1977_v15 = vmul.f32 -0.5, %v4439_v18  ;;  %v141_v23 = vpop.permute.xlu1 %140 }
 0x1a6   :  { %v1964_v58 = vsel %vm4887_vm13, %v1961_v32, %v4845_v47  ;;  %v1980_v11 = vand.u32 2147483647, %v4439_v18  ;;  %2720 = vlog2.f32 %v5657_v43  ;;  %v1986_v50 = vmul.f32 -0.5, %v4449_v46  ;;  %v5660_v47 = vld [vmem:[#allocation11_spill] sm:$0xff] }
 0x1a7   :  { %v2325_v20 = vsub.f32 0.0, %v2310_v7  ;;  %v2415_v1 = vadd.f32 %v2414_v16, %v2323_v41  ;;  %v1978_v63 = vadd.f32 1.0, %v1977_v15  ;;  %v1989_v17 = vand.u32 2147483647, %v4449_v46  ;;  %v143_v36 = vpop.permute.xlu0 %142  ;;  %v5668_v15 = vld [vmem:[#allocation21_spill] sm:$0xff] }
 0x1a8   :  { %vm4920_vm12 = vcmp.lt.f32.partialorder %v1971_v57, 0.0004427343  ;;  %v1987_v4 = vadd.f32 1.0, %v1986_v50  ;;  %2722 = vlog2.f32 %v5660_v47  ;;  %v1995_v6 = vmul.f32 -0.5, %v4460_v13  ;;  %v5667_v57 = vld [vmem:[#allocation28_spill] sm:$0xff] }
 0x1a9   :  { %v2416_v62 = vadd.f32 %v2415_v1, %v2324_v45  ;;  %v1970_v35 = vmul.f32 %v4431_v19, %v1969_v14  ;;  %vm4927_vm14 = vcmp.lt.f32.partialorder %v1980_v11, 0.0004427343  ;;  %v1998_v55 = vand.u32 2147483647, %v4460_v13  ;;  %v145_v39 = vpop.permute.xlu1 %144  ;;  %v5671_v1 = vld [vmem:[#allocation38_spill] sm:$0xff] }
 0x1aa   :  { %v1979_v60 = vmul.f32 %v4439_v18, %v1978_v63  ;;  %vm4933_vm2 = vcmp.lt.f32.partialorder %v1989_v17, 0.0004427343  ;;  %v1996_v9 = vadd.f32 1.0, %v1995_v6  ;;  %v2091_v25 = vmax.f32 %v2769_v54, 0.0 }
 0x1ab   :  { %v2417_v26 = vadd.f32 %v2416_v62, %v2325_v20  ;;  %v1988_v24 = vmul.f32 %v4449_v46, %v1987_v4  ;;  %vm4938_vm15 = vcmp.lt.f32.partialorder %v1998_v55, 0.0004427343  ;;  %v2092_v44 = vmax.f32 %v2770_v12, 0.0 }
 0x1ac   :  { %v2093_v18 = vmax.f32 %v4942_v33, 0.0  ;;  %v2094_v49 = vmax.f32 %v4945_v0, 0.0  ;;  %v2106_v34 = vadd.f32 %v2091_v25, %v1964_v58  ;;  %vm61_vm0 = vcmask 121856  }
 0x1ad   :  { %2418 = vadd.xlane.f32.xlu1 %v2417_v26  ;;  %v1967_v46 = vmul.f32 0.6931472, %v2717_v29  ;;  %vm149_vm1 = vcmask 97352   ;;  %vm725_vm3 = vcmask 121952   ;;  %v1997_v3 = vmul.f32 %v4460_v13, %v1996_v9 }
 0x1ae   :  { %v2719_v5 = vpop.eup %2718  ;;  %v2121_v22 = vsub.f32 %v2106_v34, %v2769_v54  ;;  %v2241_v37 = vsub.f32 0.0, %v2106_v34  ;;  %v2839_v30 = vmov 0.0   ;;  %2724 = vlog2.f32 %v4642_v51 }
 0x1af   :  { %62 = vst.msk [vmem:[%s5268_s8] sm:$0xff] %vm61_vm0, %v2839_v30  ;;  %63 = vst.msk [vmem:[%s5268_s8 + $0x8] sm:$0xff] %vm61_vm0, %v2839_v30  ;;  %v1973_v13 = vsel %vm4920_vm12, %v1970_v35, %v1967_v46  ;;  %v1976_v2 = vmul.f32 0.6931472, %v2719_v5  ;;  %v2049_v32 = vmul.f32 -0.5, %v4635_v42  ;;  %v2095_v41 = vmax.f32 %v2773_v21, 0.0 }
 0x1b0   :  { %64 = vst.msk [vmem:[%s5268_s8 + $0x10] sm:$0xff] %vm61_vm0, %v2839_v30  ;;  %v2052_v7 = vand.u32 2147483647, %v4635_v42  ;;  %v2721_v51 = vpop.eup %2720  ;;  %v2107_v27 = vadd.f32 %v2092_v44, %v1973_v13  ;;  %v2211_v48 = vsub.f32 0.0, %v2121_v22  ;;  %v2256_v52 = vmax.f32 %v2241_v37, -100.0  ;;  %v2775_v46 = vld [vmem:[#allocation4 + $0x8] sm:$0xff] }
 0x1b1   :  { %150 = vst.msk [vmem:[%s5268_s8] sm:$0xff] %vm149_vm1, %v141_v23  ;;  %151 = vst.msk [vmem:[%s5268_s8 + $0x8] sm:$0xff] %vm149_vm1, %v143_v36  ;;  %v1982_v45 = vsel %vm4927_vm14, %v1979_v60, %v1976_v2  ;;  %v1985_v16 = vmul.f32 0.6931472, %v2721_v51  ;;  %v2050_v14 = vadd.f32 1.0, %v2049_v32  ;;  %2726 = vlog2.f32 %v5668_v15  ;;  %v5672_v60 = vld [vmem:[#allocation16_spill] sm:$0xff] }
 0x1b2   :  { %152 = vst.msk [vmem:[%s5268_s8 + $0x10] sm:$0xff] %vm149_vm1, %v145_v39  ;;  %v2723_v58 = vpop.eup %2722  ;;  %v2108_v11 = vadd.f32 %v2093_v18, %v1982_v45  ;;  %v2122_v43 = vsub.f32 %v2107_v27, %v2770_v12  ;;  %v2226_v50 = vmax.f32 %v2211_v48, -100.0  ;;  %v2242_v23 = vsub.f32 0.0, %v2107_v27  ;;  %v5673_v12 = vld [vmem:[#allocation39_spill] sm:$0xff]  ;;  %v5675_v51 = vld [vmem:[#allocation41_spill] sm:$0xff] }
 0x1b3   :  { %726 = vst.msk [vmem:[%s5268_s8] sm:$0xff] %vm725_vm3, %v5667_v57  ;;  %727 = vst.msk [vmem:[%s5268_s8 + $0x8] sm:$0xff] %vm725_vm3, %v4899_v59  ;;  %vm1266_vm4 = vcmask 7168   ;;  %vm4993_vm5 = vcmp.lt.f32.partialorder %v2052_v7, 0.0004427343  ;;  %v2286_v63 = vmul.f32 %v2256_v52, %v5671_v1  ;;  %v5001_v17 = vmul.f32 %v4635_v42, %v2050_v14  ;;  %v2776_v2 = vld [vmem:[#allocation4 + $0x10] sm:$0xff] }
 0x1b4   :  { %728 = vst.msk [vmem:[%s5268_s8 + $0x10] sm:$0xff] %vm725_vm3, %v4906_v56  ;;  %v1991_v56 = vsel %vm4933_vm2, %v1988_v24, %v1985_v16  ;;  %v1994_v20 = vmul.f32 0.6931472, %v2723_v58  ;;  %v2123_v4 = vsub.f32 %v2108_v11, %v4942_v33  ;;  %v2212_v47 = vsub.f32 0.0, %v2122_v43  ;;  %v2777_v57 = vld [vmem:[#allocation4 + $0x18] sm:$0xff]  ;;  %v5676_v16 = vld [vmem:[#allocation42_spill] sm:$0xff] }
 0x1b5   :  { %v2109_v61 = vadd.f32 %v2094_v49, %v1991_v56  ;;  %v2243_v6 = vsub.f32 0.0, %v2108_v11  ;;  %v2257_v35 = vmax.f32 %v2242_v23, -100.0  ;;  %v2271_v55 = vmul.f32 %v2774_v40, %v2226_v50  ;;  %v2778_v50 = vld [vmem:[#allocation4 + $0x20] sm:$0xff] }
 0x1b6   :  { %v2000_v62 = vsel %vm4938_vm15, %v1997_v3, %v1994_v20  ;;  %v2058_v28 = vmul.f32 -0.5, %v5672_v60  ;;  %v2213_v25 = vsub.f32 0.0, %v2123_v4  ;;  %v2227_v26 = vmax.f32 %v2212_v47, -100.0 }
 0x1b7   :  { %v2110_v9 = vadd.f32 %v2095_v41, %v2000_v62  ;;  %v2124_v54 = vsub.f32 %v2109_v61, %v4945_v0  ;;  %v2244_v42 = vsub.f32 0.0, %v2109_v61  ;;  %v2258_v24 = vmax.f32 %v2243_v6, -100.0  ;;  %v5674_v0 = vld [vmem:[#allocation40_spill] sm:$0xff]  ;;  %v5678_v61 = vld [vmem:[#allocation10_spill] sm:$0xff] }
 0x1b8   :  { %v2287_v44 = vmul.f32 %v2257_v35, %v5673_v12  ;;  %v2301_v29 = vadd.f32 %v2286_v63, %v2271_v55  ;;  %v2725_v33 = vpop.eup %2724  ;;  %v2228_v19 = vmax.f32 %v2213_v25, -100.0  ;;  %v2272_v5 = vmul.f32 %v2775_v46, %v2227_v26  ;;  %v5677_v63 = vld [vmem:[#allocation9_spill] sm:$0xff]  ;;  %v5681_v55 = vld [vmem:[#allocation30_spill] sm:$0xff] }
 0x1b9   :  { %v2125_v18 = vsub.f32 %v2110_v9, %v2773_v21  ;;  %v2214_v49 = vsub.f32 0.0, %v2124_v54  ;;  %v2245_v34 = vsub.f32 0.0, %v2110_v9  ;;  %v2259_v39 = vmax.f32 %v2244_v42, -100.0  ;;  %v5682_v54 = vld [vmem:[#allocation35_spill] sm:$0xff]  ;;  %v5684_v12 = vld [vmem:[#allocation37_spill] sm:$0xff] }
 0x1ba   :  { %v1227_v36 = vld [vmem:[%s5268_s8] sm:$0xff]  ;;  %v2288_v3 = vmul.f32 %v2258_v24, %v5674_v0  ;;  %v2316_v22 = vsub.f32 0.0, %v2301_v29  ;;  %v2273_v32 = vmul.f32 %v2776_v2, %v2228_v19  ;;  %v2302_v41 = vadd.f32 %v2287_v44, %v2272_v5  ;;  %v5683_v24 = vld [vmem:[#allocation24_spill] sm:$0xff]  ;;  %v5042_v19 = vpop.xlane.xlu0 %760  ;;  %v1278_v0 = vpop.xlane.xlu1 %1277 }
 0x1bb   :  { %v2215_v37 = vsub.f32 0.0, %v2125_v18  ;;  %v2229_v30 = vmax.f32 %v2214_v49, -100.0  ;;  %v2260_v13 = vmax.f32 %v2245_v34, -100.0  ;;  %v2727_v7 = vpop.eup %2726  ;;  %v2289_v21 = vmul.f32 %v2259_v39, %v5675_v51  ;;  %v1228_v49 = vld [vmem:[%s5268_s8 + $0x8] sm:$0xff]  ;;  %v2780_v39 = vld [vmem:[#allocation2 + $0x58] sm:$0xff]  ;;  %v1229_v5 = vld [vmem:[%s5268_s8 + $0x10] sm:$0xff] }
 0x1bc   :  { %v1263_v27 = vadd.f32 %v4864_v31, %v1227_v36  ;;  %v2048_v48 = vmul.f32 0.6931472, %v2725_v33  ;;  %v2303_v15 = vadd.f32 %v2288_v3, %v2273_v32  ;;  %v2317_v58 = vsub.f32 0.0, %v2302_v41  ;;  %v2779_v33 = vld [vmem:[#allocation2 + $0x50] sm:$0xff] }
 0x1bd   :  { %v2230_v52 = vmax.f32 %v2215_v37, -100.0  ;;  %v2274_v45 = vmul.f32 %v2777_v57, %v2229_v30  ;;  %v2290_v14 = vmul.f32 %v2260_v13, %v5676_v16  ;;  %v2059_v43 = vadd.f32 1.0, %v2058_v28  ;;  %v2781_v13 = vld [vmem:[#allocation2 + $0x60] sm:$0xff] }
 0x1be   :  { %1267 = vst.msk [vmem:[%s5268_s8] sm:$0xff] %vm1266_vm4, %v1263_v27  ;;  %v2054_v11 = vsel %vm4993_vm5, %v5001_v17, %v2048_v48  ;;  %v2318_v56 = vsub.f32 0.0, %v2303_v15  ;;  %v2061_v20 = vand.u32 2147483647, %v5672_v60  ;;  %v2408_v1 = vadd.f32 %v2317_v58, %v2316_v22  ;;  %v2782_v15 = vld [vmem:[#allocation2 + $0x68] sm:$0xff] }
 0x1bf   :  { %v2275_v31 = vmul.f32 %v2778_v50, %v2230_v52  ;;  %v2304_v23 = vadd.f32 %v2289_v21, %v2274_v45  ;;  %2728 = vlog2.f32 %v5677_v63  ;;  %v2067_v4 = vmul.f32 -0.5, %v5678_v61 }
 0x1c0   :  { %v2057_v62 = vmul.f32 0.6931472, %v2727_v7  ;;  %v2060_v35 = vmul.f32 %v5672_v60, %v2059_v43  ;;  %v2409_v40 = vadd.f32 %v2408_v1, %v2318_v56  ;;  %vm5027_vm6 = vcmp.lt.f32.partialorder %v2061_v20, 0.0004427343 }
 0x1c1   :  { %v2305_v47 = vadd.f32 %v2290_v14, %v2275_v31  ;;  %v2319_v6 = vsub.f32 0.0, %v2304_v23  ;;  %v2070_v17 = vand.u32 2147483647, %v5678_v61  ;;  %2730 = vlog2.f32 %v5681_v55 }
 0x1c2   :  { %v2068_v9 = vadd.f32 1.0, %v2067_v4  ;;  %v2076_v25 = vmul.f32 -0.5, %v5682_v54  ;;  %v2079_v26 = vand.u32 2147483647, %v5682_v54  ;;  %2732 = vlog2.f32 %v5683_v24  ;;  %v2783_v4 = vld [vmem:[#allocation2 + $0x70] sm:$0xff] }
 0x1c3   :  { %v2320_v28 = vsub.f32 0.0, %v2305_v47  ;;  %v2410_v42 = vadd.f32 %v2409_v40, %v2319_v6  ;;  %v2085_v60 = vmul.f32 -0.5, %v5684_v12  ;;  %v2063_v44 = vsel %vm5027_vm6, %v2060_v35, %v2057_v62 }
 0x1c4   :  { %v2077_v29 = vadd.f32 1.0, %v2076_v25  ;;  %v2101_v18 = vmax.f32 %v2779_v33, 0.0  ;;  %vm5044_vm7 = vcmp.lt.f32.partialorder %v2070_v17, 0.0004427343  ;;  %v2102_v46 = vmax.f32 %v2780_v39, 0.0  ;;  %v1290_v17 = vpop.xlane.xlu1 %1289  ;;  %v5692_v25 = vld [vmem:[#allocation18_spill] sm:$0xff] }
 0x1c5   :  { %v2411_v34 = vadd.f32 %v2410_v42, %v2320_v28  ;;  %v2069_v3 = vmul.f32 %v5678_v61, %v2068_v9  ;;  %vm5052_vm8 = vcmp.lt.f32.partialorder %v2079_v26, 0.0004427343  ;;  %v2086_v37 = vadd.f32 1.0, %v2085_v60  ;;  %v5691_v9 = vld [vmem:[#allocation17_spill] sm:$0xff]  ;;  %v5693_v60 = vld [vmem:[#allocation36_spill] sm:$0xff] }
 0x1c6   :  { %v2088_v30 = vand.u32 2147483647, %v5684_v12  ;;  %v2103_v2 = vmax.f32 %v2781_v13, 0.0  ;;  %v2116_v32 = vadd.f32 %v2101_v18, %v2054_v11  ;;  %v2117_v7 = vadd.f32 %v2102_v46, %v2063_v44  ;;  %v1284_v11 = vpop.xlane.xlu0 %1283 }
 0x1c7   :  { %2412 = vadd.xlane.f32.xlu0 %v2411_v34  ;;  %v1264_v51 = vadd.f32 %v4862_v8, %v1228_v49  ;;  %v2078_v21 = vmul.f32 %v5682_v54, %v2077_v29  ;;  %v1265_v41 = vadd.f32 %v4878_v38, %v1229_v5  ;;  %vm1297_vm9 = vcmask 31768   ;;  %v1270_v8 = vld [vmem:[%s5268_s8] sm:$0xff] }
 0x1c8   :  { %v1291_v27 = vadd.f32 %v1278_v0, %v4876_v53  ;;  %v2131_v52 = vsub.f32 %v2116_v32, %v2779_v33  ;;  %v2132_v57 = vsub.f32 %v2117_v7, %v2780_v39  ;;  %v2251_v45 = vsub.f32 0.0, %v2116_v32  ;;  %v5694_v33 = vld [vmem:[#allocation27_spill] sm:$0xff] }
 0x1c9   :  { %v2729_v48 = vpop.eup %2728  ;;  %v2252_v16 = vsub.f32 0.0, %v2117_v7  ;;  %1268 = vst.msk [vmem:[%s5268_s8 + $0x8] sm:$0xff] %vm1266_vm4, %v1264_v51  ;;  %vm5068_vm10 = vcmp.lt.f32.partialorder %v2088_v30, 0.0004427343  ;;  %v2104_v58 = vmax.f32 %v2782_v15, 0.0  ;;  %1269 = vst.msk [vmem:[%s5268_s8 + $0x10] sm:$0xff] %vm1266_vm4, %v1265_v41  ;;  %v2087_v61 = vmul.f32 %v5684_v12, %v2086_v37 }
 0x1ca   :  { %v2066_v14 = vmul.f32 0.6931472, %v2729_v48  ;;  %v1294_v43 = vadd.f32 %v1291_v27, %v1270_v8  ;;  %v2221_v31 = vsub.f32 0.0, %v2131_v52  ;;  %v2222_v23 = vsub.f32 0.0, %v2132_v57  ;;  %v1309_v7 = vpop.xlane.xlu0 %1308  ;;  %v5695_v41 = vld [vmem:[#allocation32_spill] sm:$0xff]  ;;  %v5696_v8 = vld [vmem:[#allocation43_spill] sm:$0xff] }
 0x1cb   :  { %v2731_v50 = vpop.eup %2730  ;;  %v2266_v56 = vmax.f32 %v2251_v45, -100.0  ;;  %v2267_v20 = vmax.f32 %v2252_v16, -100.0  ;;  %v2105_v47 = vmax.f32 %v2783_v4, 0.0  ;;  %v1292_v59 = vadd.f32 %v1284_v11, %v4917_v10 }
 0x1cc   :  { %v2072_v1 = vsel %vm5044_vm7, %v2069_v3, %v2066_v14  ;;  %v2075_v63 = vmul.f32 0.6931472, %v2731_v50  ;;  %1298 = vst.msk [vmem:[%s5268_s8] sm:$0xff] %vm1297_vm9, %v1294_v43  ;;  %v2733_v6 = vpop.eup %2732  ;;  %v2236_v35 = vmax.f32 %v2221_v31, -100.0  ;;  %v2237_v40 = vmax.f32 %v2222_v23, -100.0  ;;  %v5698_v23 = vld [vmem:[#allocation12_spill] sm:$0xff] }
 0x1cd   :  { %v2118_v62 = vadd.f32 %v2103_v2, %v2072_v1  ;;  %v2084_v28 = vmul.f32 0.6931472, %v2733_v6  ;;  %v2296_v54 = vmul.f32 %v2266_v56, %v5691_v9  ;;  %v2297_v26 = vmul.f32 %v2267_v20, %v5692_v25  ;;  %v5699_v20 = vld [vmem:[#allocation29_spill] sm:$0xff] }
 0x1ce   :  { %v2081_v55 = vsel %vm5052_vm8, %v2078_v21, %v2075_v63  ;;  %v2281_v44 = vmul.f32 %v5693_v60, %v2236_v35  ;;  %v2282_v18 = vmul.f32 %v5694_v33, %v2237_v40  ;;  %vm1325_vm11 = vcmask 56368   ;;  %v1315_v35 = vpop.xlane.xlu1 %1314 }
 0x1cf   :  { %v2119_v42 = vadd.f32 %v2104_v58, %v2081_v55  ;;  %v2133_v24 = vsub.f32 %v2118_v62, %v2781_v13  ;;  %v2253_v12 = vsub.f32 0.0, %v2118_v62  ;;  %v2090_v29 = vsel %vm5068_vm10, %v2087_v61, %v2084_v28  ;;  %v5700_v61 = vld [vmem:[#allocation14_spill] sm:$0xff]  ;;  %v1321_v62 = vpop.xlane.xlu0 %1320 }
 0x1d0   :  { %v1293_v49 = vadd.f32 %v1290_v17, %v5042_v19  ;;  %v2120_v34 = vadd.f32 %v2105_v47, %v2090_v29  ;;  %v1271_v5 = vld [vmem:[%s5268_s8 + $0x8] sm:$0xff]  ;;  %v2311_v3 = vadd.f32 %v2296_v54, %v2281_v44  ;;  %v2312_v22 = vadd.f32 %v2297_v26, %v2282_v18  ;;  %v1272_v38 = vld [vmem:[%s5268_s8 + $0x10] sm:$0xff] }
 0x1d1   :  { %v2134_v36 = vsub.f32 %v2119_v42, %v2782_v15  ;;  %v2223_v39 = vsub.f32 0.0, %v2133_v24  ;;  %v2254_v46 = vsub.f32 0.0, %v2119_v42  ;;  %v2268_v0 = vmax.f32 %v2253_v12, -100.0  ;;  %v5697_v15 = vld [vmem:[#allocation33_spill] sm:$0xff] }
 0x1d2   :  { %v1295_v37 = vadd.f32 %v1292_v59, %v1271_v5  ;;  %v2135_v30 = vsub.f32 %v2120_v34, %v2783_v4  ;;  %v2255_v32 = vsub.f32 0.0, %v2120_v34  ;;  %v2326_v48 = vsub.f32 0.0, %v2311_v3  ;;  %v1802_v24 = vpop.xlane.xlu1 %1801 }
 0x1d3   :  { %v2224_v13 = vsub.f32 0.0, %v2134_v36  ;;  %v2238_v2 = vmax.f32 %v2223_v39, -100.0  ;;  %v1301_v51 = vld [vmem:[%s5268_s8] sm:$0xff]  ;;  %v2269_v21 = vmax.f32 %v2254_v46, -100.0  ;;  %v2298_v27 = vmul.f32 %v2268_v0, %v5695_v41  ;;  %v1808_v42 = vpop.xlane.xlu0 %1807 }
 0x1d4   :  { %v2327_v52 = vsub.f32 0.0, %v2312_v22  ;;  %1299 = vst.msk [vmem:[%s5268_s8 + $0x8] sm:$0xff] %vm1297_vm9, %v1295_v37  ;;  %v2225_v57 = vsub.f32 0.0, %v2135_v30  ;;  %v2270_v16 = vmax.f32 %v2255_v32, -100.0  ;;  %v1322_v43 = vadd.f32 %v1309_v7, %v1301_v51 }
 0x1d5   :  { %v2239_v45 = vmax.f32 %v2224_v13, -100.0  ;;  %v2283_v14 = vmul.f32 %v5696_v8, %v2238_v2  ;;  %v2299_v58 = vmul.f32 %v2269_v21, %v5697_v15  ;;  %v1296_v50 = vadd.f32 %v1293_v49, %v1272_v38 }
 0x1d6   :  { %v2420_v11 = vadd.f32 %v2327_v52, %v2326_v48  ;;  %v2240_v31 = vmax.f32 %v2225_v57, -100.0  ;;  %v2300_v1 = vmul.f32 %v2270_v16, %v5699_v20  ;;  %1326 = vst.msk [vmem:[%s5268_s8] sm:$0xff] %vm1325_vm11, %v1322_v43  ;;  %vm1818_vm13 = vcmask 15368   ;;  %v1814_v18 = vpop.xlane.xlu1 %1813 }
 0x1d7   :  { %v2284_v56 = vmul.f32 %v5698_v23, %v2239_v45  ;;  %v2313_v63 = vadd.f32 %v2298_v27, %v2283_v14  ;;  %1300 = vst.msk [vmem:[%s5268_s8 + $0x10] sm:$0xff] %vm1297_vm9, %v1296_v50  ;;  %v1830_v33 = vpop.xlane.xlu0 %1829  ;;  %vm1849_vm12 = vcmask 39968   ;;  %vm1877_vm14 = vcmask 64568  }
 0x1d8   :  { %v2285_v4 = vmul.f32 %v5700_v61, %v2240_v31  ;;  %v1843_v34 = vadd.f32 %v1830_v33, %v4876_v53  ;;  %vm2370_vm2 = vcmask 23568   ;;  %vm2401_vm15 = vcmask 48168  }
 0x1d9   :  { %v2314_v47 = vadd.f32 %v2299_v58, %v2284_v56  ;;  %v2328_v6 = vsub.f32 0.0, %v2313_v63  ;;  %vm2429_vm0 = vcmask 72768  }
 0x1da   :  { %v2315_v40 = vadd.f32 %v2300_v1, %v2285_v4  ;;  %v1836_v0 = vpop.xlane.xlu1 %1835 }
 0x1db   :  { %v2329_v59 = vsub.f32 0.0, %v2314_v47  ;;  %v2421_v17 = vadd.f32 %v2420_v11, %v2328_v6  ;;  %v1302_v55 = vld [vmem:[%s5268_s8 + $0x8] sm:$0xff]  ;;  %v1844_v3 = vadd.f32 %v1836_v0, %v4917_v10  ;;  %v1842_v22 = vpop.xlane.xlu0 %1841 }
 0x1dc   :  { %v1323_v28 = vadd.f32 %v1315_v35, %v1302_v55  ;;  %v2330_v9 = vsub.f32 0.0, %v2315_v40  ;;  %v1845_v13 = vadd.f32 %v1842_v22, %v5042_v19 }
 0x1dd   :  { %v2422_v54 = vadd.f32 %v2421_v17, %v2329_v59  ;;  %v1779_v12 = vld [vmem:[%s5268_s8] sm:$0xff] }
 0x1de   :  { %1327 = vst.msk [vmem:[%s5268_s8 + $0x8] sm:$0xff] %vm1325_vm11, %v1323_v28  ;;  %v1303_v26 = vld [vmem:[%s5268_s8 + $0x10] sm:$0xff]  ;;  %v1815_v44 = vadd.f32 %v1802_v24, %v1779_v12  ;;  %v1861_v32 = vpop.xlane.xlu1 %1860 }
 0x1df   :  { %v2423_v25 = vadd.f32 %v2422_v54, %v2330_v9  ;;  %v1324_v60 = vadd.f32 %v1321_v62, %v1303_v26  ;;  %v1867_v41 = vpop.xlane.xlu0 %1866 }
 0x1e0   :  { %1819 = vst.msk [vmem:[%s5268_s8] sm:$0xff] %vm1818_vm13, %v1815_v44 }
 0x1e1   :  { %2424 = vadd.xlane.f32.xlu0 %v2423_v25  ;;  %1328 = vst.msk [vmem:[%s5268_s8 + $0x10] sm:$0xff] %vm1325_vm11, %v1324_v60 }
 0x1e5   :  { %v1780_v29 = vld [vmem:[%s5268_s8 + $0x8] sm:$0xff] }
 0x1e6   :  { %v1816_v49 = vadd.f32 %v1808_v42, %v1780_v29 }
 0x1e7   :  { %v1822_v36 = vld [vmem:[%s5268_s8] sm:$0xff] }
 0x1e8   :  { %1820 = vst.msk [vmem:[%s5268_s8 + $0x8] sm:$0xff] %vm1818_vm13, %v1816_v49  ;;  %v1781_v39 = vld [vmem:[%s5268_s8 + $0x10] sm:$0xff]  ;;  %v1846_v46 = vadd.f32 %v1843_v34, %v1822_v36 }
 0x1e9   :  { %v1817_v5 = vadd.f32 %v1814_v18, %v1781_v39 }
 0x1ea   :  { %1850 = vst.msk [vmem:[%s5268_s8] sm:$0xff] %vm1849_vm12, %v1846_v46 }
 0x1eb   :  { %1821 = vst.msk [vmem:[%s5268_s8 + $0x10] sm:$0xff] %vm1818_vm13, %v1817_v5 }
 0x1ef   :  { %v1823_v37 = vld [vmem:[%s5268_s8 + $0x8] sm:$0xff] }
 0x1f0   :  { %v1847_v30 = vadd.f32 %v1844_v3, %v1823_v37 }
 0x1f1   :  { %v1853_v7 = vld [vmem:[%s5268_s8] sm:$0xff] }
 0x1f2   :  { %1851 = vst.msk [vmem:[%s5268_s8 + $0x8] sm:$0xff] %vm1849_vm12, %v1847_v30  ;;  %v1824_v2 = vld [vmem:[%s5268_s8 + $0x10] sm:$0xff]  ;;  %v1874_v21 = vadd.f32 %v1861_v32, %v1853_v7  ;;  %v2354_v52 = vpop.xlane.xlu0 %2353 }
 0x1f3   :  { %v1848_v51 = vadd.f32 %v1845_v13, %v1824_v2 }
 0x1f4   :  { %1878 = vst.msk [vmem:[%s5268_s8] sm:$0xff] %vm1877_vm14, %v1874_v21 }
 0x1f5   :  { %1852 = vst.msk [vmem:[%s5268_s8 + $0x10] sm:$0xff] %vm1849_vm12, %v1848_v51 }
 0x1f9   :  { %v1854_v27 = vld [vmem:[%s5268_s8 + $0x8] sm:$0xff] }
 0x1fa   :  { %v1875_v48 = vadd.f32 %v1867_v41, %v1854_v27 }
 0x1fb   :  { %v2331_v57 = vld [vmem:[%s5268_s8] sm:$0xff] }
 0x1fc   :  { %1879 = vst.msk [vmem:[%s5268_s8 + $0x8] sm:$0xff] %vm1877_vm14, %v1875_v48  ;;  %v1855_v45 = vld [vmem:[%s5268_s8 + $0x10] sm:$0xff]  ;;  %v2367_v16 = vadd.f32 %v2354_v52, %v2331_v57 }
 0x1fd   :  { %v1873_v8 = vpop.xlane.xlu1 %1872 }
 0x1fe   :  { %2371 = vst.msk [vmem:[%s5268_s8] sm:$0xff] %vm2370_vm2, %v2367_v16  ;;  %v1876_v14 = vadd.f32 %v1873_v8, %v1855_v45 }
 0x200   :  { %1880 = vst.msk [vmem:[%s5268_s8 + $0x10] sm:$0xff] %vm1877_vm14, %v1876_v14 }
 0x203   :  { %v2332_v11 = vld [vmem:[%s5268_s8 + $0x8] sm:$0xff] }
 0x205   :  { %v2374_v23 = vld [vmem:[%s5268_s8] sm:$0xff] }
 0x207   :  { %v2333_v38 = vld [vmem:[%s5268_s8 + $0x10] sm:$0xff] }
 0x21c   :  { %v2366_v15 = vpop.xlane.xlu0 %2365 }
 0x21d   :  { %v2369_v58 = vadd.f32 %v2366_v15, %v2333_v38 }
 0x21f   :  { %2373 = vst.msk [vmem:[%s5268_s8 + $0x10] sm:$0xff] %vm2370_vm2, %v2369_v58 }
 0x223   :  { %v2388_v20 = vpop.xlane.xlu0 %2387 }
 0x224   :  { %v2360_v43 = vpop.xlane.xlu1 %2359  ;;  %v2396_v4 = vadd.f32 %v2388_v20, %v4917_v10 }
 0x225   :  { %v2368_v50 = vadd.f32 %v2360_v43, %v2332_v11 }
 0x226   :  { %v2376_v61 = vld [vmem:[%s5268_s8 + $0x10] sm:$0xff] }
 0x227   :  { %2372 = vst.msk [vmem:[%s5268_s8 + $0x8] sm:$0xff] %vm2370_vm2, %v2368_v50 }
 0x228   :  { %v2382_v31 = vpop.xlane.xlu1 %2381 }
 0x229   :  { %v2395_v56 = vadd.f32 %v2382_v31, %v4876_v53 }
 0x22b   :  { %v2398_v1 = vadd.f32 %v2395_v56, %v2374_v23 }
 0x22c   :  { %v2394_v63 = vpop.xlane.xlu1 %2393 }
 0x22d   :  { %2402 = vst.msk [vmem:[%s5268_s8] sm:$0xff] %vm2401_vm15, %v2398_v1  ;;  %v2397_v47 = vadd.f32 %v2394_v63, %v5042_v19 }
 0x22e   :  { %v2375_v53 = vld [vmem:[%s5268_s8 + $0x8] sm:$0xff] }
 0x22f   :  { %v2399_v6 = vadd.f32 %v2396_v4, %v2375_v53  ;;  %v2400_v62 = vadd.f32 %v2397_v47, %v2376_v61 }
 0x231   :  { %2403 = vst.msk [vmem:[%s5268_s8 + $0x8] sm:$0xff] %vm2401_vm15, %v2399_v6  ;;  %2404 = vst.msk [vmem:[%s5268_s8 + $0x10] sm:$0xff] %vm2401_vm15, %v2400_v62 }
 0x234   :  { %v2405_v40 = vld [vmem:[%s5268_s8] sm:$0xff] }
 0x238   :  { %v2406_v19 = vld [vmem:[%s5268_s8 + $0x8] sm:$0xff]  ;;  %v2407_v55 = vld [vmem:[%s5268_s8 + $0x10] sm:$0xff] }
 0x23a   :  { %v2419_v10 = vpop.xlane.xlu1 %2418 }
 0x23b   :  { %v2427_v35 = vadd.f32 %v2419_v10, %v2406_v19 }
 0x23d   :  { %2431 = vst.msk [vmem:[%s5268_s8 + $0x8] sm:$0xff] %vm2429_vm0, %v2427_v35 }
 0x254   :  { %v2413_v59 = vpop.xlane.xlu0 %2412 }
 0x255   :  { %v2426_v17 = vadd.f32 %v2413_v59, %v2405_v40 }
 0x257   :  { %2430 = vst.msk [vmem:[%s5268_s8] sm:$0xff] %vm2429_vm0, %v2426_v17 }
 0x26e   :  { %v2425_v28 = vpop.xlane.xlu0 %2424 }
 0x26f   :  { %v2428_v9 = vadd.f32 %v2425_v28, %v2407_v55 }
 0x271   :  { %2432 = vst.msk [vmem:[%s5268_s8 + $0x10] sm:$0xff] %vm2429_vm0, %v2428_v9 }
 0x272   :  { %2437 = vsyncpa [#allocation3], 1 }
 0x273   :  { %2438 = vsyncpa [#allocation5], 1 }

</bundles_post_ra>
